<compile_context>
chip_gen: v6e
topology: v6e:2x2x1
jax: 0.10.0
libtpu: 0.0.40
codegen_flags: <defaults>
</compile_context>

<pallas_src>
import math
import jax
import jax.numpy as jnp
from jax.experimental import pallas as pl
from jax.experimental.pallas import tpu as pltpu


# ----------------------------------------------------------------------------
# Pallas kernels
# ----------------------------------------------------------------------------
def _mm_bias_relu_kernel(x_ref, w_ref, b_ref, o_ref):
    # x: (tm, K) bf16, w: (K, Cout) bf16, b: (1, Cout) f32, o: (tm, Cout) f32
    acc = jnp.dot(x_ref[...], w_ref[...], preferred_element_type=jnp.float32)
    o_ref[...] = jnp.maximum(acc + b_ref[...], 0.0).astype(o_ref.dtype)


def _conv3x3_bn_relu_kernel(xp_ref, w_ref, b_ref, o_ref):
    # xp: (1, H+2, W+2, Cin) f32 (zero-padded halo)
    # w : (9, Cin, Cout) bf16, tap order (kh, kw)
    # b : (1, Cout) f32
    # o : (1, H, W, Cout) f32
    H, W, Cout = o_ref.shape[1], o_ref.shape[2], o_ref.shape[3]
    Cin = xp_ref.shape[3]
    xv = xp_ref[...]
    acc = jnp.zeros((H * W, Cout), jnp.float32)
    # 9-tap accumulation (static unroll): 9 small bf16 MXU matmuls, f32 acc.
    for t in range(9):
        dh, dw = t // 3, t % 3
        tap = xv[:, dh:dh + H, dw:dw + W, :].reshape(H * W, Cin)
        acc = acc + jnp.dot(tap.astype(jnp.bfloat16), w_ref[t],
                            preferred_element_type=jnp.float32)
    y = jnp.maximum(acc + b_ref[...], 0.0)
    o_ref[...] = y.reshape(1, H, W, Cout).astype(o_ref.dtype)


def _maxpool_conv1x1_kernel(xp_ref, w_ref, b_ref, o_ref):
    # xp: (1, H+2, W+2, C) f32 padded with -inf
    # w : (C, Cout) bf16, b: (1, Cout) f32, o: (1, H, W, Cout) f32
    H, W, Cout = o_ref.shape[1], o_ref.shape[2], o_ref.shape[3]
    C = xp_ref.shape[3]
    x = xp_ref[...]
    # Separable 3x3 max: 2 max ops over W-shifts, then 2 over H-shifts (f32 VPU).
    mw = jnp.maximum(jnp.maximum(x[:, :, 0:W, :], x[:, :, 1:W + 1, :]),
                     x[:, :, 2:W + 2, :])                      # (1, H+2, W, C)
    mp = jnp.maximum(jnp.maximum(mw[:, 0:H], mw[:, 1:H + 1]),
                     mw[:, 2:H + 2])                           # (1, H, W, C)
    p2 = mp.reshape(H * W, C).astype(jnp.bfloat16)
    y = jnp.dot(p2, w_ref[...], preferred_element_type=jnp.float32)
    o_ref[...] = jnp.maximum(y + b_ref[...], 0.0).reshape(1, H, W, Cout).astype(o_ref.dtype)


# ----------------------------------------------------------------------------
# Wrappers around pallas_call
# ----------------------------------------------------------------------------
def _pick_tm(M):
    """Tile that divides M (no tail-pad copy), big enough that per-step pipeline
    overhead is amortized, while still giving >=2 parallel grid steps so both
    v7x TensorCores get work."""
    for tm in (1024, 512, 256, 128):
        if M % tm == 0 and M // tm >= 2:
            return tm
    if M % 8 == 0 and M <= 2048:
        return M            # single big tile
    return 512              # fall back to padding the ragged tail


def mm_bias_relu(x, w, b):
    """relu(x @ w + b). x: (M, K) f32, w: (K, Cout) f32, b: (Cout,) f32."""
    M, K = x.shape
    Kw, Cout = w.shape
    assert K == Kw
    x_bf = x.astype(jnp.bfloat16)          # bf16 MXU operands, f32 epilogue
    w_bf = w.astype(jnp.bfloat16)
    b2 = b.reshape(1, Cout).astype(jnp.float32)

    tm = _pick_tm(M)
    Mp = pl.cdiv(M, tm) * tm
    if Mp != M:
        x_bf = jnp.pad(x_bf, ((0, Mp - M), (0, 0)))

    out = pl.pallas_call(
        _mm_bias_relu_kernel,
        out_shape=jax.ShapeDtypeStruct((Mp, Cout), jnp.float32),
        grid=(Mp // tm,),
        in_specs=[
            pl.BlockSpec((tm, K), lambda i: (i, 0)),
            pl.BlockSpec((K, Cout), lambda i: (0, 0)),
            pl.BlockSpec((1, Cout), lambda i: (0, 0)),
        ],
        out_specs=pl.BlockSpec((tm, Cout), lambda i: (i, 0)),
        compiler_params=pltpu.CompilerParams(dimension_semantics=("parallel",)),
    )(x_bf, w_bf, b2)
    return out if Mp == M else out[:M]


def conv3x3_bn_relu(x_nhwc, w, b):
    """3x3 conv (pad=1, stride=1) + folded BN + ReLU. w: (3,3,Cin,Cout), b: (Cout,)."""
    N, H, W, C = x_nhwc.shape
    Cout = w.shape[-1]
    xp = jnp.pad(x_nhwc, ((0, 0), (1, 1), (1, 1), (0, 0)))      # zero halo
    w9 = w.reshape(9, C, Cout).astype(jnp.bfloat16)
    b2 = b.reshape(1, Cout).astype(jnp.float32)
    return pl.pallas_call(
        _conv3x3_bn_relu_kernel,
        out_shape=jax.ShapeDtypeStruct((N, H, W, Cout), jnp.float32),
        grid=(N,),
        in_specs=[
            pl.BlockSpec((1, H + 2, W + 2, C), lambda n: (n, 0, 0, 0)),
            pl.BlockSpec((9, C, Cout), lambda n: (0, 0, 0)),
            pl.BlockSpec((1, Cout), lambda n: (0, 0)),
        ],
        out_specs=pl.BlockSpec((1, H, W, Cout), lambda n: (n, 0, 0, 0)),
        compiler_params=pltpu.CompilerParams(dimension_semantics=("parallel",)),
    )(xp, w9, b2)


def maxpool3x3_conv1x1_bn_relu(x_nhwc, w, b):
    """Fused MaxPool2d(3, s=1, p=1) + 1x1 conv + folded BN + ReLU. w: (Cin, Cout)."""
    N, H, W, C = x_nhwc.shape
    Cout = w.shape[-1]
    xp = jnp.pad(x_nhwc, ((0, 0), (1, 1), (1, 1), (0, 0)),
                 constant_values=-jnp.inf)
    w_bf = w.astype(jnp.bfloat16)
    b2 = b.reshape(1, Cout).astype(jnp.float32)
    return pl.pallas_call(
        _maxpool_conv1x1_kernel,
        out_shape=jax.ShapeDtypeStruct((N, H, W, Cout), jnp.float32),
        grid=(N,),
        in_specs=[
            pl.BlockSpec((1, H + 2, W + 2, C), lambda n: (n, 0, 0, 0)),
            pl.BlockSpec((C, Cout), lambda n: (0, 0)),
            pl.BlockSpec((1, Cout), lambda n: (0, 0)),
        ],
        out_specs=pl.BlockSpec((1, H, W, Cout), lambda n: (n, 0, 0, 0)),
        compiler_params=pltpu.CompilerParams(dimension_semantics=("parallel",)),
    )(xp, w_bf, b2)


# ----------------------------------------------------------------------------
# Parameter construction (deterministic, BN folded into conv)
# ----------------------------------------------------------------------------
def make_conv_bn(key, cin, cout, ksize):
    k = jax.random.split(key, 6)
    if ksize == 1:
        w = jax.random.normal(k[0], (cin, cout), jnp.float32) * 0.1
    else:
        w = jax.random.normal(k[0], (ksize, ksize, cin, cout), jnp.float32) * 0.05
    conv_b = jax.random.normal(k[1], (cout,), jnp.float32) * 0.1
    gamma = 1.0 + 0.1 * jax.random.normal(k[2], (cout,), jnp.float32)
    beta = 0.1 * jax.random.normal(k[3], (cout,), jnp.float32)
    rmean = 0.1 * jax.random.normal(k[4], (cout,), jnp.float32)
    rvar = 1.0 + 0.1 * jnp.abs(jax.random.normal(k[5], (cout,), jnp.float32))
    eps = 1e-5
    scale = gamma / jnp.sqrt(rvar + eps)
    bias = beta - rmean * scale
    w_folded = w * scale          # broadcasts over output-channel (last) axis
    b_folded = conv_b * scale + bias
    return w_folded, b_folded


def make_inception_params(key, in_planes, n1x1, n3x3red, n3x3,
                          n5x5red, n5x5, pool_planes, compress_rate, last=False):
    out3 = n3x3 if last else math.ceil(round(n3x3 * (1.0 - compress_rate[0]), 3))
    mid5 = math.ceil(n5x5 * (1.0 - compress_rate[1]))
    out5 = n5x5 if last else math.ceil(round(n5x5 * (1.0 - compress_rate[2]), 3))

    keys = jax.random.split(key, 7)
    params = {
        "b1":   make_conv_bn(keys[0], in_planes, n1x1, 1),
        "b3_1": make_conv_bn(keys[1], in_planes, n3x3red, 1),
        "b3_2": make_conv_bn(keys[2], n3x3red, out3, 3),
        "b5_1": make_conv_bn(keys[3], in_planes, n5x5red, 1),
        "b5_2": make_conv_bn(keys[4], n5x5red, mid5, 3),
        "b5_3": make_conv_bn(keys[5], mid5, out5, 3),
        "bp":   make_conv_bn(keys[6], in_planes, pool_planes, 1),
    }
    return params


# ----------------------------------------------------------------------------
# Inception forward (NCHW in / NCHW out, like PyTorch)
# ----------------------------------------------------------------------------
def inception_forward(x_nchw, params):
    x = jnp.transpose(x_nchw, (0, 2, 3, 1))  # NCHW -> NHWC
    N, H, W, Cin = x.shape

    # Fused branch-head 1x1 convs: b1 | b3_1 | b5_1 in a single matmul, so x is
    # read from HBM once and the matmul output has Cout = 24 instead of 3x8.
    w1, bb1 = params["b1"]
    w31, bb31 = params["b3_1"]
    w51, bb51 = params["b5_1"]
    w_head = jnp.concatenate([w1, w31, w51], axis=1)
    b_head = jnp.concatenate([bb1, bb31, bb51], axis=0)
    c1 = w1.shape[1]
    c2 = c1 + w31.shape[1]

    y_head = mm_bias_relu(x.reshape(N * H * W, Cin), w_head, b_head)
    y1 = y_head[:, :c1].reshape(N, H, W, -1)         # branch 1x1 output
    x3 = y_head[:, c1:c2].reshape(N, H, W, -1)       # branch 3x3 reduce
    x5 = y_head[:, c2:].reshape(N, H, W, -1)         # branch 5x5 reduce

    # branch 3x3
    y2 = conv3x3_bn_relu(x3, *params["b3_2"])

    # branch 5x5 (factorized into two 3x3 convs, as in the module)
    y3 = conv3x3_bn_relu(x5, *params["b5_2"])
    y3 = conv3x3_bn_relu(y3, *params["b5_3"])

    # pool branch: maxpool fused with its 1x1 conv (no HBM round trip of pooled x)
    y4 = maxpool3x3_conv1x1_bn_relu(x, *params["bp"])

    # TODO(synk): channel concat + NHWC->NCHW transpose left in XLA to keep the
    # PyTorch NCHW boundary; a NHWC consumer could take the branch outputs directly.
    out = jnp.concatenate([y1, y2, y3, y4], axis=-1)
    return jnp.transpose(out, (0, 3, 1, 2))  # NHWC -> NCHW


# ----------------------------------------------------------------------------
if __name__ == "__main__":
    key = jax.random.PRNGKey(0)
    kx, kp = jax.random.split(key)

    # Small Inception config
    in_planes, n1x1, n3x3red, n3x3 = 16, 8, 8, 16
    n5x5red, n5x5, pool_planes = 8, 16, 8
    compress_rate = [0.25, 0.25, 0.25]

    x = jax.random.normal(kx, (2, in_planes, 16, 16), jnp.float32)  # NCHW
    params = make_inception_params(kp, in_planes, n1x1, n3x3red, n3x3,
                                   n5x5red, n5x5, pool_planes, compress_rate)

    out = jax.jit(inception_forward)(x, params)
    out = jax.block_until_ready(out)

    # Expected output channels = 8 + 12 + 12 + 8 = 40
    assert out.shape == (2, 40, 16, 16), out.shape
    assert bool(jnp.all(jnp.isfinite(out)))
    print("KERNEL_OK")
</pallas_src>

<mosaic_0001>
module attributes {stable_mosaic.version = 11 : i64} {
  func.func @_mm_bias_relu_kernel(%arg0: i32, %arg1: memref<256x16xbf16, #tpu.memory_space<vmem>>, %arg2: memref<16x24xbf16, #tpu.memory_space<vmem>>, %arg3: memref<1x24xf32, #tpu.memory_space<vmem>>, %arg4: memref<256x24xf32, #tpu.memory_space<vmem>>) attributes {dimension_semantics = [#tpu.dimension_semantics<parallel>], iteration_bounds = array<i64: 2>, scalar_prefetch = 0 : i64, scratch_operands = 0 : i64, tpu.core_type = #tpu.core_type<tc>, window_params = [{transform_indices = @transform_0, window_bounds = array<i64: 256, 16>}, {pipeline_mode = #tpu.pipeline_mode<synchronous>, transform_indices = @transform_1, window_bounds = array<i64: 16, 24>}, {pipeline_mode = #tpu.pipeline_mode<synchronous>, transform_indices = @transform_2, window_bounds = array<i64: 1, 24>}, {transform_indices = @transform_3, window_bounds = array<i64: 256, 24>}]} {
    %c0 = arith.constant 0 : index
    %c0_0 = arith.constant 0 : index
    %0 = vector.load %arg1[%c0, %c0_0] : memref<256x16xbf16, #tpu.memory_space<vmem>>, vector<256x16xbf16>
    %c0_1 = arith.constant 0 : index
    %c0_2 = arith.constant 0 : index
    %1 = vector.load %arg2[%c0_1, %c0_2] : memref<16x24xbf16, #tpu.memory_space<vmem>>, vector<16x24xbf16>
    %cst = arith.constant dense<0.000000e+00> : vector<256x24xf32>
    %2 = tpu.matmul %0, %1, %cst {dimension_numbers = #tpu.dot_dimension_numbers<[1], [0], [0], [1], [0, 0, 1, 1], [], []>} : vector<256x16xbf16>, vector<16x24xbf16>, vector<256x24xf32> -> vector<256x24xf32>
    %c0_3 = arith.constant 0 : index
    %c0_4 = arith.constant 0 : index
    %3 = vector.load %arg3[%c0_3, %c0_4] : memref<1x24xf32, #tpu.memory_space<vmem>>, vector<1x24xf32>
    %4 = vector.broadcast %3 : vector<1x24xf32> to vector<256x24xf32>
    %5 = arith.addf %2, %4 : vector<256x24xf32>
    %cst_5 = arith.constant 0.000000e+00 : f32
    %6 = vector.broadcast %cst_5 : f32 to vector<256x24xf32>
    %7 = arith.maximumf %5, %6 : vector<256x24xf32>
    %c0_6 = arith.constant 0 : index
    %c0_7 = arith.constant 0 : index
    %8 = vector.load %arg4[%c0_6, %c0_7] : memref<256x24xf32, #tpu.memory_space<vmem>>, vector<256x24xf32>
    tpu.vector_store %arg4[%c0_6, %c0_7], %7 {strides = array<i32>} : memref<256x24xf32, #tpu.memory_space<vmem>>, vector<256x24xf32>,
    return
  }
  func.func @transform_0(%arg0: i32) -> (i32, i32) {
    %c0_i32 = arith.constant 0 : i32
    %c0_i32_0 = arith.constant 0 : i32
    return %arg0, %c0_i32 : i32, i32
  }
  func.func @transform_1(%arg0: i32) -> (i32, i32) {
    %c0_i32 = arith.constant 0 : i32
    %c0_i32_0 = arith.constant 0 : i32
    %c0_i32_1 = arith.constant 0 : i32
    return %c0_i32, %c0_i32_0 : i32, i32
  }
  func.func @transform_2(%arg0: i32) -> (i32, i32) {
    %c0_i32 = arith.constant 0 : i32
    %c0_i32_0 = arith.constant 0 : i32
    %c0_i32_1 = arith.constant 0 : i32
    return %c0_i32, %c0_i32_0 : i32, i32
  }
  func.func @transform_3(%arg0: i32) -> (i32, i32) {
    %c0_i32 = arith.constant 0 : i32
    %c0_i32_0 = arith.constant 0 : i32
    return %arg0, %c0_i32 : i32, i32
  }
}

module attributes {stable_mosaic.version = 11 : i64} {
  func.func @_conv3x3_bn_relu_kernel(%arg0: i32, %arg1: memref<1x18x18x8xf32, #tpu.memory_space<vmem>>, %arg2: memref<9x8x12xbf16, #tpu.memory_space<vmem>>, %arg3: memref<1x12xf32, #tpu.memory_space<vmem>>, %arg4: memref<1x16x16x12xf32, #tpu.memory_space<vmem>>) attributes {dimension_semantics = [#tpu.dimension_semantics<parallel>], iteration_bounds = array<i64: 2>, scalar_prefetch = 0 : i64, scratch_operands = 0 : i64, tpu.core_type = #tpu.core_type<tc>, window_params = [{transform_indices = @transform_0, window_bounds = array<i64: 1, 18, 18, 8>}, {pipeline_mode = #tpu.pipeline_mode<synchronous>, transform_indices = @transform_1, window_bounds = array<i64: 9, 8, 12>}, {pipeline_mode = #tpu.pipeline_mode<synchronous>, transform_indices = @transform_2, window_bounds = array<i64: 1, 12>}, {transform_indices = @transform_3, window_bounds = array<i64: 1, 16, 16, 12>}]} {
    %c0 = arith.constant 0 : index
    %c0_0 = arith.constant 0 : index
    %c0_1 = arith.constant 0 : index
    %c0_2 = arith.constant 0 : index
    %0 = vector.load %arg1[%c0, %c0_0, %c0_1, %c0_2] : memref<1x18x18x8xf32, #tpu.memory_space<vmem>>, vector<1x18x18x8xf32>
    %cst = arith.constant 0.000000e+00 : f32
    %1 = vector.broadcast %cst : f32 to vector<256x12xf32>
    %2 = vector.extract_strided_slice %0 {offsets = [0, 0, 0, 0], sizes = [1, 16, 16, 8], strides = [1, 1, 1, 1]} : vector<1x18x18x8xf32> to vector<1x16x16x8xf32>
    %3 = vector.shape_cast %2 : vector<1x16x16x8xf32> to vector<256x8xf32>
    %4 = arith.truncf %3 : vector<256x8xf32> to vector<256x8xbf16>
    %c0_3 = arith.constant 0 : index
    %c0_4 = arith.constant 0 : index
    %c0_5 = arith.constant 0 : index
    %5 = vector.load %arg2[%c0_3, %c0_4, %c0_5] : memref<9x8x12xbf16, #tpu.memory_space<vmem>>, vector<1x8x12xbf16>
    %6 = vector.shape_cast %5 : vector<1x8x12xbf16> to vector<8x12xbf16>
    %cst_6 = arith.constant dense<0.000000e+00> : vector<256x12xf32>
    %7 = tpu.matmul %4, %6, %cst_6 {dimension_numbers = #tpu.dot_dimension_numbers<[1], [0], [0], [1], [0, 0, 1, 1], [], []>} : vector<256x8xbf16>, vector<8x12xbf16>, vector<256x12xf32> -> vector<256x12xf32>
    %8 = arith.addf %1, %7 : vector<256x12xf32>
    %9 = vector.extract_strided_slice %0 {offsets = [0, 0, 1, 0], sizes = [1, 16, 16, 8], strides = [1, 1, 1, 1]} : vector<1x18x18x8xf32> to vector<1x16x16x8xf32>
    %10 = vector.shape_cast %9 : vector<1x16x16x8xf32> to vector<256x8xf32>
    %11 = arith.truncf %10 : vector<256x8xf32> to vector<256x8xbf16>
    %c1 = arith.constant 1 : index
    %c0_7 = arith.constant 0 : index
    %c0_8 = arith.constant 0 : index
    %12 = vector.load %arg2[%c1, %c0_7, %c0_8] : memref<9x8x12xbf16, #tpu.memory_space<vmem>>, vector<1x8x12xbf16>
    %13 = vector.shape_cast %12 : vector<1x8x12xbf16> to vector<8x12xbf16>
    %cst_9 = arith.constant dense<0.000000e+00> : vector<256x12xf32>
    %14 = tpu.matmul %11, %13, %cst_9 {dimension_numbers = #tpu.dot_dimension_numbers<[1], [0], [0], [1], [0, 0, 1, 1], [], []>} : vector<256x8xbf16>, vector<8x12xbf16>, vector<256x12xf32> -> vector<256x12xf32>
    %15 = arith.addf %8, %14 : vector<256x12xf32>
    %16 = vector.extract_strided_slice %0 {offsets = [0, 0, 2, 0], sizes = [1, 16, 16, 8], strides = [1, 1, 1, 1]} : vector<1x18x18x8xf32> to vector<1x16x16x8xf32>
    %17 = vector.shape_cast %16 : vector<1x16x16x8xf32> to vector<256x8xf32>
    %18 = arith.truncf %17 : vector<256x8xf32> to vector<256x8xbf16>
    %c2 = arith.constant 2 : index
    %c0_10 = arith.constant 0 : index
    %c0_11 = arith.constant 0 : index
    %19 = vector.load %arg2[%c2, %c0_10, %c0_11] : memref<9x8x12xbf16, #tpu.memory_space<vmem>>, vector<1x8x12xbf16>
    %20 = vector.shape_cast %19 : vector<1x8x12xbf16> to vector<8x12xbf16>
    %cst_12 = arith.constant dense<0.000000e+00> : vector<256x12xf32>
    %21 = tpu.matmul %18, %20, %cst_12 {dimension_numbers = #tpu.dot_dimension_numbers<[1], [0], [0], [1], [0, 0, 1, 1], [], []>} : vector<256x8xbf16>, vector<8x12xbf16>, vector<256x12xf32> -> vector<256x12xf32>
    %22 = arith.addf %15, %21 : vector<256x12xf32>
    %23 = vector.extract_strided_slice %0 {offsets = [0, 1, 0, 0], sizes = [1, 16, 16, 8], strides = [1, 1, 1, 1]} : vector<1x18x18x8xf32> to vector<1x16x16x8xf32>
    %24 = vector.shape_cast %23 : vector<1x16x16x8xf32> to vector<256x8xf32>
    %25 = arith.truncf %24 : vector<256x8xf32> to vector<256x8xbf16>
    %c3 = arith.constant 3 : index
    %c0_13 = arith.constant 0 : index
    %c0_14 = arith.constant 0 : index
    %26 = vector.load %arg2[%c3, %c0_13, %c0_14] : memref<9x8x12xbf16, #tpu.memory_space<vmem>>, vector<1x8x12xbf16>
    %27 = vector.shape_cast %26 : vector<1x8x12xbf16> to vector<8x12xbf16>
    %cst_15 = arith.constant dense<0.000000e+00> : vector<256x12xf32>
    %28 = tpu.matmul %25, %27, %cst_15 {dimension_numbers = #tpu.dot_dimension_numbers<[1], [0], [0], [1], [0, 0, 1, 1], [], []>} : vector<256x8xbf16>, vector<8x12xbf16>, vector<256x12xf32> -> vector<256x12xf32>
    %29 = arith.addf %22, %28 : vector<256x12xf32>
    %30 = vector.extract_strided_slice %0 {offsets = [0, 1, 1, 0], sizes = [1, 16, 16, 8], strides = [1, 1, 1, 1]} : vector<1x18x18x8xf32> to vector<1x16x16x8xf32>
    %31 = vector.shape_cast %30 : vector<1x16x16x8xf32> to vector<256x8xf32>
    %32 = arith.truncf %31 : vector<256x8xf32> to vector<256x8xbf16>
    %c4 = arith.constant 4 : index
    %c0_16 = arith.constant 0 : index
    %c0_17 = arith.constant 0 : index
    %33 = vector.load %arg2[%c4, %c0_16, %c0_17] : memref<9x8x12xbf16, #tpu.memory_space<vmem>>, vector<1x8x12xbf16>
    %34 = vector.shape_cast %33 : vector<1x8x12xbf16> to vector<8x12xbf16>
    %cst_18 = arith.constant dense<0.000000e+00> : vector<256x12xf32>
    %35 = tpu.matmul %32, %34, %cst_18 {dimension_numbers = #tpu.dot_dimension_numbers<[1], [0], [0], [1], [0, 0, 1, 1], [], []>} : vector<256x8xbf16>, vector<8x12xbf16>, vector<256x12xf32> -> vector<256x12xf32>
    %36 = arith.addf %29, %35 : vector<256x12xf32>
    %37 = vector.extract_strided_slice %0 {offsets = [0, 1, 2, 0], sizes = [1, 16, 16, 8], strides = [1, 1, 1, 1]} : vector<1x18x18x8xf32> to vector<1x16x16x8xf32>
    %38 = vector.shape_cast %37 : vector<1x16x16x8xf32> to vector<256x8xf32>
    %39 = arith.truncf %38 : vector<256x8xf32> to vector<256x8xbf16>
    %c5 = arith.constant 5 : index
    %c0_19 = arith.constant 0 : index
    %c0_20 = arith.constant 0 : index
    %40 = vector.load %arg2[%c5, %c0_19, %c0_20] : memref<9x8x12xbf16, #tpu.memory_space<vmem>>, vector<1x8x12xbf16>
    %41 = vector.shape_cast %40 : vector<1x8x12xbf16> to vector<8x12xbf16>
    %cst_21 = arith.constant dense<0.000000e+00> : vector<256x12xf32>
    %42 = tpu.matmul %39, %41, %cst_21 {dimension_numbers = #tpu.dot_dimension_numbers<[1], [0], [0], [1], [0, 0, 1, 1], [], []>} : vector<256x8xbf16>, vector<8x12xbf16>, vector<256x12xf32> -> vector<256x12xf32>
    %43 = arith.addf %36, %42 : vector<256x12xf32>
    %44 = vector.extract_strided_slice %0 {offsets = [0, 2, 0, 0], sizes = [1, 16, 16, 8], strides = [1, 1, 1, 1]} : vector<1x18x18x8xf32> to vector<1x16x16x8xf32>
    %45 = vector.shape_cast %44 : vector<1x16x16x8xf32> to vector<256x8xf32>
    %46 = arith.truncf %45 : vector<256x8xf32> to vector<256x8xbf16>
    %c6 = arith.constant 6 : index
    %c0_22 = arith.constant 0 : index
    %c0_23 = arith.constant 0 : index
    %47 = vector.load %arg2[%c6, %c0_22, %c0_23] : memref<9x8x12xbf16, #tpu.memory_space<vmem>>, vector<1x8x12xbf16>
    %48 = vector.shape_cast %47 : vector<1x8x12xbf16> to vector<8x12xbf16>
    %cst_24 = arith.constant dense<0.000000e+00> : vector<256x12xf32>
    %49 = tpu.matmul %46, %48, %cst_24 {dimension_numbers = #tpu.dot_dimension_numbers<[1], [0], [0], [1], [0, 0, 1, 1], [], []>} : vector<256x8xbf16>, vector<8x12xbf16>, vector<256x12xf32> -> vector<256x12xf32>
    %50 = arith.addf %43, %49 : vector<256x12xf32>
    %51 = vector.extract_strided_slice %0 {offsets = [0, 2, 1, 0], sizes = [1, 16, 16, 8], strides = [1, 1, 1, 1]} : vector<1x18x18x8xf32> to vector<1x16x16x8xf32>
    %52 = vector.shape_cast %51 : vector<1x16x16x8xf32> to vector<256x8xf32>
    %53 = arith.truncf %52 : vector<256x8xf32> to vector<256x8xbf16>
    %c7 = arith.constant 7 : index
    %c0_25 = arith.constant 0 : index
    %c0_26 = arith.constant 0 : index
    %54 = vector.load %arg2[%c7, %c0_25, %c0_26] : memref<9x8x12xbf16, #tpu.memory_space<vmem>>, vector<1x8x12xbf16>
    %55 = vector.shape_cast %54 : vector<1x8x12xbf16> to vector<8x12xbf16>
    %cst_27 = arith.constant dense<0.000000e+00> : vector<256x12xf32>
    %56 = tpu.matmul %53, %55, %cst_27 {dimension_numbers = #tpu.dot_dimension_numbers<[1], [0], [0], [1], [0, 0, 1, 1], [], []>} : vector<256x8xbf16>, vector<8x12xbf16>, vector<256x12xf32> -> vector<256x12xf32>
    %57 = arith.addf %50, %56 : vector<256x12xf32>
    %58 = vector.extract_strided_slice %0 {offsets = [0, 2, 2, 0], sizes = [1, 16, 16, 8], strides = [1, 1, 1, 1]} : vector<1x18x18x8xf32> to vector<1x16x16x8xf32>
    %59 = vector.shape_cast %58 : vector<1x16x16x8xf32> to vector<256x8xf32>
    %60 = arith.truncf %59 : vector<256x8xf32> to vector<256x8xbf16>
    %c8 = arith.constant 8 : index
    %c0_28 = arith.constant 0 : index
    %c0_29 = arith.constant 0 : index
    %61 = vector.load %arg2[%c8, %c0_28, %c0_29] : memref<9x8x12xbf16, #tpu.memory_space<vmem>>, vector<1x8x12xbf16>
    %62 = vector.shape_cast %61 : vector<1x8x12xbf16> to vector<8x12xbf16>
    %cst_30 = arith.constant dense<0.000000e+00> : vector<256x12xf32>
    %63 = tpu.matmul %60, %62, %cst_30 {dimension_numbers = #tpu.dot_dimension_numbers<[1], [0], [0], [1], [0, 0, 1, 1], [], []>} : vector<256x8xbf16>, vector<8x12xbf16>, vector<256x12xf32> -> vector<256x12xf32>
    %64 = arith.addf %57, %63 : vector<256x12xf32>
    %c0_31 = arith.constant 0 : index
    %c0_32 = arith.constant 0 : index
    %65 = vector.load %arg3[%c0_31, %c0_32] : memref<1x12xf32, #tpu.memory_space<vmem>>, vector<1x12xf32>
    %66 = vector.broadcast %65 : vector<1x12xf32> to vector<256x12xf32>
    %67 = arith.addf %64, %66 : vector<256x12xf32>
    %cst_33 = arith.constant 0.000000e+00 : f32
    %68 = vector.broadcast %cst_33 : f32 to vector<256x12xf32>
    %69 = arith.maximumf %67, %68 : vector<256x12xf32>
    %70 = vector.shape_cast %69 : vector<256x12xf32> to vector<1x16x16x12xf32>
    %c0_34 = arith.constant 0 : index
    %c0_35 = arith.constant 0 : index
    %c0_36 = arith.constant 0 : index
    %c0_37 = arith.constant 0 : index
    %71 = vector.load %arg4[%c0_34, %c0_35, %c0_36, %c0_37] : memref<1x16x16x12xf32, #tpu.memory_space<vmem>>, vector<1x16x16x12xf32>
    tpu.vector_store %arg4[%c0_34, %c0_35, %c0_36, %c0_37], %70 {strides = array<i32>} : memref<1x16x16x12xf32, #tpu.memory_space<vmem>>, vector<1x16x16x12xf32>,
    return
  }
  func.func @transform_0(%arg0: i32) -> (i32, i32, i32, i32) {
    %c0_i32 = arith.constant 0 : i32
    %c0_i32_0 = arith.constant 0 : i32
    %c0_i32_1 = arith.constant 0 : i32
    %c0_i32_2 = arith.constant 0 : i32
    return %arg0, %c0_i32, %c0_i32_0, %c0_i32_1 : i32, i32, i32, i32
  }
  func.func @transform_1(%arg0: i32) -> (i32, i32, i32) {
    %c0_i32 = arith.constant 0 : i32
    %c0_i32_0 = arith.constant 0 : i32
    %c0_i32_1 = arith.constant 0 : i32
    %c0_i32_2 = arith.constant 0 : i32
    return %c0_i32, %c0_i32_0, %c0_i32_1 : i32, i32, i32
  }
  func.func @transform_2(%arg0: i32) -> (i32, i32) {
    %c0_i32 = arith.constant 0 : i32
    %c0_i32_0 = arith.constant 0 : i32
    %c0_i32_1 = arith.constant 0 : i32
    return %c0_i32, %c0_i32_0 : i32, i32
  }
  func.func @transform_3(%arg0: i32) -> (i32, i32, i32, i32) {
    %c0_i32 = arith.constant 0 : i32
    %c0_i32_0 = arith.constant 0 : i32
    %c0_i32_1 = arith.constant 0 : i32
    %c0_i32_2 = arith.constant 0 : i32
    return %arg0, %c0_i32, %c0_i32_0, %c0_i32_1 : i32, i32, i32, i32
  }
}

module attributes {stable_mosaic.version = 11 : i64} {
  func.func @_conv3x3_bn_relu_kernel(%arg0: i32, %arg1: memref<1x18x18x12xf32, #tpu.memory_space<vmem>>, %arg2: memref<9x12x12xbf16, #tpu.memory_space<vmem>>, %arg3: memref<1x12xf32, #tpu.memory_space<vmem>>, %arg4: memref<1x16x16x12xf32, #tpu.memory_space<vmem>>) attributes {dimension_semantics = [#tpu.dimension_semantics<parallel>], iteration_bounds = array<i64: 2>, scalar_prefetch = 0 : i64, scratch_operands = 0 : i64, tpu.core_type = #tpu.core_type<tc>, window_params = [{transform_indices = @transform_0, window_bounds = array<i64: 1, 18, 18, 12>}, {pipeline_mode = #tpu.pipeline_mode<synchronous>, transform_indices = @transform_1, window_bounds = array<i64: 9, 12, 12>}, {pipeline_mode = #tpu.pipeline_mode<synchronous>, transform_indices = @transform_2, window_bounds = array<i64: 1, 12>}, {transform_indices = @transform_3, window_bounds = array<i64: 1, 16, 16, 12>}]} {
    %c0 = arith.constant 0 : index
    %c0_0 = arith.constant 0 : index
    %c0_1 = arith.constant 0 : index
    %c0_2 = arith.constant 0 : index
    %0 = vector.load %arg1[%c0, %c0_0, %c0_1, %c0_2] : memref<1x18x18x12xf32, #tpu.memory_space<vmem>>, vector<1x18x18x12xf32>
    %cst = arith.constant 0.000000e+00 : f32
    %1 = vector.broadcast %cst : f32 to vector<256x12xf32>
    %2 = vector.extract_strided_slice %0 {offsets = [0, 0, 0, 0], sizes = [1, 16, 16, 12], strides = [1, 1, 1, 1]} : vector<1x18x18x12xf32> to vector<1x16x16x12xf32>
    %3 = vector.shape_cast %2 : vector<1x16x16x12xf32> to vector<256x12xf32>
    %4 = arith.truncf %3 : vector<256x12xf32> to vector<256x12xbf16>
    %c0_3 = arith.constant 0 : index
    %c0_4 = arith.constant 0 : index
    %c0_5 = arith.constant 0 : index
    %5 = vector.load %arg2[%c0_3, %c0_4, %c0_5] : memref<9x12x12xbf16, #tpu.memory_space<vmem>>, vector<1x12x12xbf16>
    %6 = vector.shape_cast %5 : vector<1x12x12xbf16> to vector<12x12xbf16>
    %cst_6 = arith.constant dense<0.000000e+00> : vector<256x12xf32>
    %7 = tpu.matmul %4, %6, %cst_6 {dimension_numbers = #tpu.dot_dimension_numbers<[1], [0], [0], [1], [0, 0, 1, 1], [], []>} : vector<256x12xbf16>, vector<12x12xbf16>, vector<256x12xf32> -> vector<256x12xf32>
    %8 = arith.addf %1, %7 : vector<256x12xf32>
    %9 = vector.extract_strided_slice %0 {offsets = [0, 0, 1, 0], sizes = [1, 16, 16, 12], strides = [1, 1, 1, 1]} : vector<1x18x18x12xf32> to vector<1x16x16x12xf32>
    %10 = vector.shape_cast %9 : vector<1x16x16x12xf32> to vector<256x12xf32>
    %11 = arith.truncf %10 : vector<256x12xf32> to vector<256x12xbf16>
    %c1 = arith.constant 1 : index
    %c0_7 = arith.constant 0 : index
    %c0_8 = arith.constant 0 : index
    %12 = vector.load %arg2[%c1, %c0_7, %c0_8] : memref<9x12x12xbf16, #tpu.memory_space<vmem>>, vector<1x12x12xbf16>
    %13 = vector.shape_cast %12 : vector<1x12x12xbf16> to vector<12x12xbf16>
    %cst_9 = arith.constant dense<0.000000e+00> : vector<256x12xf32>
    %14 = tpu.matmul %11, %13, %cst_9 {dimension_numbers = #tpu.dot_dimension_numbers<[1], [0], [0], [1], [0, 0, 1, 1], [], []>} : vector<256x12xbf16>, vector<12x12xbf16>, vector<256x12xf32> -> vector<256x12xf32>
    %15 = arith.addf %8, %14 : vector<256x12xf32>
    %16 = vector.extract_strided_slice %0 {offsets = [0, 0, 2, 0], sizes = [1, 16, 16, 12], strides = [1, 1, 1, 1]} : vector<1x18x18x12xf32> to vector<1x16x16x12xf32>
    %17 = vector.shape_cast %16 : vector<1x16x16x12xf32> to vector<256x12xf32>
    %18 = arith.truncf %17 : vector<256x12xf32> to vector<256x12xbf16>
    %c2 = arith.constant 2 : index
    %c0_10 = arith.constant 0 : index
    %c0_11 = arith.constant 0 : index
    %19 = vector.load %arg2[%c2, %c0_10, %c0_11] : memref<9x12x12xbf16, #tpu.memory_space<vmem>>, vector<1x12x12xbf16>
    %20 = vector.shape_cast %19 : vector<1x12x12xbf16> to vector<12x12xbf16>
    %cst_12 = arith.constant dense<0.000000e+00> : vector<256x12xf32>
    %21 = tpu.matmul %18, %20, %cst_12 {dimension_numbers = #tpu.dot_dimension_numbers<[1], [0], [0], [1], [0, 0, 1, 1], [], []>} : vector<256x12xbf16>, vector<12x12xbf16>, vector<256x12xf32> -> vector<256x12xf32>
    %22 = arith.addf %15, %21 : vector<256x12xf32>
    %23 = vector.extract_strided_slice %0 {offsets = [0, 1, 0, 0], sizes = [1, 16, 16, 12], strides = [1, 1, 1, 1]} : vector<1x18x18x12xf32> to vector<1x16x16x12xf32>
    %24 = vector.shape_cast %23 : vector<1x16x16x12xf32> to vector<256x12xf32>
    %25 = arith.truncf %24 : vector<256x12xf32> to vector<256x12xbf16>
    %c3 = arith.constant 3 : index
    %c0_13 = arith.constant 0 : index
    %c0_14 = arith.constant 0 : index
    %26 = vector.load %arg2[%c3, %c0_13, %c0_14] : memref<9x12x12xbf16, #tpu.memory_space<vmem>>, vector<1x12x12xbf16>
    %27 = vector.shape_cast %26 : vector<1x12x12xbf16> to vector<12x12xbf16>
    %cst_15 = arith.constant dense<0.000000e+00> : vector<256x12xf32>
    %28 = tpu.matmul %25, %27, %cst_15 {dimension_numbers = #tpu.dot_dimension_numbers<[1], [0], [0], [1], [0, 0, 1, 1], [], []>} : vector<256x12xbf16>, vector<12x12xbf16>, vector<256x12xf32> -> vector<256x12xf32>
    %29 = arith.addf %22, %28 : vector<256x12xf32>
    %30 = vector.extract_strided_slice %0 {offsets = [0, 1, 1, 0], sizes = [1, 16, 16, 12], strides = [1, 1, 1, 1]} : vector<1x18x18x12xf32> to vector<1x16x16x12xf32>
    %31 = vector.shape_cast %30 : vector<1x16x16x12xf32> to vector<256x12xf32>
    %32 = arith.truncf %31 : vector<256x12xf32> to vector<256x12xbf16>
    %c4 = arith.constant 4 : index
    %c0_16 = arith.constant 0 : index
    %c0_17 = arith.constant 0 : index
    %33 = vector.load %arg2[%c4, %c0_16, %c0_17] : memref<9x12x12xbf16, #tpu.memory_space<vmem>>, vector<1x12x12xbf16>
    %34 = vector.shape_cast %33 : vector<1x12x12xbf16> to vector<12x12xbf16>
    %cst_18 = arith.constant dense<0.000000e+00> : vector<256x12xf32>
    %35 = tpu.matmul %32, %34, %cst_18 {dimension_numbers = #tpu.dot_dimension_numbers<[1], [0], [0], [1], [0, 0, 1, 1], [], []>} : vector<256x12xbf16>, vector<12x12xbf16>, vector<256x12xf32> -> vector<256x12xf32>
    %36 = arith.addf %29, %35 : vector<256x12xf32>
    %37 = vector.extract_strided_slice %0 {offsets = [0, 1, 2, 0], sizes = [1, 16, 16, 12], strides = [1, 1, 1, 1]} : vector<1x18x18x12xf32> to vector<1x16x16x12xf32>
    %38 = vector.shape_cast %37 : vector<1x16x16x12xf32> to vector<256x12xf32>
    %39 = arith.truncf %38 : vector<256x12xf32> to vector<256x12xbf16>
    %c5 = arith.constant 5 : index
    %c0_19 = arith.constant 0 : index
    %c0_20 = arith.constant 0 : index
    %40 = vector.load %arg2[%c5, %c0_19, %c0_20] : memref<9x12x12xbf16, #tpu.memory_space<vmem>>, vector<1x12x12xbf16>
    %41 = vector.shape_cast %40 : vector<1x12x12xbf16> to vector<12x12xbf16>
    %cst_21 = arith.constant dense<0.000000e+00> : vector<256x12xf32>
    %42 = tpu.matmul %39, %41, %cst_21 {dimension_numbers = #tpu.dot_dimension_numbers<[1], [0], [0], [1], [0, 0, 1, 1], [], []>} : vector<256x12xbf16>, vector<12x12xbf16>, vector<256x12xf32> -> vector<256x12xf32>
    %43 = arith.addf %36, %42 : vector<256x12xf32>
    %44 = vector.extract_strided_slice %0 {offsets = [0, 2, 0, 0], sizes = [1, 16, 16, 12], strides = [1, 1, 1, 1]} : vector<1x18x18x12xf32> to vector<1x16x16x12xf32>
    %45 = vector.shape_cast %44 : vector<1x16x16x12xf32> to vector<256x12xf32>
    %46 = arith.truncf %45 : vector<256x12xf32> to vector<256x12xbf16>
    %c6 = arith.constant 6 : index
    %c0_22 = arith.constant 0 : index
    %c0_23 = arith.constant 0 : index
    %47 = vector.load %arg2[%c6, %c0_22, %c0_23] : memref<9x12x12xbf16, #tpu.memory_space<vmem>>, vector<1x12x12xbf16>
    %48 = vector.shape_cast %47 : vector<1x12x12xbf16> to vector<12x12xbf16>
    %cst_24 = arith.constant dense<0.000000e+00> : vector<256x12xf32>
    %49 = tpu.matmul %46, %48, %cst_24 {dimension_numbers = #tpu.dot_dimension_numbers<[1], [0], [0], [1], [0, 0, 1, 1], [], []>} : vector<256x12xbf16>, vector<12x12xbf16>, vector<256x12xf32> -> vector<256x12xf32>
    %50 = arith.addf %43, %49 : vector<256x12xf32>
    %51 = vector.extract_strided_slice %0 {offsets = [0, 2, 1, 0], sizes = [1, 16, 16, 12], strides = [1, 1, 1, 1]} : vector<1x18x18x12xf32> to vector<1x16x16x12xf32>
    %52 = vector.shape_cast %51 : vector<1x16x16x12xf32> to vector<256x12xf32>
    %53 = arith.truncf %52 : vector<256x12xf32> to vector<256x12xbf16>
    %c7 = arith.constant 7 : index
    %c0_25 = arith.constant 0 : index
    %c0_26 = arith.constant 0 : index
    %54 = vector.load %arg2[%c7, %c0_25, %c0_26] : memref<9x12x12xbf16, #tpu.memory_space<vmem>>, vector<1x12x12xbf16>
    %55 = vector.shape_cast %54 : vector<1x12x12xbf16> to vector<12x12xbf16>
    %cst_27 = arith.constant dense<0.000000e+00> : vector<256x12xf32>
    %56 = tpu.matmul %53, %55, %cst_27 {dimension_numbers = #tpu.dot_dimension_numbers<[1], [0], [0], [1], [0, 0, 1, 1], [], []>} : vector<256x12xbf16>, vector<12x12xbf16>, vector<256x12xf32> -> vector<256x12xf32>
    %57 = arith.addf %50, %56 : vector<256x12xf32>
    %58 = vector.extract_strided_slice %0 {offsets = [0, 2, 2, 0], sizes = [1, 16, 16, 12], strides = [1, 1, 1, 1]} : vector<1x18x18x12xf32> to vector<1x16x16x12xf32>
    %59 = vector.shape_cast %58 : vector<1x16x16x12xf32> to vector<256x12xf32>
    %60 = arith.truncf %59 : vector<256x12xf32> to vector<256x12xbf16>
    %c8 = arith.constant 8 : index
    %c0_28 = arith.constant 0 : index
    %c0_29 = arith.constant 0 : index
    %61 = vector.load %arg2[%c8, %c0_28, %c0_29] : memref<9x12x12xbf16, #tpu.memory_space<vmem>>, vector<1x12x12xbf16>
    %62 = vector.shape_cast %61 : vector<1x12x12xbf16> to vector<12x12xbf16>
    %cst_30 = arith.constant dense<0.000000e+00> : vector<256x12xf32>
    %63 = tpu.matmul %60, %62, %cst_30 {dimension_numbers = #tpu.dot_dimension_numbers<[1], [0], [0], [1], [0, 0, 1, 1], [], []>} : vector<256x12xbf16>, vector<12x12xbf16>, vector<256x12xf32> -> vector<256x12xf32>
    %64 = arith.addf %57, %63 : vector<256x12xf32>
    %c0_31 = arith.constant 0 : index
    %c0_32 = arith.constant 0 : index
    %65 = vector.load %arg3[%c0_31, %c0_32] : memref<1x12xf32, #tpu.memory_space<vmem>>, vector<1x12xf32>
    %66 = vector.broadcast %65 : vector<1x12xf32> to vector<256x12xf32>
    %67 = arith.addf %64, %66 : vector<256x12xf32>
    %cst_33 = arith.constant 0.000000e+00 : f32
    %68 = vector.broadcast %cst_33 : f32 to vector<256x12xf32>
    %69 = arith.maximumf %67, %68 : vector<256x12xf32>
    %70 = vector.shape_cast %69 : vector<256x12xf32> to vector<1x16x16x12xf32>
    %c0_34 = arith.constant 0 : index
    %c0_35 = arith.constant 0 : index
    %c0_36 = arith.constant 0 : index
    %c0_37 = arith.constant 0 : index
    %71 = vector.load %arg4[%c0_34, %c0_35, %c0_36, %c0_37] : memref<1x16x16x12xf32, #tpu.memory_space<vmem>>, vector<1x16x16x12xf32>
    tpu.vector_store %arg4[%c0_34, %c0_35, %c0_36, %c0_37], %70 {strides = array<i32>} : memref<1x16x16x12xf32, #tpu.memory_space<vmem>>, vector<1x16x16x12xf32>,
    return
  }
  func.func @transform_0(%arg0: i32) -> (i32, i32, i32, i32) {
    %c0_i32 = arith.constant 0 : i32
    %c0_i32_0 = arith.constant 0 : i32
    %c0_i32_1 = arith.constant 0 : i32
    %c0_i32_2 = arith.constant 0 : i32
    return %arg0, %c0_i32, %c0_i32_0, %c0_i32_1 : i32, i32, i32, i32
  }
  func.func @transform_1(%arg0: i32) -> (i32, i32, i32) {
    %c0_i32 = arith.constant 0 : i32
    %c0_i32_0 = arith.constant 0 : i32
    %c0_i32_1 = arith.constant 0 : i32
    %c0_i32_2 = arith.constant 0 : i32
    return %c0_i32, %c0_i32_0, %c0_i32_1 : i32, i32, i32
  }
  func.func @transform_2(%arg0: i32) -> (i32, i32) {
    %c0_i32 = arith.constant 0 : i32
    %c0_i32_0 = arith.constant 0 : i32
    %c0_i32_1 = arith.constant 0 : i32
    return %c0_i32, %c0_i32_0 : i32, i32
  }
  func.func @transform_3(%arg0: i32) -> (i32, i32, i32, i32) {
    %c0_i32 = arith.constant 0 : i32
    %c0_i32_0 = arith.constant 0 : i32
    %c0_i32_1 = arith.constant 0 : i32
    %c0_i32_2 = arith.constant 0 : i32
    return %arg0, %c0_i32, %c0_i32_0, %c0_i32_1 : i32, i32, i32, i32
  }
}

module attributes {stable_mosaic.version = 11 : i64} {
  func.func @_maxpool_conv1x1_kernel(%arg0: i32, %arg1: memref<1x18x18x16xf32, #tpu.memory_space<vmem>>, %arg2: memref<16x8xbf16, #tpu.memory_space<vmem>>, %arg3: memref<1x8xf32, #tpu.memory_space<vmem>>, %arg4: memref<1x16x16x8xf32, #tpu.memory_space<vmem>>) attributes {dimension_semantics = [#tpu.dimension_semantics<parallel>], iteration_bounds = array<i64: 2>, scalar_prefetch = 0 : i64, scratch_operands = 0 : i64, tpu.core_type = #tpu.core_type<tc>, window_params = [{transform_indices = @transform_0, window_bounds = array<i64: 1, 18, 18, 16>}, {pipeline_mode = #tpu.pipeline_mode<synchronous>, transform_indices = @transform_1, window_bounds = array<i64: 16, 8>}, {pipeline_mode = #tpu.pipeline_mode<synchronous>, transform_indices = @transform_2, window_bounds = array<i64: 1, 8>}, {transform_indices = @transform_3, window_bounds = array<i64: 1, 16, 16, 8>}]} {
    %c0 = arith.constant 0 : index
    %c0_0 = arith.constant 0 : index
    %c0_1 = arith.constant 0 : index
    %c0_2 = arith.constant 0 : index
    %0 = vector.load %arg1[%c0, %c0_0, %c0_1, %c0_2] : memref<1x18x18x16xf32, #tpu.memory_space<vmem>>, vector<1x18x18x16xf32>
    %1 = vector.extract_strided_slice %0 {offsets = [0, 0, 0, 0], sizes = [1, 18, 16, 16], strides = [1, 1, 1, 1]} : vector<1x18x18x16xf32> to vector<1x18x16x16xf32>
    %2 = vector.extract_strided_slice %0 {offsets = [0, 0, 1, 0], sizes = [1, 18, 16, 16], strides = [1, 1, 1, 1]} : vector<1x18x18x16xf32> to vector<1x18x16x16xf32>
    %3 = arith.maximumf %1, %2 : vector<1x18x16x16xf32>
    %4 = vector.extract_strided_slice %0 {offsets = [0, 0, 2, 0], sizes = [1, 18, 16, 16], strides = [1, 1, 1, 1]} : vector<1x18x18x16xf32> to vector<1x18x16x16xf32>
    %5 = arith.maximumf %3, %4 : vector<1x18x16x16xf32>
    %6 = vector.extract_strided_slice %5 {offsets = [0, 0, 0, 0], sizes = [1, 16, 16, 16], strides = [1, 1, 1, 1]} : vector<1x18x16x16xf32> to vector<1x16x16x16xf32>
    %7 = vector.extract_strided_slice %5 {offsets = [0, 1, 0, 0], sizes = [1, 16, 16, 16], strides = [1, 1, 1, 1]} : vector<1x18x16x16xf32> to vector<1x16x16x16xf32>
    %8 = arith.maximumf %6, %7 : vector<1x16x16x16xf32>
    %9 = vector.extract_strided_slice %5 {offsets = [0, 2, 0, 0], sizes = [1, 16, 16, 16], strides = [1, 1, 1, 1]} : vector<1x18x16x16xf32> to vector<1x16x16x16xf32>
    %10 = arith.maximumf %8, %9 : vector<1x16x16x16xf32>
    %11 = vector.shape_cast %10 : vector<1x16x16x16xf32> to vector<256x16xf32>
    %12 = arith.truncf %11 : vector<256x16xf32> to vector<256x16xbf16>
    %c0_3 = arith.constant 0 : index
    %c0_4 = arith.constant 0 : index
    %13 = vector.load %arg2[%c0_3, %c0_4] : memref<16x8xbf16, #tpu.memory_space<vmem>>, vector<16x8xbf16>
    %cst = arith.constant dense<0.000000e+00> : vector<256x8xf32>
    %14 = tpu.matmul %12, %13, %cst {dimension_numbers = #tpu.dot_dimension_numbers<[1], [0], [0], [1], [0, 0, 1, 1], [], []>} : vector<256x16xbf16>, vector<16x8xbf16>, vector<256x8xf32> -> vector<256x8xf32>
    %c0_5 = arith.constant 0 : index
    %c0_6 = arith.constant 0 : index
    %15 = vector.load %arg3[%c0_5, %c0_6] : memref<1x8xf32, #tpu.memory_space<vmem>>, vector<1x8xf32>
    %16 = vector.broadcast %15 : vector<1x8xf32> to vector<256x8xf32>
    %17 = arith.addf %14, %16 : vector<256x8xf32>
    %cst_7 = arith.constant 0.000000e+00 : f32
    %18 = vector.broadcast %cst_7 : f32 to vector<256x8xf32>
    %19 = arith.maximumf %17, %18 : vector<256x8xf32>
    %20 = vector.shape_cast %19 : vector<256x8xf32> to vector<1x16x16x8xf32>
    %c0_8 = arith.constant 0 : index
    %c0_9 = arith.constant 0 : index
    %c0_10 = arith.constant 0 : index
    %c0_11 = arith.constant 0 : index
    %21 = vector.load %arg4[%c0_8, %c0_9, %c0_10, %c0_11] : memref<1x16x16x8xf32, #tpu.memory_space<vmem>>, vector<1x16x16x8xf32>
    tpu.vector_store %arg4[%c0_8, %c0_9, %c0_10, %c0_11], %20 {strides = array<i32>} : memref<1x16x16x8xf32, #tpu.memory_space<vmem>>, vector<1x16x16x8xf32>,
    return
  }
  func.func @transform_0(%arg0: i32) -> (i32, i32, i32, i32) {
    %c0_i32 = arith.constant 0 : i32
    %c0_i32_0 = arith.constant 0 : i32
    %c0_i32_1 = arith.constant 0 : i32
    %c0_i32_2 = arith.constant 0 : i32
    return %arg0, %c0_i32, %c0_i32_0, %c0_i32_1 : i32, i32, i32, i32
  }
  func.func @transform_1(%arg0: i32) -> (i32, i32) {
    %c0_i32 = arith.constant 0 : i32
    %c0_i32_0 = arith.constant 0 : i32
    %c0_i32_1 = arith.constant 0 : i32
    return %c0_i32, %c0_i32_0 : i32, i32
  }
  func.func @transform_2(%arg0: i32) -> (i32, i32) {
    %c0_i32 = arith.constant 0 : i32
    %c0_i32_0 = arith.constant 0 : i32
    %c0_i32_1 = arith.constant 0 : i32
    return %c0_i32, %c0_i32_0 : i32, i32
  }
  func.func @transform_3(%arg0: i32) -> (i32, i32, i32, i32) {
    %c0_i32 = arith.constant 0 : i32
    %c0_i32_0 = arith.constant 0 : i32
    %c0_i32_1 = arith.constant 0 : i32
    %c0_i32_2 = arith.constant 0 : i32
    return %arg0, %c0_i32, %c0_i32_0, %c0_i32_1 : i32, i32, i32, i32
  }
}

</mosaic_0001>

<bundles_post_ra>
// kernel: inception_forward.5
= control target key start
LH: loop header
LB: loop body
LE: loop exit
PB: predicated region body
PF: predicated region fallthrough
CT: control target
= control target key end

     0   :  { %s784_s12 = smov 0   ;;  %s945_s0 = inlined_call_operand.vmem [shape: bf16[512,16], index: 0, kind: input, shape index: {}]   ;;  %s946_s1 = inlined_call_operand.vmem [shape: bf16[16,24], index: 1, kind: input, shape index: {}]   ;;  %s947_s2 = inlined_call_operand.vmem [shape: f32[1,24], index: 2, kind: input, shape index: {}]   ;;  %s948_s3 = inlined_call_operand.vmem [shape: f32[512,24], index: 3, kind: output, shape index: {}]  }
   0x1 LB: > { %s633_s13 = sadd.s32 4294967295, %s762_s12   ;;  %p637_p0 = scmp.ge.s32.totalorder %s762_s12, 1  ;;  %s762_s12 = sphi %s784_s12, %s13_s12  }
   0x2   : > { %p138_p1 = scmp.lt.s32.totalorder %s762_s12, 3 }
   0x4   : > { %p139_p2 = pnand %p637_p0, %p138_p1 }
   0x5   : > { %s638_s16 = sshll.u32 (!%p139_p2), %s633_s13, 5 }
   0x6   : > { %142 = sbr.rel (%p139_p2) target bundleno = 245 (0xf5), region = 32  ;;  %p163_p3 = scmp.lt.s32.totalorder (!%p139_p2), %s638_s16, 63 }
   0xb   : > { %v739_v0 = vld [vmem:[%s946_s1] sm:$0xff]   ;;  %s950_s16 = smov (!%p163_p3, %s638_s16), 63  ;;  %vm302_vm0 = vcmask 130048   ;;  %vm544_vm1 = vcmask 195584  }
   0xc   : > { %695 = vmatprep.subr.bf16.mxu0 %v739_v0  ;;  %729 = vmatprep.subr.bf16.mxu1 %v739_v0  ;;  %s639_s17 = sshll.u32 %s950_s16, 2  ;;  %v838_v17 = vld [vmem:[%s947_s2] ss:$0 sm:$0xff]  ;;  %s641_s23 = sshll.u32 %s950_s16, 3 }
   0xd   : > { %696 = vmatpush3.bf16.msra.mxu0 %v739_v0  ;;  %730 = vmatpush3.bf16.msra.mxu1 %v739_v0  ;;  %s801_s20 = scalar_lea.vmem %s945_s0, %s639_s17  ;;  %s845_s26 = scalar_lea.vmem %s948_s3, %s641_s23 }
   0xe   : > { %v740_v1 = vld [vmem:[%s801_s20] sm:$0xff]   ;;  %v742_v3 = vld [vmem:[%s801_s20 + $0x8] sm:$0xff]   ;;  %v744_v5 = vld [vmem:[%s801_s20 + $0x10] sm:$0xff]  }
   0xf   : > { %v741_v2 = vld [vmem:[%s801_s20 + $0x40] sm:$0xff]   ;;  %697 = vmatprep.mubr.msk.bf16.mxu0 %vm302_vm0, %v740_v1  ;;  %v743_v4 = vld [vmem:[%s801_s20 + $0x48] sm:$0xff]   ;;  %v745_v6 = vld [vmem:[%s801_s20 + $0x50] sm:$0xff]  }
  0x10   : > { %713 = vmatprep.mubr.msk.bf16.mxu1 %vm302_vm0, %v741_v2  ;;  %698 = vmatmul.mubr.msk.bf16.vlgmr.msra.gmra.mxu0 %vm302_vm0, %v742_v3  ;;  %v746_v7 = vld [vmem:[%s801_s20 + $0x18] sm:$0xff]   ;;  %v748_v9 = vld [vmem:[%s801_s20 + $0x20] sm:$0xff]   ;;  %v750_v11 = vld [vmem:[%s801_s20 + $0x28] sm:$0xff]  }
  0x11   : > { %714 = vmatmul.mubr.msk.bf16.vlgmr.msra.gmra.mxu1 %vm302_vm0, %v743_v4  ;;  %701 = vmatprep.mubr.msk.bf16.mxu0 %vm302_vm0, %v744_v5  ;;  %v747_v8 = vld [vmem:[%s801_s20 + $0x58] sm:$0xff]   ;;  %v749_v10 = vld [vmem:[%s801_s20 + $0x60] sm:$0xff]   ;;  %v751_v12 = vld [vmem:[%s801_s20 + $0x68] sm:$0xff]  }
  0x12   : > { %717 = vmatprep.mubr.msk.bf16.mxu1 %vm302_vm0, %v745_v6  ;;  %v752_v13 = vld [vmem:[%s801_s20 + $0x30] sm:$0xff]   ;;  %v754_v15 = vld [vmem:[%s801_s20 + $0x38] sm:$0xff]  }
  0x13   : > { %v753_v14 = vld [vmem:[%s801_s20 + $0x70] sm:$0xff]   ;;  %v755_v16 = vld [vmem:[%s801_s20 + $0x78] sm:$0xff]  }
  0x18   : > { %702 = vmatmul.mubr.msk.bf16.gmra.mxu0 %vm302_vm0, %v746_v7 }
  0x19   : > { %718 = vmatmul.mubr.msk.bf16.gmra.mxu1 %vm302_vm0, %v747_v8  ;;  %705 = vmatprep.mubr.msk.bf16.mxu0 %vm302_vm0, %v748_v9 }
  0x1a   : > { %721 = vmatprep.mubr.msk.bf16.mxu1 %vm302_vm0, %v749_v10 }
  0x20   : > { %706 = vmatmul.mubr.msk.bf16.gmra.mxu0 %vm302_vm0, %v750_v11 }
  0x21   : > { %722 = vmatmul.mubr.msk.bf16.gmra.mxu1 %vm302_vm0, %v751_v12  ;;  %709 = vmatprep.mubr.msk.bf16.mxu0 %vm302_vm0, %v752_v13 }
  0x22   : > { %725 = vmatprep.mubr.msk.bf16.mxu1 %vm302_vm0, %v753_v14 }
  0x28   : > { %710 = vmatmul.mubr.msk.bf16.gmra.mxu0 %vm302_vm0, %v754_v15 }
  0x29   : > { %726 = vmatmul.mubr.msk.bf16.gmra.mxu1 %vm302_vm0, %v755_v16 }
  0xd0   : > { %v699_v18 = vpop.f32.mrf.mxu0 }
  0xd1   : > { %v394_v19 = vadd.f32 %v699_v18, %v838_v17  ;;  %v715_v20 = vpop.f32.mrf.mxu1 }
  0xd2   : > { %v458_v21 = vadd.f32 %v715_v20, %v838_v17  ;;  %v385_v22 = vpop.f32.mrf.mxu0 }
  0xd3   : > { %v514_v23 = vmax.f32 %v394_v19, 0.0  ;;  %v386_v24 = vadd.f32 %v838_v17, %v385_v22  ;;  %v449_v25 = vpop.f32.mrf.mxu1 }
  0xd4   : > { %v530_v26 = vmax.f32 %v458_v21, 0.0  ;;  %v450_v27 = vadd.f32 %v838_v17, %v449_v25  ;;  %v700_v28 = vpop.f32.mrf.mxu0 }
  0xd5   : > { %547 = vst.msk [vmem:[%s845_s26 + $0x10] sm:$0xff] %vm544_vm1, %v514_v23  ;;  %v512_v29 = vmax.f32 %v386_v24, 0.0  ;;  %v397_v30 = vadd.f32 %v700_v28, %v838_v17  ;;  %v716_v31 = vpop.f32.mrf.mxu1 }
  0xd6   : > { %563 = vst.msk [vmem:[%s845_s26 + $0x90] sm:$0xff] %vm544_vm1, %v530_v26  ;;  %v528_v32 = vmax.f32 %v450_v27, 0.0  ;;  %v461_v33 = vadd.f32 %v716_v31, %v838_v17  ;;  %v388_v34 = vpop.f32.mrf.mxu0 }
  0xd7   : > { %545 = vst.msk [vmem:[%s845_s26] sm:$0xff] %vm544_vm1, %v512_v29  ;;  %v515_v35 = vmax.f32 %v397_v30, 0.0  ;;  %v389_v36 = vadd.f32 %v838_v17, %v388_v34  ;;  %v452_v37 = vpop.f32.mrf.mxu1 }
  0xd8   : > { %561 = vst.msk [vmem:[%s845_s26 + $0x80] sm:$0xff] %vm544_vm1, %v528_v32  ;;  %v531_v38 = vmax.f32 %v461_v33, 0.0  ;;  %v453_v39 = vadd.f32 %v838_v17, %v452_v37  ;;  %v703_v40 = vpop.f32.mrf.mxu0 }
  0xd9   : > { %548 = vst.msk [vmem:[%s845_s26 + $0x18] sm:$0xff] %vm544_vm1, %v515_v35  ;;  %v513_v41 = vmax.f32 %v389_v36, 0.0  ;;  %v410_v42 = vadd.f32 %v703_v40, %v838_v17  ;;  %v719_v43 = vpop.f32.mrf.mxu1 }
  0xda   : > { %564 = vst.msk [vmem:[%s845_s26 + $0x98] sm:$0xff] %vm544_vm1, %v531_v38  ;;  %v529_v44 = vmax.f32 %v453_v39, 0.0  ;;  %v474_v45 = vadd.f32 %v719_v43, %v838_v17  ;;  %v401_v46 = vpop.f32.mrf.mxu0 }
  0xdb   : > { %546 = vst.msk [vmem:[%s845_s26 + $0x8] sm:$0xff] %vm544_vm1, %v513_v41  ;;  %v518_v47 = vmax.f32 %v410_v42, 0.0  ;;  %v402_v48 = vadd.f32 %v838_v17, %v401_v46  ;;  %v465_v49 = vpop.f32.mrf.mxu1 }
  0xdc   : > { %562 = vst.msk [vmem:[%s845_s26 + $0x88] sm:$0xff] %vm544_vm1, %v529_v44  ;;  %v534_v50 = vmax.f32 %v474_v45, 0.0  ;;  %v466_v51 = vadd.f32 %v838_v17, %v465_v49  ;;  %v704_v52 = vpop.f32.mrf.mxu0 }
  0xdd   : > { %551 = vst.msk [vmem:[%s845_s26 + $0x30] sm:$0xff] %vm544_vm1, %v518_v47  ;;  %v516_v53 = vmax.f32 %v402_v48, 0.0  ;;  %v413_v54 = vadd.f32 %v704_v52, %v838_v17  ;;  %v720_v55 = vpop.f32.mrf.mxu1 }
  0xde   : > { %567 = vst.msk [vmem:[%s845_s26 + $0xb0] sm:$0xff] %vm544_vm1, %v534_v50  ;;  %v532_v56 = vmax.f32 %v466_v51, 0.0  ;;  %v477_v57 = vadd.f32 %v720_v55, %v838_v17  ;;  %v404_v58 = vpop.f32.mrf.mxu0 }
  0xdf   : > { %549 = vst.msk [vmem:[%s845_s26 + $0x20] sm:$0xff] %vm544_vm1, %v516_v53  ;;  %v519_v59 = vmax.f32 %v413_v54, 0.0  ;;  %v405_v60 = vadd.f32 %v838_v17, %v404_v58  ;;  %v468_v61 = vpop.f32.mrf.mxu1 }
  0xe0   : > { %565 = vst.msk [vmem:[%s845_s26 + $0xa0] sm:$0xff] %vm544_vm1, %v532_v56  ;;  %v535_v62 = vmax.f32 %v477_v57, 0.0  ;;  %v469_v63 = vadd.f32 %v838_v17, %v468_v61  ;;  %v707_v0 = vpop.f32.mrf.mxu0 }
  0xe1   : > { %552 = vst.msk [vmem:[%s845_s26 + $0x38] sm:$0xff] %vm544_vm1, %v519_v59  ;;  %v517_v1 = vmax.f32 %v405_v60, 0.0  ;;  %v426_v2 = vadd.f32 %v707_v0, %v838_v17  ;;  %v723_v3 = vpop.f32.mrf.mxu1 }
  0xe2   : > { %568 = vst.msk [vmem:[%s845_s26 + $0xb8] sm:$0xff] %vm544_vm1, %v535_v62  ;;  %v533_v4 = vmax.f32 %v469_v63, 0.0  ;;  %v490_v5 = vadd.f32 %v723_v3, %v838_v17  ;;  %v417_v6 = vpop.f32.mrf.mxu0 }
  0xe3   : > { %550 = vst.msk [vmem:[%s845_s26 + $0x28] sm:$0xff] %vm544_vm1, %v517_v1  ;;  %v522_v7 = vmax.f32 %v426_v2, 0.0  ;;  %v418_v8 = vadd.f32 %v838_v17, %v417_v6  ;;  %v481_v9 = vpop.f32.mrf.mxu1 }
  0xe4   : > { %566 = vst.msk [vmem:[%s845_s26 + $0xa8] sm:$0xff] %vm544_vm1, %v533_v4  ;;  %v538_v10 = vmax.f32 %v490_v5, 0.0  ;;  %v482_v11 = vadd.f32 %v838_v17, %v481_v9  ;;  %v708_v12 = vpop.f32.mrf.mxu0 }
  0xe5   : > { %555 = vst.msk [vmem:[%s845_s26 + $0x50] sm:$0xff] %vm544_vm1, %v522_v7  ;;  %v520_v13 = vmax.f32 %v418_v8, 0.0  ;;  %v429_v14 = vadd.f32 %v708_v12, %v838_v17  ;;  %v724_v15 = vpop.f32.mrf.mxu1 }
  0xe6   : > { %571 = vst.msk [vmem:[%s845_s26 + $0xd0] sm:$0xff] %vm544_vm1, %v538_v10  ;;  %v536_v16 = vmax.f32 %v482_v11, 0.0  ;;  %v493_v18 = vadd.f32 %v724_v15, %v838_v17  ;;  %v420_v19 = vpop.f32.mrf.mxu0 }
  0xe7   : > { %553 = vst.msk [vmem:[%s845_s26 + $0x40] sm:$0xff] %vm544_vm1, %v520_v13  ;;  %v523_v20 = vmax.f32 %v429_v14, 0.0  ;;  %v421_v21 = vadd.f32 %v838_v17, %v420_v19  ;;  %v484_v22 = vpop.f32.mrf.mxu1 }
  0xe8   : > { %569 = vst.msk [vmem:[%s845_s26 + $0xc0] sm:$0xff] %vm544_vm1, %v536_v16  ;;  %v539_v23 = vmax.f32 %v493_v18, 0.0  ;;  %v485_v24 = vadd.f32 %v838_v17, %v484_v22  ;;  %v711_v25 = vpop.f32.mrf.mxu0 }
  0xe9   : > { %556 = vst.msk [vmem:[%s845_s26 + $0x58] sm:$0xff] %vm544_vm1, %v523_v20  ;;  %v521_v26 = vmax.f32 %v421_v21, 0.0  ;;  %v442_v27 = vadd.f32 %v711_v25, %v838_v17  ;;  %v727_v28 = vpop.f32.mrf.mxu1 }
  0xea   : > { %572 = vst.msk [vmem:[%s845_s26 + $0xd8] sm:$0xff] %vm544_vm1, %v539_v23  ;;  %v537_v29 = vmax.f32 %v485_v24, 0.0  ;;  %v506_v30 = vadd.f32 %v727_v28, %v838_v17  ;;  %v433_v31 = vpop.f32.mrf.mxu0 }
  0xeb   : > { %554 = vst.msk [vmem:[%s845_s26 + $0x48] sm:$0xff] %vm544_vm1, %v521_v26  ;;  %v526_v32 = vmax.f32 %v442_v27, 0.0  ;;  %v434_v33 = vadd.f32 %v838_v17, %v433_v31  ;;  %v497_v34 = vpop.f32.mrf.mxu1 }
  0xec   : > { %570 = vst.msk [vmem:[%s845_s26 + $0xc8] sm:$0xff] %vm544_vm1, %v537_v29  ;;  %v542_v35 = vmax.f32 %v506_v30, 0.0  ;;  %v498_v36 = vadd.f32 %v838_v17, %v497_v34  ;;  %v712_v37 = vpop.f32.mrf.mxu0 }
  0xed   : > { %559 = vst.msk [vmem:[%s845_s26 + $0x70] sm:$0xff] %vm544_vm1, %v526_v32  ;;  %v524_v38 = vmax.f32 %v434_v33, 0.0  ;;  %v445_v39 = vadd.f32 %v712_v37, %v838_v17  ;;  %v728_v40 = vpop.f32.mrf.mxu1 }
  0xee   : > { %575 = vst.msk [vmem:[%s845_s26 + $0xf0] sm:$0xff] %vm544_vm1, %v542_v35  ;;  %v540_v41 = vmax.f32 %v498_v36, 0.0  ;;  %v509_v42 = vadd.f32 %v728_v40, %v838_v17  ;;  %v436_v43 = vpop.f32.mrf.mxu0 }
  0xef   : > { %557 = vst.msk [vmem:[%s845_s26 + $0x60] sm:$0xff] %vm544_vm1, %v524_v38  ;;  %v527_v44 = vmax.f32 %v445_v39, 0.0  ;;  %v437_v45 = vadd.f32 %v838_v17, %v436_v43  ;;  %v500_v46 = vpop.f32.mrf.mxu1 }
  0xf0   : > { %573 = vst.msk [vmem:[%s845_s26 + $0xe0] sm:$0xff] %vm544_vm1, %v540_v41  ;;  %v543_v47 = vmax.f32 %v509_v42, 0.0  ;;  %v501_v48 = vadd.f32 %v838_v17, %v500_v46 }
  0xf1   : > { %560 = vst.msk [vmem:[%s845_s26 + $0x78] sm:$0xff] %vm544_vm1, %v527_v44  ;;  %v525_v49 = vmax.f32 %v437_v45, 0.0 }
  0xf2   : > { %576 = vst.msk [vmem:[%s845_s26 + $0xf8] sm:$0xff] %vm544_vm1, %v543_v47  ;;  %v541_v50 = vmax.f32 %v501_v48, 0.0 }
  0xf3   : > { %558 = vst.msk [vmem:[%s845_s26 + $0x68] sm:$0xff] %vm544_vm1, %v525_v49 }
  0xf4   : > { %574 = vst.msk [vmem:[%s845_s26 + $0xe8] sm:$0xff] %vm544_vm1, %v541_v50 }
  0xf5 PF: > { %s13_s12 = sadd.s32 1, %s762_s12  }
  0xf6   : > { %p10_p4 = scmp.ge.s32.totalorder %s13_s12, 4  }
  0xf8   :  { %12 = sbr.rel (!%p10_p4) target bundleno = 1 (0x1), region = 62 }

// kernel: inception_forward.7
= control target key start
LH: loop header
LB: loop body
LE: loop exit
PB: predicated region body
PF: predicated region fallthrough
CT: control target
= control target key end

     0   :  { %s3300_s12 = smov 0   ;;  %s4684_s0 = inlined_call_operand.vmem [shape: f32[2,18,18,8], index: 0, kind: input, shape index: {}]   ;;  %s4685_s1 = inlined_call_operand.vmem [shape: bf16[9,8,12], index: 1, kind: input, shape index: {}]   ;;  %s4686_s2 = inlined_call_operand.vmem [shape: f32[1,12], index: 2, kind: input, shape index: {}]   ;;  %s4687_s3 = inlined_call_operand.vmem [shape: f32[2,16,16,12], index: 3, kind: output, shape index: {}]  }
   0x1 LB: > { %s2628_s13 = sadd.s32 4294967295, %s3278_s12   ;;  %p2632_p0 = scmp.ge.s32.totalorder %s3278_s12, 1  ;;  %s3278_s12 = sphi %s3300_s12, %s13_s12  }
   0x2   : > { %p137_p1 = scmp.lt.s32.totalorder %s3278_s12, 3 }
   0x4   : > { %p138_p2 = pnand %p2632_p0, %p137_p1 }
   0x6   : > { %141 = sbr.rel (%p138_p2) target bundleno = 516 (0x204), region = 32 }
   0xb   : > { %v2636_v0 = vld [vmem:[%s4685_s1 + $0x4] sm:$0xf]  ;;  %vm471_vm0 = vcmask 1043456   ;;  %p161_p3 = scmp.lt.s32.totalorder %s2628_s13, 1  ;;  %v242_v2 = vld [vmem:[%s4685_s1] sm:$0xf] }
   0xc   : > { %3254 = vmatprep.subr.msk.bf16.mxu1 %vm471_vm0, %v2636_v0  ;;  %3253 = vmatprep.subr.msk.bf16.mxu0 %vm471_vm0, %v2636_v0  ;;  %v473_v1 = vsel %vm471_vm0, %v2636_v0, 0  ;;  %v2669_v3 = vld [vmem:[%s4685_s1 + $0x8] sm:$0xf]  ;;  %vm291_vm1 = vcmask 1046528   ;;  %vm422_vm2 = vcmask 64512   ;;  %v685_v30 = vsel %vm471_vm0, %v242_v2, 0 }
   0xd   : > { %3252 = vmatpush3.bf16.msra.mxu1 %v473_v1  ;;  %2946 = vmatpush3.bf16.msra.mxu0 %v473_v1  ;;  %s4855_s13 = smov (!%p161_p3, %s2628_s13), 1  ;;  %v1028_v37 = vsel %vm471_vm0, %v2669_v3, 0  ;;  %v3424_v51 = vld [vmem:[%s4685_s1 + $0x10] sm:$0xf]  ;;  %vm848_vm3 = vcmask 1045504   ;;  %vm2540_vm4 = vcmask 97280  }
   0xe   : > { %3255 = vmatprep.subr.msk.bf16.mxu1 %vm471_vm0, %v242_v2  ;;  %3256 = vmatprep.subr.msk.bf16.mxu0 %vm471_vm0, %v2669_v3  ;;  %s3263_s20 = smul.u32 432, %s4855_s13  ;;  %s2791_s11 = sshll.u32 %s4855_s13, 8 }
   0xf   : > { %s4507_s15 = scalar_lea.vmem %s4687_s3, %s2791_s11 }
  0x10   : > { %s3328_s23 = scalar_lea.vmem %s4684_s0, %s3263_s20 }
  0x11   : > { %v3331_v4 = vld [vmem:[%s3328_s23] sm:$0xff]  ;;  %v3334_v5 = vld [vmem:[%s3328_s23 + $0x8] sm:$0xff]  ;;  %v3337_v6 = vld [vmem:[%s3328_s23 + $0x10] sm:$0x3] }
  0x12   : > { %v292_v7 = vrot.slane %v3331_v4, 1  ;;  %v293_v8 = vrot.slane %v3334_v5, 1  ;;  %v295_v9 = vrot.slane %v3337_v6, 1  ;;  %v3343_v10 = vld [vmem:[%s3328_s23 + $0xc0] sm:$0xff]  ;;  %v3346_v11 = vld [vmem:[%s3328_s23 + $0xc8] sm:$0xff]  ;;  %v3357_v18 = vld [vmem:[%s3328_s23 + $0x18] sm:$0xff] }
  0x13   : > { %v3349_v12 = vld [vmem:[%s3328_s23 + $0xd0] sm:$0x3]  ;;  %v332_v13 = vrot.slane %v3343_v10, 1  ;;  %v333_v14 = vrot.slane %v3346_v11, 1  ;;  %v3360_v19 = vld [vmem:[%s3328_s23 + $0x20] sm:$0xff]  ;;  %v297_v23 = vrot.slane %v3357_v18, 1 }
  0x14   : > { %4716 = vst [vmem:[#allocation2_spill] sm:$0xff] %v3349_v12  ;;  %v294_v15 = vsel %vm291_vm1, %v292_v7, %v293_v8  ;;  %v296_v16 = vsel %vm291_vm1, %v293_v8, %v295_v9  ;;  %v335_v17 = vrot.slane %v3349_v12, 1  ;;  %v3363_v20 = vld [vmem:[%s3328_s23 + $0x28] sm:$0x3]  ;;  %v298_v24 = vrot.slane %v3360_v19, 1  ;;  %v3369_v25 = vld [vmem:[%s3328_s23 + $0xd8] sm:$0xff] }
  0x15   : > { %v404_v21 = vpack.c.bf16 %v296_v16, %v294_v15  ;;  %v334_v22 = vsel %vm291_vm1, %v332_v13, %v333_v14  ;;  %v3372_v26 = vld [vmem:[%s3328_s23 + $0xe0] sm:$0xff]  ;;  %v3375_v27 = vld [vmem:[%s3328_s23 + $0xe8] sm:$0x3]  ;;  %v300_v29 = vrot.slane %v3363_v20, 1  ;;  %v3381_v31 = vld [vmem:[%s3328_s23 + $0x30] sm:$0xff]  ;;  %v337_v36 = vrot.slane %v3369_v25, 1 }
  0x16   : > { %4717 = vst [vmem:[#allocation3_spill] sm:$0xff] %v3375_v27  ;;  %v336_v28 = vsel %vm291_vm1, %v333_v14, %v335_v17  ;;  %v3384_v32 = vld [vmem:[%s3328_s23 + $0x38] sm:$0xff]  ;;  %v3387_v33 = vld [vmem:[%s3328_s23 + $0xf0] sm:$0xff]  ;;  %v299_v35 = vsel %vm291_vm1, %v297_v23, %v298_v24  ;;  %v3396_v38 = vld [vmem:[%s3328_s23 + $0x40] sm:$0x3]  ;;  %v338_v41 = vrot.slane %v3372_v26, 1 }
  0x17   : > { %2947 = vmatprep.mubr.msk.bf16.mxu0 %vm422_vm2, %v404_v21  ;;  %v3390_v34 = vpack.c.bf16 %v336_v28, %v334_v22  ;;  %v3399_v39 = vld [vmem:[%s3328_s23 + $0xf8] sm:$0xff]  ;;  %v301_v40 = vsel %vm291_vm1, %v298_v24, %v300_v29  ;;  %v340_v42 = vrot.slane %v3375_v27, 1  ;;  %v302_v43 = vrot.slane %v3381_v31, 1  ;;  %v3406_v44 = vld [vmem:[%s3328_s23 + $0x100] sm:$0x3]  ;;  %v3409_v45 = vld [vmem:[%s3328_s23 + $0x48] sm:$0xff] }
  0x18   : > { %4719 = vst [vmem:[#allocation5_spill] sm:$0xff] %v3406_v44  ;;  %v3413_v46 = vpack.c.bf16 %v301_v40, %v299_v35  ;;  %v303_v47 = vrot.slane %v3384_v32, 1  ;;  %v305_v48 = vrot.slane %v3396_v38, 1  ;;  %v342_v49 = vrot.slane %v3387_v33, 1  ;;  %v3419_v50 = vld [vmem:[%s3328_s23 + $0x50] sm:$0xff]  ;;  %v3434_v57 = vld [vmem:[%s3328_s23 + $0x108] sm:$0xff] }
  0x19   : > { %4718 = vst [vmem:[#allocation4_spill] sm:$0xff] %v3390_v34  ;;  %2963 = vmatprep.mubr.msk.bf16.mxu1 %vm422_vm2, %v3390_v34  ;;  %v339_v52 = vsel %vm291_vm1, %v337_v36, %v338_v41  ;;  %v341_v53 = vsel %vm291_vm1, %v338_v41, %v340_v42  ;;  %v343_v54 = vrot.slane %v3399_v39, 1  ;;  %v345_v55 = vrot.slane %v3406_v44, 1  ;;  %v3431_v56 = vld [vmem:[%s3328_s23 + $0x58] sm:$0x3]  ;;  %v3437_v58 = vld [vmem:[%s3328_s23 + $0x110] sm:$0xff] }
  0x1a   : > { %4720 = vst [vmem:[#allocation6_spill] sm:$0xff] %v3413_v46  ;;  %2948 = vmatmul.mubr.msk.bf16.vlgmr.msra.gmra.mxu0 %vm422_vm2, %v3413_v46  ;;  %v3441_v59 = vpack.c.bf16 %v341_v53, %v339_v52  ;;  %v304_v60 = vsel %vm291_vm1, %v302_v43, %v303_v47  ;;  %v306_v61 = vsel %vm291_vm1, %v303_v47, %v305_v48  ;;  %v307_v62 = vrot.slane %v3409_v45, 1  ;;  %v3447_v63 = vld [vmem:[%s3328_s23 + $0x118] sm:$0x3]  ;;  %v3450_v0 = vld [vmem:[%s3328_s23 + $0x60] sm:$0xff]  ;;  %v3453_v1 = vld [vmem:[%s3328_s23 + $0x68] sm:$0xff] }
  0x1b   : > { %4722 = vst [vmem:[#allocation8_spill] sm:$0xff] %v3447_v63  ;;  %3014 = vmatpush3.bf16.msra.mxu0 %v1028_v37  ;;  %v3455_v2 = vpack.c.bf16 %v306_v61, %v304_v60  ;;  %v344_v3 = vsel %vm291_vm1, %v342_v49, %v343_v54  ;;  %v346_v7 = vsel %vm291_vm1, %v343_v54, %v345_v55  ;;  %v308_v8 = vrot.slane %v3419_v50, 1  ;;  %v3461_v9 = vld [vmem:[%s3328_s23 + $0x70] sm:$0x3]  ;;  %v3464_v13 = vld [vmem:[%s3328_s23 + $0x120] sm:$0xff]  ;;  %v3479_v22 = vld [vmem:[%s3328_s23 + $0x128] sm:$0xff] }
  0x1c   : > { %4721 = vst [vmem:[#allocation7_spill] sm:$0xff] %v3441_v59  ;;  %v3469_v14 = vld [vmem:[%s4685_s1 + $0xc] sm:$0xf]  ;;  %2964 = vmatmul.mubr.msk.bf16.vlgmr.msra.gmra.mxu1 %vm422_vm2, %v3441_v59  ;;  %v3473_v15 = vpack.c.bf16 %v346_v7, %v344_v3  ;;  %v310_v16 = vrot.slane %v3431_v56, 1  ;;  %v347_v17 = vrot.slane %v3434_v57, 1  ;;  %v348_v21 = vrot.slane %v3437_v58, 1  ;;  %3258 = vmatprep.subr.msk.bf16.mxu0 %vm471_vm0, %v3424_v51 }
  0x1d   : > { %4723 = vst [vmem:[#allocation9_spill] sm:$0xff] %v3455_v2  ;;  %2980 = vmatpush3.bf16.msra.mxu1 %v685_v30  ;;  %2951 = vmatprep.mubr.msk.bf16.mxu0 %vm422_vm2, %v3455_v2  ;;  %v309_v23 = vsel %vm291_vm1, %v307_v62, %v308_v8  ;;  %v350_v24 = vrot.slane %v3447_v63, 1  ;;  %v312_v28 = vrot.slane %v3450_v0, 1  ;;  %v313_v29 = vrot.slane %v3453_v1, 1  ;;  %v3490_v35 = vld [vmem:[%s3328_s23 + $0x130] sm:$0x3] }
  0x1e   : > { %4724 = vst [vmem:[#allocation10_spill] sm:$0xff] %v3473_v15  ;;  %4725 = vst [vmem:[#allocation11_spill] sm:$0xff] %v3490_v35  ;;  %v3493_v36 = vld [vmem:[%s3328_s23 + $0x78] sm:$0xff]  ;;  %2967 = vmatprep.mubr.msk.bf16.mxu1 %vm422_vm2, %v3473_v15  ;;  %v311_v30 = vsel %vm291_vm1, %v308_v8, %v310_v16  ;;  %v349_v37 = vsel %vm291_vm1, %v347_v17, %v348_v21  ;;  %v315_v40 = vrot.slane %v3461_v9, 1  ;;  %v352_v41 = vrot.slane %v3464_v13, 1  ;;  %v3502_v42 = vld [vmem:[%s3328_s23 + $0x80] sm:$0xff] }
  0x1f   : > { %v3505_v43 = vld [vmem:[%s3328_s23 + $0x88] sm:$0x3]  ;;  %3257 = vmatprep.subr.msk.bf16.mxu1 %vm471_vm0, %v3469_v14  ;;  %v3509_v47 = vpack.c.bf16 %v311_v30, %v309_v23  ;;  %v351_v48 = vsel %vm291_vm1, %v348_v21, %v350_v24  ;;  %v314_v49 = vsel %vm291_vm1, %v312_v28, %v313_v29  ;;  %v353_v52 = vrot.slane %v3479_v22, 1  ;;  %v3515_v53 = vld [vmem:[%s3328_s23 + $0x138] sm:$0xff]  ;;  %v3518_v54 = vld [vmem:[%s3328_s23 + $0x140] sm:$0xff] }
  0x20   : > { %v3521_v55 = vld [vmem:[%s3328_s23 + $0x148] sm:$0x3]  ;;  %v3523_v60 = vpack.c.bf16 %v351_v48, %v349_v37  ;;  %v316_v61 = vsel %vm291_vm1, %v313_v29, %v315_v40  ;;  %v355_v62 = vrot.slane %v3490_v35, 1  ;;  %v317_v3 = vrot.slane %v3493_v36, 1  ;;  %v3529_v7 = vld [vmem:[%s3328_s23 + $0x90] sm:$0xff]  ;;  %v3537_v23 = vld [vmem:[%s3328_s23 + $0x98] sm:$0xff] }
  0x21   : > { %4726 = vst [vmem:[#allocation12_spill] sm:$0xff] %v3509_v47  ;;  %4727 = vst [vmem:[#allocation13_spill] sm:$0xff] %v3521_v55  ;;  %v3531_v8 = vpack.c.bf16 %v316_v61, %v314_v49  ;;  %v354_v16 = vsel %vm291_vm1, %v352_v41, %v353_v52  ;;  %v318_v17 = vrot.slane %v3502_v42, 1  ;;  %v320_v21 = vrot.slane %v3505_v43, 1  ;;  %v3540_v24 = vld [vmem:[%s3328_s23 + $0x150] sm:$0xff]  ;;  %v3552_v41 = vld [vmem:[%s3328_s23 + $0x158] sm:$0xff] }
  0x22   : > { %4728 = vst [vmem:[#allocation14_spill] sm:$0xff] %v3523_v60  ;;  %2952 = vmatmul.mubr.msk.bf16.gmra.mxu0 %vm422_vm2, %v3509_v47  ;;  %v356_v28 = vsel %vm291_vm1, %v353_v52, %v355_v62  ;;  %v357_v29 = vrot.slane %v3515_v53, 1  ;;  %v358_v30 = vrot.slane %v3518_v54, 1  ;;  %v360_v37 = vrot.slane %v3521_v55, 1  ;;  %v3549_v40 = vld [vmem:[%s3328_s23 + $0xa0] sm:$0x3] }
  0x23   : > { %4729 = vst [vmem:[#allocation15_spill] sm:$0xff] %v3531_v8  ;;  %2955 = vmatprep.mubr.msk.bf16.mxu0 %vm422_vm2, %v3531_v8  ;;  %v3556_v48 = vpack.c.bf16 %v356_v28, %v354_v16  ;;  %v319_v49 = vsel %vm291_vm1, %v317_v3, %v318_v17  ;;  %v321_v52 = vsel %vm291_vm1, %v318_v17, %v320_v21  ;;  %v322_v61 = vrot.slane %v3529_v7, 1  ;;  %v3562_v62 = vld [vmem:[%s3328_s23 + $0x160] sm:$0x3]  ;;  %v3565_v15 = vld [vmem:[%s3328_s23 + $0xa8] sm:$0xff]  ;;  %v3574_v17 = vld [vmem:[%s3328_s23 + $0xb0] sm:$0xff] }
  0x24   : > { %4731 = vst [vmem:[#allocation17_spill] sm:$0xff] %v3562_v62  ;;  %4732 = vst [vmem:[#allocation18_spill] sm:$0xff] %v3565_v15  ;;  %v849_v59 = vrot.slane %v3331_v4, 2  ;;  %v850_v34 = vrot.slane %v3334_v5, 2  ;;  %2968 = vmatmul.mubr.msk.bf16.gmra.mxu1 %vm422_vm2, %v3523_v60  ;;  %v359_v3 = vsel %vm291_vm1, %v357_v29, %v358_v30  ;;  %v323_v16 = vrot.slane %v3537_v23, 1  ;;  %v3591_v35 = vld [vmem:[%s3328_s23 + $0x168] sm:$0xff] }
  0x25   : > { %4730 = vst [vmem:[#allocation16_spill] sm:$0xff] %v3556_v48  ;;  %v3577_v21 = vld [vmem:[%s3328_s23 + $0xb8] sm:$0x3]  ;;  %2971 = vmatprep.mubr.msk.bf16.mxu1 %vm422_vm2, %v3556_v48  ;;  %v361_v28 = vsel %vm291_vm1, %v358_v30, %v360_v37  ;;  %v325_v8 = vrot.slane %v3549_v40, 1  ;;  %v362_v47 = vrot.slane %v3540_v24, 1  ;;  %v363_v60 = vrot.slane %v3552_v41, 1 }
  0x26   : > { %v3585_v2 = vpack.c.bf16 %v321_v52, %v319_v49  ;;  %v324_v29 = vsel %vm291_vm1, %v322_v61, %v323_v16  ;;  %v365_v46 = vrot.slane %v3562_v62, 1  ;;  %v327_v55 = vrot.slane %v3565_v15, 1  ;;  %v3594_v63 = vld [vmem:[%s3328_s23 + $0x170] sm:$0xff]  ;;  %v3597_v48 = vld [vmem:[%s3328_s23 + $0x178] sm:$0x3] }
  0x27   : > { %v326_v30 = vsel %vm291_vm1, %v323_v16, %v325_v8  ;;  %v364_v37 = vsel %vm291_vm1, %v362_v47, %v363_v60  ;;  %v328_v44 = vrot.slane %v3574_v17, 1  ;;  %v330_v49 = vrot.slane %v3577_v21, 1 }
  0x28   : > { %v852_v52 = vrot.slane %v3337_v6, 2  ;;  %v3604_v61 = vpack.c.bf16 %v361_v28, %v359_v3  ;;  %v3606_v62 = vpack.c.bf16 %v326_v30, %v324_v29  ;;  %v366_v27 = vsel %vm291_vm1, %v363_v60, %v365_v46 }
  0x29   : > { %v3609_v12 = vpack.c.bf16 %v366_v27, %v364_v37  ;;  %v367_v15 = vrot.slane %v3591_v35, 1  ;;  %v368_v8 = vrot.slane %v3594_v63, 1  ;;  %v370_v47 = vrot.slane %v3597_v48, 1 }
  0x2a   : > { %2956 = vmatmul.mubr.msk.bf16.gmra.mxu0 %vm422_vm2, %v3585_v2  ;;  %v329_v6 = vsel %vm291_vm1, %v327_v55, %v328_v44  ;;  %v331_v3 = vsel %vm291_vm1, %v328_v44, %v330_v49  ;;  %v851_v27 = vsel %vm848_vm3, %v849_v59, %v850_v34  ;;  %v853_v46 = vsel %vm848_vm3, %v850_v34, %v852_v52 }
  0x2b   : > { %2959 = vmatprep.mubr.msk.bf16.mxu0 %vm422_vm2, %v3606_v62  ;;  %v369_v60 = vsel %vm291_vm1, %v367_v15, %v368_v8  ;;  %v371_v16 = vsel %vm291_vm1, %v368_v8, %v370_v47  ;;  %v3628_v28 = vpack.c.bf16 %v331_v3, %v329_v6  ;;  %v854_v55 = vrot.slane %v3357_v18, 2 }
  0x2c   : > { %2972 = vmatmul.mubr.msk.bf16.gmra.mxu1 %vm422_vm2, %v3604_v61  ;;  %v855_v44 = vrot.slane %v3360_v19, 2  ;;  %v857_v29 = vrot.slane %v3363_v20, 2  ;;  %v961_v30 = vpack.c.bf16 %v853_v46, %v851_v27  ;;  %v3633_v37 = vpack.c.bf16 %v371_v16, %v369_v60 }
  0x2d   : > { %2975 = vmatprep.mubr.msk.bf16.mxu1 %vm422_vm2, %v3609_v12  ;;  %v859_v34 = vrot.slane %v3381_v31, 2  ;;  %v860_v59 = vrot.slane %v3384_v32, 2  ;;  %v862_v49 = vrot.slane %v3396_v38, 2  ;;  %v226_v15 = vpack.c.bf16 %v3334_v5, %v3331_v4 }
  0x2e   : > { %4733 = vst [vmem:[#allocation19_spill] sm:$0xff] %v3633_v37  ;;  %v856_v52 = vsel %vm848_vm3, %v854_v55, %v855_v44  ;;  %v858_v20 = vsel %vm848_vm3, %v855_v44, %v857_v29  ;;  %v1442_v4 = vsel %vm471_vm0, %v3424_v51, 0  ;;  %v3654_v5 = vpack.c.bf16 %v3360_v19, %v3357_v18 }
  0x2f   : > { %v861_v8 = vsel %vm848_vm3, %v859_v34, %v860_v59  ;;  %v863_v47 = vsel %vm848_vm3, %v860_v59, %v862_v49  ;;  %v3656_v38 = vpack.c.bf16 %v858_v20, %v856_v52  ;;  %v864_v6 = vrot.slane %v3409_v45, 2 }
  0x30   : > { %v3661_v3 = vpack.c.bf16 %v3346_v11, %v3343_v10  ;;  %v3663_v27 = vpack.c.bf16 %v863_v47, %v861_v8  ;;  %v865_v46 = vrot.slane %v3419_v50, 2  ;;  %v867_v60 = vrot.slane %v3431_v56, 2  ;;  %v3685_v56 = vld [vmem:[%s4685_s1 + $0x18] sm:$0xf] }
  0x31   : > { %v3669_v51 = vpack.c.bf16 %v3372_v26, %v3369_v25  ;;  %v869_v18 = vrot.slane %v3450_v0, 2  ;;  %v870_v19 = vrot.slane %v3453_v1, 2  ;;  %v872_v16 = vrot.slane %v3461_v9, 2 }
  0x32   : > { %2960 = vmatmul.mubr.msk.bf16.gmra.mxu0 %vm422_vm2, %v3628_v28  ;;  %v3676_v55 = vpack.c.bf16 %v3399_v39, %v3387_v33  ;;  %v3680_v44 = vpack.c.bf16 %v3384_v32, %v3381_v31  ;;  %v1230_v29 = vsel %vm471_vm0, %v3469_v14, 0  ;;  %v866_v9 = vsel %vm848_vm3, %v864_v6, %v865_v46 }
  0x33   : > { %3015 = vmatprep.mubr.msk.bf16.mxu0 %vm422_vm2, %v961_v30  ;;  %v868_v31 = vsel %vm848_vm3, %v865_v46, %v867_v60  ;;  %v3697_v32 = vpack.c.bf16 %v3437_v58, %v3434_v57  ;;  %v3702_v30 = vld [vmem:[%s4685_s1 + $0x14] sm:$0xf]  ;;  %v871_v14 = vsel %vm848_vm3, %v869_v18, %v870_v19  ;;  %v873_v34 = vsel %vm848_vm3, %v870_v19, %v872_v16 }
  0x34   : > { %2976 = vmatmul.mubr.msk.bf16.gmra.mxu1 %vm422_vm2, %v3633_v37  ;;  %v3710_v59 = vpack.c.bf16 %v3479_v22, %v3464_v13  ;;  %v3718_v49 = vpack.c.bf16 %v3419_v50, %v3409_v45  ;;  %v3724_v52 = vpack.c.bf16 %v3518_v54, %v3515_v53  ;;  %v3728_v20 = vpack.c.bf16 %v873_v34, %v871_v14  ;;  %v4735_v34 = vld [vmem:[#allocation2_spill] sm:$0xff] }
  0x35   : > { %2981 = vmatprep.mubr.msk.bf16.mxu1 %vm422_vm2, %v226_v15  ;;  %v3720_v15 = vpack.c.bf16 %v868_v31, %v866_v9  ;;  %v874_v8 = vrot.slane %v3493_v36, 2  ;;  %v875_v47 = vrot.slane %v3502_v42, 2  ;;  %v879_v45 = vrot.slane %v3529_v7, 2 }
  0x36   : > { %v880_v50 = vrot.slane %v3537_v23, 2  ;;  %v882_v6 = vrot.slane %v3549_v40, 2  ;;  %v3738_v46 = vpack.c.bf16 %v3552_v41, %v3540_v24  ;;  %v3742_v60 = vpack.c.bf16 %v3453_v1, %v3450_v0 }
  0x37   : > { %v3746_v18 = vpack.c.bf16 %v3594_v63, %v3591_v35  ;;  %v885_v31 = vrot.slane %v3574_v17, 2  ;;  %v887_v14 = vrot.slane %v3577_v21, 2 }
  0x38   : > { %v881_v0 = vsel %vm848_vm3, %v879_v45, %v880_v50  ;;  %v883_v1 = vsel %vm848_vm3, %v880_v50, %v882_v6  ;;  %v890_v45 = vrot.slane %v3346_v11, 2  ;;  %v3776_v50 = vpack.c.bf16 %v3537_v23, %v3529_v7 }
  0x39   : > { %v3762_v16 = vpack.c.bf16 %v883_v1, %v881_v0  ;;  %v888_v6 = vsel %vm848_vm3, %v885_v31, %v887_v14  ;;  %v894_v7 = vrot.slane %v3369_v25, 2  ;;  %v895_v23 = vrot.slane %v3372_v26, 2 }
  0x3a   : > { %3016 = vmatmul.mubr.msk.bf16.vlgmr.msra.gmra.mxu0 %vm422_vm2, %v3656_v38  ;;  %v899_v1 = vrot.slane %v3387_v33, 2 }
  0x3b   : > { %3082 = vmatpush3.bf16.msra.mxu0 %v1442_v4  ;;  %3019 = vmatprep.mubr.msk.bf16.mxu0 %vm422_vm2, %v3663_v27  ;;  %v877_v4 = vrot.slane %v3505_v43, 2  ;;  %v876_v43 = vsel %vm848_vm3, %v874_v8, %v875_v47  ;;  %v892_v8 = vrot.slane %v4735_v34, 2  ;;  %v896_v25 = vsel %vm848_vm3, %v894_v7, %v895_v23 }
  0x3c   : > { %2982 = vmatmul.mubr.msk.bf16.vlgmr.msra.gmra.mxu1 %vm422_vm2, %v3654_v5  ;;  %3260 = vmatprep.subr.msk.bf16.mxu0 %vm471_vm0, %v3685_v56  ;;  %v904_v34 = vrot.slane %v3434_v57, 2 }
  0x3d   : > { %3048 = vmatpush3.bf16.msra.mxu1 %v1230_v29  ;;  %2985 = vmatprep.mubr.msk.bf16.mxu1 %vm422_vm2, %v3680_v44  ;;  %v878_v40 = vsel %vm848_vm3, %v875_v47, %v877_v4  ;;  %v4734_v29 = vld [vmem:[#allocation18_spill] sm:$0xff]  ;;  %v3770_v47 = vpack.c.bf16 %v3502_v42, %v3493_v36  ;;  %v889_v4 = vrot.slane %v3343_v10, 2  ;;  %v893_v11 = vsel %vm848_vm3, %v890_v45, %v892_v8 }
  0x3e   : > { %3259 = vmatprep.subr.msk.bf16.mxu1 %vm471_vm0, %v3702_v30  ;;  %v3760_v19 = vpack.c.bf16 %v878_v40, %v876_v43  ;;  %v884_v9 = vrot.slane %v4734_v29, 2  ;;  %v4736_v43 = vld [vmem:[#allocation3_spill] sm:$0xff]  ;;  %v3799_v0 = vpack.c.bf16 %v3574_v17, %v4734_v29  ;;  %v905_v8 = vrot.slane %v3437_v58, 2 }
  0x3f   : > { %v891_v10 = vsel %vm848_vm3, %v889_v4, %v890_v45  ;;  %v897_v40 = vrot.slane %v4736_v43, 2  ;;  %v4738_v4 = vld [vmem:[#allocation8_spill] sm:$0xff]  ;;  %v914_v43 = vrot.slane %v3515_v53, 2 }
  0x40   : > { %v886_v21 = vsel %vm848_vm3, %v884_v9, %v885_v31  ;;  %v3792_v42 = vpack.c.bf16 %v893_v11, %v891_v10  ;;  %v900_v9 = vrot.slane %v3399_v39, 2  ;;  %v4737_v31 = vld [vmem:[#allocation5_spill] sm:$0xff]  ;;  %v907_v45 = vrot.slane %v4738_v4, 2  ;;  %v4739_v10 = vld [vmem:[#allocation11_spill] sm:$0xff] }
  0x41   : > { %v3790_v36 = vpack.c.bf16 %v888_v6, %v886_v21  ;;  %v902_v14 = vrot.slane %v4737_v31, 2  ;;  %v898_v26 = vsel %vm848_vm3, %v895_v23, %v897_v40  ;;  %v909_v21 = vrot.slane %v3464_v13, 2 }
  0x42   : > { %3020 = vmatmul.mubr.msk.bf16.gmra.mxu0 %vm422_vm2, %v3720_v15  ;;  %v901_v17 = vsel %vm848_vm3, %v899_v1, %v900_v9  ;;  %v3816_v39 = vpack.c.bf16 %v898_v26, %v896_v25  ;;  %v910_v6 = vrot.slane %v3479_v22, 2  ;;  %v912_v11 = vrot.slane %v4739_v10, 2  ;;  %v4740_v1 = vld [vmem:[#allocation13_spill] sm:$0xff]  ;;  %v221_v10 = vld [vmem:[%s3328_s23 + $0x188] sm:$0xff] }
  0x43   : > { %3023 = vmatprep.mubr.msk.bf16.mxu0 %vm422_vm2, %v3728_v20  ;;  %v903_v33 = vsel %vm848_vm3, %v900_v9, %v902_v14  ;;  %v906_v7 = vsel %vm848_vm3, %v904_v34, %v905_v8  ;;  %v908_v57 = vsel %vm848_vm3, %v905_v8, %v907_v45  ;;  %v915_v40 = vrot.slane %v3518_v54, 2  ;;  %v4741_v25 = vld [vmem:[#allocation17_spill] sm:$0xff] }
  0x44   : > { %2986 = vmatmul.mubr.msk.bf16.gmra.mxu1 %vm422_vm2, %v3718_v49  ;;  %v3818_v29 = vpack.c.bf16 %v903_v33, %v901_v17  ;;  %v911_v58 = vsel %vm848_vm3, %v909_v21, %v910_v6  ;;  %v913_v13 = vsel %vm848_vm3, %v910_v6, %v912_v11  ;;  %v3838_v22 = vpack.c.bf16 %v908_v57, %v906_v7  ;;  %v220_v6 = vld [vmem:[%s3328_s23 + $0x180] sm:$0xff]  ;;  %v222_v11 = vld [vmem:[%s3328_s23 + $0x190] sm:$0x3] }
  0x45   : > { %2989 = vmatprep.mubr.msk.bf16.mxu1 %vm422_vm2, %v3742_v60  ;;  %v3840_v23 = vpack.c.bf16 %v913_v13, %v911_v58  ;;  %v917_v9 = vrot.slane %v4740_v1, 2  ;;  %v919_v31 = vrot.slane %v3540_v24, 2  ;;  %v920_v14 = vrot.slane %v3552_v41, 2  ;;  %v2771_v1 = vld [vmem:[%s4685_s1 + $0x20] sm:$0xf] }
  0x46   : > { %v922_v26 = vrot.slane %v4741_v25, 2  ;;  %v916_v17 = vsel %vm848_vm3, %v914_v43, %v915_v40  ;;  %v924_v34 = vrot.slane %v3591_v35, 2  ;;  %v925_v8 = vrot.slane %v3594_v63, 2  ;;  %v4742_v43 = vld [vmem:[#allocation6_spill] sm:$0xff]  ;;  %v4747_v25 = vld [vmem:[#allocation7_spill] sm:$0xff] }
  0x47   : > { %v918_v53 = vsel %vm848_vm3, %v915_v40, %v917_v9  ;;  %v921_v54 = vsel %vm848_vm3, %v919_v31, %v920_v14  ;;  %v927_v4 = vrot.slane %v3597_v48, 2  ;;  %v1637_v63 = vrot.slane %v220_v6, 2  ;;  %v4743_v9 = vld [vmem:[#allocation9_spill] sm:$0xff] }
  0x48   : > { %v923_v24 = vsel %vm848_vm3, %v920_v14, %v922_v26  ;;  %v3860_v41 = vpack.c.bf16 %v918_v53, %v916_v17  ;;  %v926_v45 = vsel %vm848_vm3, %v924_v34, %v925_v8  ;;  %v1638_v35 = vrot.slane %v221_v10, 2  ;;  %v4744_v14 = vld [vmem:[#allocation12_spill] sm:$0xff]  ;;  %v4748_v26 = vld [vmem:[#allocation10_spill] sm:$0xff] }
  0x49   : > { %v3862_v33 = vpack.c.bf16 %v923_v24, %v921_v54  ;;  %v928_v21 = vsel %vm848_vm3, %v925_v8, %v927_v4  ;;  %v1640_v7 = vrot.slane %v222_v11, 2  ;;  %v1853_v40 = vsel %vm471_vm0, %v3685_v56, 0  ;;  %v4745_v56 = vld [vmem:[#allocation15_spill] sm:$0xff]  ;;  %v4749_v17 = vld [vmem:[#allocation14_spill] sm:$0xff]  ;;  %v4750_v53 = vld [vmem:[#allocation16_spill] sm:$0xff] }
  0x4a   : > { %3024 = vmatmul.mubr.msk.bf16.gmra.mxu0 %vm422_vm2, %v3760_v19  ;;  %v3879_v48 = vpack.c.bf16 %v928_v21, %v926_v45  ;;  %v1639_v57 = vsel %vm848_vm3, %v1637_v63, %v1638_v35  ;;  %v1651_v31 = vsel %vm471_vm0, %v3702_v30, 0  ;;  %v4746_v30 = vld [vmem:[#allocation4_spill] sm:$0xff]  ;;  %v1428_v54 = vrot.slane %v220_v6, 1 }
  0x4b   : > { %3027 = vmatprep.mubr.msk.bf16.mxu0 %vm422_vm2, %v3762_v16  ;;  %v1641_v58 = vsel %vm848_vm3, %v1638_v35, %v1640_v7  ;;  %v1429_v24 = vrot.slane %v221_v10, 1  ;;  %v1431_v34 = vrot.slane %v222_v11, 1  ;;  %v1223_v21 = vpack.c.bf16 %v221_v10, %v220_v6  ;;  %v4053_v7 = vld [vmem:[%s3328_s23 + $0x198] sm:$0xff] }
  0x4c   : > { %2990 = vmatmul.mubr.msk.bf16.gmra.mxu1 %vm422_vm2, %v3770_v47  ;;  %v3886_v13 = vpack.c.bf16 %v1641_v58, %v1639_v57  ;;  %v2274_v63 = vsel %vm471_vm0, %v2771_v1, 0  ;;  %v4056_v57 = vld [vmem:[%s3328_s23 + $0x1a0] sm:$0xff] }
  0x4d   : > { %2993 = vmatprep.mubr.msk.bf16.mxu1 %vm422_vm2, %v3776_v50  ;;  %v1430_v8 = vsel %vm291_vm1, %v1428_v54, %v1429_v24  ;;  %v1432_v4 = vsel %vm291_vm1, %v1429_v24, %v1431_v34 }
  0x4e   : > { %v3964_v45 = vpack.c.bf16 %v1432_v4, %v1430_v8 }
  0x50   : > { %4751 = vst [vmem:[#allocation18_spill] sm:$0xff] %v3964_v45 }
  0x52   : > { %3028 = vmatmul.mubr.msk.bf16.gmra.mxu0 %vm422_vm2, %v3790_v36 }
  0x53   : > { %3031 = vmatprep.mubr.msk.bf16.mxu0 %vm422_vm2, %v3792_v42 }
  0x54   : > { %2994 = vmatmul.mubr.msk.bf16.gmra.mxu1 %vm422_vm2, %v3799_v0 }
  0x55   : > { %2997 = vmatprep.mubr.msk.bf16.mxu1 %vm422_vm2, %v3661_v3 }
  0x5a   : > { %3032 = vmatmul.mubr.msk.bf16.gmra.mxu0 %vm422_vm2, %v3816_v39 }
  0x5b   : > { %3035 = vmatprep.mubr.msk.bf16.mxu0 %vm422_vm2, %v3818_v29 }
  0x5c   : > { %2998 = vmatmul.mubr.msk.bf16.gmra.mxu1 %vm422_vm2, %v3669_v51 }
  0x5d   : > { %3001 = vmatprep.mubr.msk.bf16.mxu1 %vm422_vm2, %v3676_v55 }
  0x62   : > { %3036 = vmatmul.mubr.msk.bf16.gmra.mxu0 %vm422_vm2, %v3838_v22 }
  0x63   : > { %3039 = vmatprep.mubr.msk.bf16.mxu0 %vm422_vm2, %v3840_v23 }
  0x64   : > { %3002 = vmatmul.mubr.msk.bf16.gmra.mxu1 %vm422_vm2, %v3697_v32 }
  0x65   : > { %3005 = vmatprep.mubr.msk.bf16.mxu1 %vm422_vm2, %v3710_v59 }
  0x6a   : > { %3040 = vmatmul.mubr.msk.bf16.gmra.mxu0 %vm422_vm2, %v3860_v41 }
  0x6b   : > { %3043 = vmatprep.mubr.msk.bf16.mxu0 %vm422_vm2, %v3862_v33 }
  0x6c   : > { %3006 = vmatmul.mubr.msk.bf16.gmra.mxu1 %vm422_vm2, %v3724_v52 }
  0x6d   : > { %3009 = vmatprep.mubr.msk.bf16.mxu1 %vm422_vm2, %v3738_v46 }
  0x72   : > { %3044 = vmatmul.mubr.msk.bf16.gmra.mxu0 %vm422_vm2, %v3879_v48 }
  0x73   : > { %3083 = vmatprep.mubr.msk.bf16.mxu0 %vm422_vm2, %v4742_v43 }
  0x74   : > { %3010 = vmatmul.mubr.msk.bf16.gmra.mxu1 %vm422_vm2, %v3746_v18 }
  0x75   : > { %3049 = vmatprep.mubr.msk.bf16.mxu1 %vm422_vm2, %v3654_v5  ;;  %v2754_v5 = vld [vmem:[%s4685_s1 + $0x1c] sm:$0xf] }
  0x76   : > { %v2065_v35 = vsel %vm471_vm0, %v2754_v5, 0 }
  0x7a   : > { %3084 = vmatmul.mubr.msk.bf16.vlgmr.msra.gmra.mxu0 %vm422_vm2, %v4743_v9 }
  0x7b   : > { %3150 = vmatpush3.bf16.msra.mxu0 %v1853_v40  ;;  %3087 = vmatprep.mubr.msk.bf16.mxu0 %vm422_vm2, %v4744_v14 }
  0x7c   : > { %3050 = vmatmul.mubr.msk.bf16.vlgmr.msra.gmra.mxu1 %vm422_vm2, %v3680_v44  ;;  %3262 = vmatprep.subr.msk.bf16.mxu0 %vm471_vm0, %v2771_v1 }
  0x7d   : > { %3116 = vmatpush3.bf16.msra.mxu1 %v1651_v31  ;;  %3053 = vmatprep.mubr.msk.bf16.mxu1 %vm422_vm2, %v3718_v49 }
  0x7e   : > { %3261 = vmatprep.subr.msk.bf16.mxu1 %vm471_vm0, %v2754_v5 }
  0x82   : > { %3088 = vmatmul.mubr.msk.bf16.gmra.mxu0 %vm422_vm2, %v4745_v56 }
  0x83   : > { %3091 = vmatprep.mubr.msk.bf16.mxu0 %vm422_vm2, %v3585_v2 }
  0x84   : > { %3054 = vmatmul.mubr.msk.bf16.gmra.mxu1 %vm422_vm2, %v3742_v60 }
  0x85   : > { %3057 = vmatprep.mubr.msk.bf16.mxu1 %vm422_vm2, %v3770_v47 }
  0x8a   : > { %3092 = vmatmul.mubr.msk.bf16.gmra.mxu0 %vm422_vm2, %v3606_v62 }
  0x8b   : > { %3095 = vmatprep.mubr.msk.bf16.mxu0 %vm422_vm2, %v3628_v28 }
  0x8c   : > { %3058 = vmatmul.mubr.msk.bf16.gmra.mxu1 %vm422_vm2, %v3776_v50 }
  0x8d   : > { %3061 = vmatprep.mubr.msk.bf16.mxu1 %vm422_vm2, %v3799_v0 }
  0x92   : > { %3096 = vmatmul.mubr.msk.bf16.gmra.mxu0 %vm422_vm2, %v4746_v30 }
  0x93   : > { %3099 = vmatprep.mubr.msk.bf16.mxu0 %vm422_vm2, %v4747_v25 }
  0x94   : > { %3062 = vmatmul.mubr.msk.bf16.gmra.mxu1 %vm422_vm2, %v3661_v3 }
  0x95   : > { %3065 = vmatprep.mubr.msk.bf16.mxu1 %vm422_vm2, %v3669_v51 }
  0x9a   : > { %3100 = vmatmul.mubr.msk.bf16.gmra.mxu0 %vm422_vm2, %v4748_v26 }
  0x9b   : > { %3103 = vmatprep.mubr.msk.bf16.mxu0 %vm422_vm2, %v4749_v17 }
  0x9c   : > { %3066 = vmatmul.mubr.msk.bf16.gmra.mxu1 %vm422_vm2, %v3676_v55 }
  0x9d   : > { %3069 = vmatprep.mubr.msk.bf16.mxu1 %vm422_vm2, %v3697_v32 }
  0xa2   : > { %3104 = vmatmul.mubr.msk.bf16.gmra.mxu0 %vm422_vm2, %v4750_v53 }
  0xa3   : > { %3107 = vmatprep.mubr.msk.bf16.mxu0 %vm422_vm2, %v3604_v61 }
  0xa4   : > { %3070 = vmatmul.mubr.msk.bf16.gmra.mxu1 %vm422_vm2, %v3710_v59 }
  0xa5   : > { %3073 = vmatprep.mubr.msk.bf16.mxu1 %vm422_vm2, %v3724_v52 }
  0xaa   : > { %3108 = vmatmul.mubr.msk.bf16.gmra.mxu0 %vm422_vm2, %v3609_v12 }
  0xab   : > { %3111 = vmatprep.mubr.msk.bf16.mxu0 %vm422_vm2, %v3633_v37 }
  0xac   : > { %3074 = vmatmul.mubr.msk.bf16.gmra.mxu1 %vm422_vm2, %v3738_v46 }
  0xad   : > { %3077 = vmatprep.mubr.msk.bf16.mxu1 %vm422_vm2, %v3746_v18 }
  0xb2   : > { %3112 = vmatmul.mubr.msk.bf16.gmra.mxu0 %vm422_vm2, %v3964_v45 }
  0xb3   : > { %3151 = vmatprep.mubr.msk.bf16.mxu0 %vm422_vm2, %v3680_v44 }
  0xb4   : > { %3078 = vmatmul.mubr.msk.bf16.gmra.mxu1 %vm422_vm2, %v1223_v21 }
  0xb5   : > { %3117 = vmatprep.mubr.msk.bf16.mxu1 %vm422_vm2, %v3656_v38 }
  0xba   : > { %3152 = vmatmul.mubr.msk.bf16.vlgmr.msra.gmra.mxu0 %vm422_vm2, %v3718_v49 }
  0xbb   : > { %3218 = vmatpush3.bf16.msra.mxu0 %v2274_v63  ;;  %3155 = vmatprep.mubr.msk.bf16.mxu0 %vm422_vm2, %v3742_v60 }
  0xbc   : > { %3118 = vmatmul.mubr.msk.bf16.vlgmr.msra.gmra.mxu1 %vm422_vm2, %v3663_v27 }
  0xbd   : > { %3184 = vmatpush3.bf16.msra.mxu1 %v2065_v35  ;;  %3121 = vmatprep.mubr.msk.bf16.mxu1 %vm422_vm2, %v3720_v15 }
  0xc2   : > { %3156 = vmatmul.mubr.msk.bf16.gmra.mxu0 %vm422_vm2, %v3770_v47 }
  0xc3   : > { %3159 = vmatprep.mubr.msk.bf16.mxu0 %vm422_vm2, %v3776_v50 }
  0xc4   : > { %3122 = vmatmul.mubr.msk.bf16.gmra.mxu1 %vm422_vm2, %v3728_v20 }
  0xc5   : > { %3125 = vmatprep.mubr.msk.bf16.mxu1 %vm422_vm2, %v3760_v19 }
  0xca   : > { %3160 = vmatmul.mubr.msk.bf16.gmra.mxu0 %vm422_vm2, %v3799_v0 }
  0xcb   : > { %3163 = vmatprep.mubr.msk.bf16.mxu0 %vm422_vm2, %v3661_v3 }
  0xcc   : > { %3126 = vmatmul.mubr.msk.bf16.gmra.mxu1 %vm422_vm2, %v3762_v16 }
  0xcd   : > { %3129 = vmatprep.mubr.msk.bf16.mxu1 %vm422_vm2, %v3790_v36 }
  0xd2   : > { %3164 = vmatmul.mubr.msk.bf16.gmra.mxu0 %vm422_vm2, %v3669_v51 }
  0xd3   : > { %3167 = vmatprep.mubr.msk.bf16.mxu0 %vm422_vm2, %v3676_v55 }
  0xd4   : > { %3130 = vmatmul.mubr.msk.bf16.gmra.mxu1 %vm422_vm2, %v3792_v42 }
  0xd5   : > { %3133 = vmatprep.mubr.msk.bf16.mxu1 %vm422_vm2, %v3816_v39 }
  0xda   : > { %v2949_v38 = vpop.f32.mrf.mxu0  ;;  %3168 = vmatmul.mubr.msk.bf16.gmra.mxu0 %vm422_vm2, %v3697_v32 }
  0xdb   : > { %3171 = vmatprep.mubr.msk.bf16.mxu0 %vm422_vm2, %v3710_v59 }
  0xdc   : > { %v4011_v3 = vpop.f32.mrf.mxu1  ;;  %3134 = vmatmul.mubr.msk.bf16.gmra.mxu1 %vm422_vm2, %v3818_v29  ;;  %v509_v51 = vpop.f32.mrf.mxu0 }
  0xdd   : > { %3137 = vmatprep.mubr.msk.bf16.mxu1 %vm422_vm2, %v3838_v22 }
  0xde   : > { %v4017_v55 = vpop.f32.mrf.mxu1  ;;  %v2950_v44 = vpop.f32.mrf.mxu0 }
  0xe0   : > { %v4019_v49 = vpop.f32.mrf.mxu1  ;;  %v512_v60 = vpop.f32.mrf.mxu0 }
  0xe2   : > { %v4021_v47 = vpop.f32.mrf.mxu1  ;;  %v4023_v32 = vpop.f32.mrf.mxu0  ;;  %3172 = vmatmul.mubr.msk.bf16.gmra.mxu0 %vm422_vm2, %v3724_v52 }
  0xe3   : > { %3175 = vmatprep.mubr.msk.bf16.mxu0 %vm422_vm2, %v3738_v46 }
  0xe4   : > { %v4029_v59 = vpop.f32.mrf.mxu1  ;;  %3138 = vmatmul.mubr.msk.bf16.gmra.mxu1 %vm422_vm2, %v3840_v23  ;;  %v4033_v50 = vpop.f32.mrf.mxu0 }
  0xe5   : > { %3141 = vmatprep.mubr.msk.bf16.mxu1 %vm422_vm2, %v3860_v41 }
  0xe6   : > { %v4037_v0 = vpop.f32.mrf.mxu1  ;;  %v4039_v6 = vpop.f32.mrf.mxu0 }
  0xe8   : > { %v4041_v10 = vpop.f32.mrf.mxu1  ;;  %v4043_v52 = vpop.f32.mrf.mxu0 }
  0xea   : > { %v4045_v11 = vpop.f32.mrf.mxu1  ;;  %v4047_v46 = vpop.f32.mrf.mxu0  ;;  %3176 = vmatmul.mubr.msk.bf16.gmra.mxu0 %vm422_vm2, %v3746_v18  ;;  %v1846_v18 = vpack.c.bf16 %v4056_v57, %v4053_v7 }
  0xeb   : > { %3179 = vmatprep.mubr.msk.bf16.mxu0 %vm422_vm2, %v1223_v21 }
  0xec   : > { %v4058_v58 = vpop.f32.mrf.mxu1  ;;  %3142 = vmatmul.mubr.msk.bf16.gmra.mxu1 %vm422_vm2, %v3862_v33  ;;  %v4062_v43 = vpop.f32.mrf.mxu0 }
  0xed   : > { %4752 = vst [vmem:[#allocation2_spill] sm:$0xff] %v4058_v58  ;;  %3145 = vmatprep.mubr.msk.bf16.mxu1 %vm422_vm2, %v3879_v48 }
  0xee   : > { %v4066_v40 = vpop.f32.mrf.mxu1  ;;  %v4068_v1 = vpop.f32.mrf.mxu0 }
  0xef   : > { %4753 = vst [vmem:[#allocation3_spill] sm:$0xff] %v4066_v40 }
  0xf0   : > { %v4072_v31 = vpop.f32.mrf.mxu1  ;;  %v4074_v5 = vpop.f32.mrf.mxu0 }
  0xf1   : > { %4754 = vst [vmem:[#allocation5_spill] sm:$0xff] %v4072_v31 }
  0xf2   : > { %v4076_v54 = vpop.f32.mrf.mxu1  ;;  %v4078_v24 = vpop.f32.mrf.mxu0  ;;  %3180 = vmatmul.mubr.msk.bf16.gmra.mxu0 %vm422_vm2, %v1846_v18 }
  0xf3   : > { %4755 = vst [vmem:[#allocation8_spill] sm:$0xff] %v4076_v54  ;;  %3219 = vmatprep.mubr.msk.bf16.mxu0 %vm422_vm2, %v3663_v27 }
  0xf4   : > { %v4083_v34 = vpop.f32.mrf.mxu1  ;;  %3146 = vmatmul.mubr.msk.bf16.gmra.mxu1 %vm422_vm2, %v3886_v13  ;;  %v4087_v8 = vpop.f32.mrf.mxu0 }
  0xf5   : > { %4756 = vst [vmem:[#allocation11_spill] sm:$0xff] %v4083_v34  ;;  %3185 = vmatprep.mubr.msk.bf16.mxu1 %vm422_vm2, %v4743_v9 }
  0xf6   : > { %v4091_v4 = vpop.f32.mrf.mxu1  ;;  %v4093_v21 = vpop.f32.mrf.mxu0 }
  0xf7   : > { %4757 = vst [vmem:[#allocation13_spill] sm:$0xff] %v4091_v4 }
  0xf8   : > { %v4095_v63 = vpop.f32.mrf.mxu1  ;;  %v4097_v35 = vpop.f32.mrf.mxu0 }
  0xf9   : > { %4758 = vst [vmem:[#allocation17_spill] sm:$0xff] %v4095_v63 }
  0xfa   : > { %v4099_v18 = vpop.f32.mrf.mxu1  ;;  %v3017_v27 = vpop.f32.mrf.mxu0  ;;  %3220 = vmatmul.mubr.msk.bf16.vlgmr.msra.gmra.mxu0 %vm422_vm2, %v3720_v15 }
  0xfb   : > { %4759 = vst [vmem:[#allocation6_spill] sm:$0xff] %v4099_v18  ;;  %3223 = vmatprep.mubr.msk.bf16.mxu0 %vm422_vm2, %v3728_v20 }
  0xfc   : > { %v2983_v34 = vpop.f32.mrf.mxu1  ;;  %3186 = vmatmul.mubr.msk.bf16.vlgmr.msra.gmra.mxu1 %vm422_vm2, %v4744_v14  ;;  %v1064_v9 = vpop.f32.mrf.mxu0 }
  0xfd   : > { %v730_v4 = vadd.f32 %v2983_v34, %v2949_v38  ;;  %3189 = vmatprep.mubr.msk.bf16.mxu1 %vm422_vm2, %v4745_v56 }
  0xfe   : > { %v721_v63 = vpop.f32.mrf.mxu1  ;;  %v3018_v54 = vpop.f32.mrf.mxu0 }
  0xff   : > { %v4109_v31 = vadd.f32 %v3017_v27, %v730_v4  ;;  %v722_v18 = vadd.f32 %v721_v63, %v509_v51 }
 0x100   : > { %v2984_v40 = vpop.f32.mrf.mxu1  ;;  %v1067_v45 = vpop.f32.mrf.mxu0 }
 0x101   : > { %v4111_v15 = vadd.f32 %v1064_v9, %v722_v18  ;;  %v733_v58 = vadd.f32 %v2984_v40, %v2950_v44 }
 0x102   : > { %v724_v20 = vpop.f32.mrf.mxu1  ;;  %v3021_v37 = vpop.f32.mrf.mxu0  ;;  %3224 = vmatmul.mubr.msk.bf16.gmra.mxu0 %vm422_vm2, %v3760_v19 }
 0x103   : > { %v4115_v14 = vadd.f32 %v3018_v54, %v733_v58  ;;  %v725_v38 = vadd.f32 %v724_v20, %v512_v60  ;;  %3227 = vmatprep.mubr.msk.bf16.mxu0 %vm422_vm2, %v3762_v16 }
 0x104   : > { %v2987_v56 = vpop.f32.mrf.mxu1  ;;  %3190 = vmatmul.mubr.msk.bf16.gmra.mxu1 %vm422_vm2, %v3585_v2  ;;  %v1080_v51 = vpop.f32.mrf.mxu0 }
 0x105   : > { %v4121_v34 = vadd.f32 %v1067_v45, %v725_v38  ;;  %v746_v44 = vadd.f32 %v2987_v56, %v4023_v32  ;;  %3193 = vmatprep.mubr.msk.bf16.mxu1 %vm422_vm2, %v3606_v62 }
 0x106   : > { %v737_v40 = vpop.f32.mrf.mxu1  ;;  %v3022_v19 = vpop.f32.mrf.mxu0 }
 0x107   : > { %v4126_v58 = vadd.f32 %v3021_v37, %v746_v44  ;;  %v738_v60 = vadd.f32 %v737_v40, %v4033_v50 }
 0x108   : > { %v2988_v54 = vpop.f32.mrf.mxu1  ;;  %v1083_v16 = vpop.f32.mrf.mxu0 }
 0x109   : > { %v4129_v4 = vadd.f32 %v1080_v51, %v738_v60  ;;  %v749_v2 = vadd.f32 %v2988_v54, %v4039_v6 }
 0x10a   : > { %v740_v63 = vpop.f32.mrf.mxu1  ;;  %v3025_v45 = vpop.f32.mrf.mxu0  ;;  %3228 = vmatmul.mubr.msk.bf16.gmra.mxu0 %vm422_vm2, %v3790_v36 }
 0x10b   : > { %v4134_v32 = vadd.f32 %v3022_v19, %v749_v2  ;;  %v741_v62 = vadd.f32 %v740_v63, %v4043_v52  ;;  %3231 = vmatprep.mubr.msk.bf16.mxu0 %vm422_vm2, %v3792_v42 }
 0x10c   : > { %v2991_v37 = vpop.f32.mrf.mxu1  ;;  %3194 = vmatmul.mubr.msk.bf16.gmra.mxu1 %vm422_vm2, %v3628_v28  ;;  %v1096_v50 = vpop.f32.mrf.mxu0 }
 0x10d   : > { %v4141_v18 = vadd.f32 %v1083_v16, %v741_v62  ;;  %v762_v6 = vadd.f32 %v2991_v37, %v4047_v46  ;;  %3197 = vmatprep.mubr.msk.bf16.mxu1 %vm422_vm2, %v4746_v30 }
 0x10e   : > { %v753_v36 = vpop.f32.mrf.mxu1  ;;  %v3026_v27 = vpop.f32.mrf.mxu0 }
 0x10f   : > { %v4146_v9 = vadd.f32 %v3025_v45, %v762_v6  ;;  %v754_v52 = vadd.f32 %v753_v36, %v4062_v43 }
 0x110   : > { %v2992_v20 = vpop.f32.mrf.mxu1  ;;  %v1099_v42 = vpop.f32.mrf.mxu0 }
 0x111   : > { %v4149_v38 = vadd.f32 %v1096_v50, %v754_v52  ;;  %v765_v28 = vadd.f32 %v2992_v20, %v4068_v1 }
 0x112   : > { %v756_v56 = vpop.f32.mrf.mxu1  ;;  %v3029_v51 = vpop.f32.mrf.mxu0  ;;  %3232 = vmatmul.mubr.msk.bf16.gmra.mxu0 %vm422_vm2, %v3816_v39 }
 0x113   : > { %v4154_v46 = vadd.f32 %v3026_v27, %v765_v28  ;;  %v757_v30 = vadd.f32 %v756_v56, %v4074_v5  ;;  %3235 = vmatprep.mubr.msk.bf16.mxu0 %vm422_vm2, %v3818_v29 }
 0x114   : > { %v2995_v44 = vpop.f32.mrf.mxu1  ;;  %3198 = vmatmul.mubr.msk.bf16.gmra.mxu1 %vm422_vm2, %v4747_v25  ;;  %v1112_v43 = vpop.f32.mrf.mxu0 }
 0x115   : > { %v4161_v40 = vadd.f32 %v1099_v42, %v757_v30  ;;  %v778_v1 = vadd.f32 %v2995_v44, %v4078_v24  ;;  %3201 = vmatprep.mubr.msk.bf16.mxu1 %vm422_vm2, %v4748_v26  ;;  %v225_v42 = vld [vmem:[%s3328_s23 + $0x1a8] sm:$0x3]  ;;  %v2051_v44 = vrot.slane %v4053_v7, 1 }
 0x116   : > { %v769_v39 = vpop.f32.mrf.mxu1  ;;  %v3030_v19 = vpop.f32.mrf.mxu0 }
 0x117   : > { %v4166_v60 = vadd.f32 %v3029_v51, %v778_v1  ;;  %v770_v5 = vadd.f32 %v769_v39, %v4087_v8  ;;  %v2261_v51 = vrot.slane %v4056_v57, 2 }
 0x118   : > { %v2996_v54 = vpop.f32.mrf.mxu1  ;;  %v1115_v29 = vpop.f32.mrf.mxu0 }
 0x119   : > { %v4169_v16 = vadd.f32 %v1112_v43, %v770_v5  ;;  %v781_v25 = vadd.f32 %v2996_v54, %v4093_v21 }
 0x11a   : > { %v772_v2 = vpop.f32.mrf.mxu1  ;;  %v3033_v63 = vpop.f32.mrf.mxu0  ;;  %3236 = vmatmul.mubr.msk.bf16.gmra.mxu0 %vm422_vm2, %v3838_v22 }
 0x11b   : > { %v4174_v24 = vadd.f32 %v3030_v19, %v781_v25  ;;  %v773_v26 = vadd.f32 %v772_v2, %v4097_v35  ;;  %3239 = vmatprep.mubr.msk.bf16.mxu0 %vm422_vm2, %v3840_v23  ;;  %v2054_v19 = vrot.slane %v225_v42, 1  ;;  %v4760_v2 = vld [vmem:[#allocation19_spill] sm:$0xff] }
 0x11c   : > { %v2999_v45 = vpop.f32.mrf.mxu1  ;;  %3202 = vmatmul.mubr.msk.bf16.gmra.mxu1 %vm422_vm2, %v4749_v17  ;;  %v1128_v8 = vpop.f32.mrf.mxu0 }
 0x11d   : > { %v4181_v62 = vadd.f32 %v1115_v29, %v773_v26  ;;  %v794_v21 = vadd.f32 %v2999_v45, %v4011_v3  ;;  %3205 = vmatprep.mubr.msk.bf16.mxu1 %vm422_vm2, %v4750_v53  ;;  %v4761_v26 = vld [vmem:[#allocation2_spill] sm:$0xff] }
 0x11e   : > { %v785_v22 = vpop.f32.mrf.mxu1  ;;  %v3034_v37 = vpop.f32.mrf.mxu0  ;;  %v4762_v45 = vld [vmem:[#allocation18_spill] sm:$0xff] }
 0x11f   : > { %v4186_v50 = vadd.f32 %v3033_v63, %v794_v21  ;;  %v786_v35 = vadd.f32 %v785_v22, %v4017_v55 }
 0x120   : > { %v3000_v23 = vpop.f32.mrf.mxu1  ;;  %v1131_v6 = vpop.f32.mrf.mxu0 }
 0x121   : > { %v4189_v36 = vadd.f32 %v1128_v8, %v786_v35  ;;  %v797_v17 = vadd.f32 %v3000_v23, %v4019_v49  ;;  %v4763_v35 = vld [vmem:[#allocation3_spill] sm:$0xff] }
 0x122   : > { %v788_v27 = vpop.f32.mrf.mxu1  ;;  %v3037_v52 = vpop.f32.mrf.mxu0  ;;  %3240 = vmatmul.mubr.msk.bf16.gmra.mxu0 %vm422_vm2, %v3860_v41  ;;  %v2260_v41 = vrot.slane %v4053_v7, 2 }
 0x123   : > { %v4194_v3 = vadd.f32 %v3034_v37, %v797_v17  ;;  %v789_v53 = vadd.f32 %v788_v27, %v4021_v47  ;;  %3243 = vmatprep.mubr.msk.bf16.mxu0 %vm422_vm2, %v3862_v33 }
 0x124   : > { %v3003_v20 = vpop.f32.mrf.mxu1  ;;  %3206 = vmatmul.mubr.msk.bf16.gmra.mxu1 %vm422_vm2, %v3604_v61  ;;  %v1144_v55 = vpop.f32.mrf.mxu0  ;;  %v2263_v61 = vrot.slane %v225_v42, 2  ;;  %v2262_v7 = vsel %vm848_vm3, %v2260_v41, %v2261_v51  ;;  %v4765_v41 = vld [vmem:[#allocation8_spill] sm:$0xff] }
 0x125   : > { %v4202_v28 = vadd.f32 %v1131_v6, %v789_v53  ;;  %v810_v49 = vadd.f32 %v3003_v20, %v4029_v59  ;;  %3209 = vmatprep.mubr.msk.bf16.mxu1 %vm422_vm2, %v3609_v12  ;;  %v2052_v59 = vrot.slane %v4056_v57, 1  ;;  %v4764_v53 = vld [vmem:[#allocation5_spill] sm:$0xff] }
 0x126   : > { %v801_v56 = vpop.f32.mrf.mxu1  ;;  %v3038_v47 = vpop.f32.mrf.mxu0  ;;  %v2264_v57 = vsel %vm848_vm3, %v2261_v51, %v2263_v61  ;;  %v4766_v61 = vld [vmem:[#allocation11_spill] sm:$0xff] }
 0x127   : > { %v4209_v33 = vadd.f32 %v3037_v52, %v810_v49  ;;  %v802_v30 = vadd.f32 %v801_v56, %v4037_v0  ;;  %v2267_v22 = vpack.c.bf16 %v2264_v57, %v2262_v7  ;;  %v4768_v7 = vld [vmem:[#allocation17_spill] sm:$0xff] }
 0x128   : > { %v3004_v43 = vpop.f32.mrf.mxu1  ;;  %v1147_v1 = vpop.f32.mrf.mxu0 }
 0x129   : > { %v4214_v39 = vadd.f32 %v1144_v55, %v802_v30  ;;  %v813_v12 = vadd.f32 %v3004_v43, %v4041_v10 }
 0x12a   : > { %v804_v5 = vpop.f32.mrf.mxu1  ;;  %v3041_v54 = vpop.f32.mrf.mxu0  ;;  %3244 = vmatmul.mubr.msk.bf16.gmra.mxu0 %vm422_vm2, %v3879_v48 }
 0x12b   : > { %v4219_v29 = vadd.f32 %v3038_v47, %v813_v12  ;;  %v805_v0 = vadd.f32 %v804_v5, %v4045_v11  ;;  %3247 = vmatprep.mubr.msk.bf16.mxu0 %vm422_vm2, %v3886_v13  ;;  %v2053_v11 = vsel %vm291_vm1, %v2051_v44, %v2052_v59  ;;  %v2055_v13 = vsel %vm291_vm1, %v2052_v59, %v2054_v19  ;;  %v4767_v12 = vld [vmem:[#allocation13_spill] sm:$0xff] }
 0x12c   : > { %v3007_v25 = vpop.f32.mrf.mxu1  ;;  %3210 = vmatmul.mubr.msk.bf16.gmra.mxu1 %vm422_vm2, %v4760_v2  ;;  %v1160_v10 = vpop.f32.mrf.mxu0  ;;  %v2058_v27 = vpack.c.bf16 %v2055_v13, %v2053_v11 }
 0x12d   : > { %v4228_v63 = vadd.f32 %v1147_v1, %v805_v0  ;;  %v826_v48 = vadd.f32 %v3007_v25, %v4761_v26  ;;  %3213 = vmatprep.mubr.msk.bf16.mxu1 %vm422_vm2, %v4762_v45  ;;  %v4769_v26 = vld [vmem:[#allocation6_spill] sm:$0xff] }
 0x12e   : > { %v817_v8 = vpop.f32.mrf.mxu1  ;;  %v3042_v21 = vpop.f32.mrf.mxu0 }
 0x12f   : > { %v4235_v37 = vadd.f32 %v3041_v54, %v826_v48  ;;  %v818_v23 = vadd.f32 %v817_v8, %v4763_v35 }
 0x130   : > { %v3008_v6 = vpop.f32.mrf.mxu1  ;;  %v1163_v17 = vpop.f32.mrf.mxu0 }
 0x131   : > { %v4238_v52 = vadd.f32 %v1160_v10, %v818_v23  ;;  %v829_v20 = vadd.f32 %v3008_v6, %v4764_v53 }
 0x132   : > { %v820_v55 = vpop.f32.mrf.mxu1  ;;  %v3045_v42 = vpop.f32.mrf.mxu0  ;;  %3248 = vmatmul.mubr.msk.bf16.gmra.mxu0 %vm422_vm2, %v2267_v22 }
 0x133   : > { %v4242_v49 = vadd.f32 %v3042_v21, %v829_v20  ;;  %v821_v56 = vadd.f32 %v820_v55, %v4765_v41 }
 0x134   : > { %v3011_v47 = vpop.f32.mrf.mxu1  ;;  %3214 = vmatmul.mubr.msk.bf16.gmra.mxu1 %vm422_vm2, %v2058_v27  ;;  %v1176_v51 = vpop.f32.mrf.mxu0 }
 0x135   : > { %v4246_v30 = vadd.f32 %v1163_v17, %v821_v56  ;;  %v842_v44 = vadd.f32 %v3011_v47, %v4766_v61 }
 0x136   : > { %v833_v43 = vpop.f32.mrf.mxu1  ;;  %v3046_v1 = vpop.f32.mrf.mxu0 }
 0x137   : > { %v4249_v59 = vadd.f32 %v3045_v42, %v842_v44  ;;  %v834_v19 = vadd.f32 %v833_v43, %v4767_v12 }
 0x138   : > { %v3012_v5 = vpop.f32.mrf.mxu1  ;;  %v1179_v54 = vpop.f32.mrf.mxu0 }
 0x139   : > { %v4252_v0 = vadd.f32 %v1176_v51, %v834_v19  ;;  %v845_v57 = vadd.f32 %v3012_v5, %v4768_v7 }
 0x13a   : > { %v836_v25 = vpop.f32.mrf.mxu1  ;;  %v3085_v2 = vpop.f32.mrf.mxu0 }
 0x13b   : > { %v4255_v10 = vadd.f32 %v3046_v1, %v845_v57  ;;  %v837_v48 = vadd.f32 %v836_v25, %v4769_v26 }
 0x13c   : > { %v3051_v45 = vpop.f32.mrf.mxu1  ;;  %v1478_v11 = vpop.f32.mrf.mxu0 }
 0x13d   : > { %v4258_v13 = vadd.f32 %v1179_v54, %v837_v48  ;;  %v1395_v8 = vadd.f32 %v3051_v45, %v4109_v31 }
 0x13e   : > { %v1266_v21 = vpop.f32.mrf.mxu1  ;;  %v3086_v22 = vpop.f32.mrf.mxu0 }
 0x13f   : > { %v4261_v35 = vadd.f32 %v3085_v2, %v1395_v8  ;;  %v1393_v23 = vadd.f32 %v1266_v21, %v4111_v15 }
 0x140   : > { %v3052_v6 = vpop.f32.mrf.mxu1  ;;  %v1481_v17 = vpop.f32.mrf.mxu0 }
 0x141   : > { %v4264_v27 = vadd.f32 %v1478_v11, %v1393_v23  ;;  %v1396_v53 = vadd.f32 %v3052_v6, %v4115_v14 }
 0x142   : > { %v1269_v20 = vpop.f32.mrf.mxu1  ;;  %v3089_v55 = vpop.f32.mrf.mxu0 }
 0x143   : > { %v4267_v42 = vadd.f32 %v3086_v22, %v1396_v53  ;;  %v1394_v41 = vadd.f32 %v1269_v20, %v4121_v34 }
 0x144   : > { %v3055_v56 = vpop.f32.mrf.mxu1  ;;  %v1494_v31 = vpop.f32.mrf.mxu0 }
 0x145   : > { %v4270_v47 = vadd.f32 %v1481_v17, %v1394_v41  ;;  %v1399_v51 = vadd.f32 %v3055_v56, %v4126_v58 }
 0x146   : > { %v1282_v61 = vpop.f32.mrf.mxu1  ;;  %v3090_v15 = vpop.f32.mrf.mxu0 }
 0x147   : > { %v4273_v44 = vadd.f32 %v3089_v55, %v1399_v51  ;;  %v1397_v43 = vadd.f32 %v1282_v61, %v4129_v4 }
 0x148   : > { %v3056_v1 = vpop.f32.mrf.mxu1  ;;  %v1497_v14 = vpop.f32.mrf.mxu0 }
 0x149   : > { %v4276_v12 = vadd.f32 %v1494_v31, %v1397_v43  ;;  %v1400_v19 = vadd.f32 %v3056_v1, %v4134_v32 }
 0x14a   : > { %v1285_v5 = vpop.f32.mrf.mxu1  ;;  %v3093_v34 = vpop.f32.mrf.mxu0 }
 0x14b   : > { %v4279_v54 = vadd.f32 %v3090_v15, %v1400_v19  ;;  %v1398_v7 = vadd.f32 %v1285_v5, %v4141_v18 }
 0x14c   : > { %v3059_v57 = vpop.f32.mrf.mxu1  ;;  %v1510_v58 = vpop.f32.mrf.mxu0 }
 0x14d   : > { %v4282_v25 = vadd.f32 %v1497_v14, %v1398_v7  ;;  %v1403_v2 = vadd.f32 %v3059_v57, %v4146_v9 }
 0x14e   : > { %v1298_v26 = vpop.f32.mrf.mxu1  ;;  %v3094_v4 = vpop.f32.mrf.mxu0 }
 0x14f   : > { %v4285_v48 = vadd.f32 %v3093_v34, %v1403_v2  ;;  %v1401_v45 = vadd.f32 %v1298_v26, %v4149_v38 }
 0x150   : > { %v3060_v11 = vpop.f32.mrf.mxu1  ;;  %v1513_v32 = vpop.f32.mrf.mxu0 }
 0x151   : > { %v4288_v8 = vadd.f32 %v1510_v58, %v1401_v45  ;;  %v1404_v21 = vadd.f32 %v3060_v11, %v4154_v46 }
 0x152   : > { %v1301_v22 = vpop.f32.mrf.mxu1  ;;  %v3097_v18 = vpop.f32.mrf.mxu0 }
 0x153   : > { %v4291_v23 = vadd.f32 %v3094_v4, %v1404_v21  ;;  %v1402_v6 = vadd.f32 %v1301_v22, %v4161_v40 }
 0x154   : > { %v3063_v17 = vpop.f32.mrf.mxu1  ;;  %v1526_v9 = vpop.f32.mrf.mxu0 }
 0x155   : > { %v4294_v53 = vadd.f32 %v1513_v32, %v1402_v6  ;;  %v1407_v20 = vadd.f32 %v3063_v17, %v4166_v60 }
 0x156   : > { %v1314_v55 = vpop.f32.mrf.mxu1  ;;  %v3098_v38 = vpop.f32.mrf.mxu0 }
 0x157   : > { %v4297_v41 = vadd.f32 %v3097_v18, %v1407_v20  ;;  %v1405_v56 = vadd.f32 %v1314_v55, %v4169_v16 }
 0x158   : > { %v3064_v31 = vpop.f32.mrf.mxu1  ;;  %v1529_v46 = vpop.f32.mrf.mxu0 }
 0x159   : > { %v4300_v51 = vadd.f32 %v1526_v9, %v1405_v56  ;;  %v1408_v61 = vadd.f32 %v3064_v31, %v4174_v24 }
 0x15a   : > { %v1317_v15 = vpop.f32.mrf.mxu1  ;;  %v3101_v40 = vpop.f32.mrf.mxu0 }
 0x15b   : > { %v4303_v43 = vadd.f32 %v3098_v38, %v1408_v61  ;;  %v1406_v1 = vadd.f32 %v1317_v15, %v4181_v62 }
 0x15c   : > { %v3067_v14 = vpop.f32.mrf.mxu1  ;;  %v1542_v60 = vpop.f32.mrf.mxu0 }
 0x15d   : > { %v4306_v19 = vadd.f32 %v1529_v46, %v1406_v1  ;;  %v1411_v5 = vadd.f32 %v3067_v14, %v4186_v50 }
 0x15e   : > { %v1330_v34 = vpop.f32.mrf.mxu1  ;;  %v3102_v16 = vpop.f32.mrf.mxu0 }
 0x15f   : > { %v4309_v7 = vadd.f32 %v3101_v40, %v1411_v5  ;;  %v1409_v57 = vadd.f32 %v1330_v34, %v4189_v36 }
 0x160   : > { %v3068_v58 = vpop.f32.mrf.mxu1  ;;  %v1545_v24 = vpop.f32.mrf.mxu0 }
 0x161   : > { %v4312_v2 = vadd.f32 %v1542_v60, %v1409_v57  ;;  %v1412_v26 = vadd.f32 %v3068_v58, %v4194_v3 }
 0x162   : > { %v1333_v4 = vpop.f32.mrf.mxu1  ;;  %v3105_v62 = vpop.f32.mrf.mxu0 }
 0x163   : > { %v4315_v45 = vadd.f32 %v3102_v16, %v1412_v26  ;;  %v1410_v11 = vadd.f32 %v1333_v4, %v4202_v28 }
 0x164   : > { %v3071_v32 = vpop.f32.mrf.mxu1  ;;  %v1558_v50 = vpop.f32.mrf.mxu0 }
 0x165   : > { %4770 = vst [vmem:[#allocation9_spill] sm:$0xff] %v4315_v45  ;;  %v4318_v21 = vadd.f32 %v1545_v24, %v1410_v11  ;;  %v1415_v22 = vadd.f32 %v3071_v32, %v4209_v33 }
 0x166   : > { %v1346_v18 = vpop.f32.mrf.mxu1  ;;  %v3106_v36 = vpop.f32.mrf.mxu0 }
 0x167   : > { %4771 = vst [vmem:[#allocation12_spill] sm:$0xff] %v4318_v21  ;;  %v4321_v6 = vadd.f32 %v3105_v62, %v1415_v22  ;;  %v1413_v17 = vadd.f32 %v1346_v18, %v4214_v39 }
 0x168   : > { %v3072_v9 = vpop.f32.mrf.mxu1  ;;  %v1561_v3 = vpop.f32.mrf.mxu0 }
 0x169   : > { %4772 = vst [vmem:[#allocation15_spill] sm:$0xff] %v4321_v6  ;;  %v4324_v20 = vadd.f32 %v1558_v50, %v1413_v17  ;;  %v1416_v55 = vadd.f32 %v3072_v9, %v4219_v29 }
 0x16a   : > { %v1349_v38 = vpop.f32.mrf.mxu1  ;;  %v3109_v28 = vpop.f32.mrf.mxu0 }
 0x16b   : > { %4773 = vst [vmem:[#allocation4_spill] sm:$0xff] %v4324_v20  ;;  %v4327_v56 = vadd.f32 %v3106_v36, %v1416_v55  ;;  %v1414_v31 = vadd.f32 %v1349_v38, %v4228_v63 }
 0x16c   : > { %v3075_v46 = vpop.f32.mrf.mxu1  ;;  %v1574_v33 = vpop.f32.mrf.mxu0 }
 0x16d   : > { %4774 = vst [vmem:[#allocation7_spill] sm:$0xff] %v4327_v56  ;;  %v4330_v61 = vadd.f32 %v1561_v3, %v1414_v31  ;;  %v1419_v15 = vadd.f32 %v3075_v46, %v4235_v37 }
 0x16e   : > { %v1362_v40 = vpop.f32.mrf.mxu1  ;;  %v3110_v39 = vpop.f32.mrf.mxu0 }
 0x16f   : > { %4775 = vst [vmem:[#allocation10_spill] sm:$0xff] %v4330_v61  ;;  %v4333_v1 = vadd.f32 %v3109_v28, %v1419_v15  ;;  %v1417_v14 = vadd.f32 %v1362_v40, %v4238_v52 }
 0x170   : > { %v3076_v60 = vpop.f32.mrf.mxu1  ;;  %v1577_v29 = vpop.f32.mrf.mxu0 }
 0x171   : > { %4776 = vst [vmem:[#allocation14_spill] sm:$0xff] %v4333_v1  ;;  %v4336_v5 = vadd.f32 %v1574_v33, %v1417_v14  ;;  %v1420_v34 = vadd.f32 %v3076_v60, %v4242_v49 }
 0x172   : > { %v1365_v16 = vpop.f32.mrf.mxu1  ;;  %v3113_v63 = vpop.f32.mrf.mxu0 }
 0x173   : > { %4777 = vst [vmem:[#allocation16_spill] sm:$0xff] %v4336_v5  ;;  %v4339_v57 = vadd.f32 %v3110_v39, %v1420_v34  ;;  %v1418_v58 = vadd.f32 %v1365_v16, %v4246_v30 }
 0x174   : > { %v3079_v24 = vpop.f32.mrf.mxu1  ;;  %v1590_v37 = vpop.f32.mrf.mxu0 }
 0x175   : > { %4778 = vst [vmem:[#allocation19_spill] sm:$0xff] %v4339_v57  ;;  %v4342_v26 = vadd.f32 %v1577_v29, %v1418_v58  ;;  %v1423_v4 = vadd.f32 %v3079_v24, %v4249_v59 }
 0x176   : > { %v1378_v62 = vpop.f32.mrf.mxu1  ;;  %v3114_v52 = vpop.f32.mrf.mxu0 }
 0x177   : > { %4779 = vst [vmem:[#allocation2_spill] sm:$0xff] %v4342_v26  ;;  %v4345_v11 = vadd.f32 %v3113_v63, %v1423_v4  ;;  %v1421_v32 = vadd.f32 %v1378_v62, %v4252_v0 }
 0x178   : > { %v3080_v50 = vpop.f32.mrf.mxu1  ;;  %v1593_v49 = vpop.f32.mrf.mxu0 }
 0x179   : > { %4780 = vst [vmem:[#allocation18_spill] sm:$0xff] %v4345_v11  ;;  %v4348_v22 = vadd.f32 %v1590_v37, %v1421_v32  ;;  %v1424_v18 = vadd.f32 %v3080_v50, %v4255_v10 }
 0x17a   : > { %v1381_v36 = vpop.f32.mrf.mxu1  ;;  %v4351_v30 = vpop.f32.mrf.mxu0 }
 0x17b   : > { %4781 = vst [vmem:[#allocation3_spill] sm:$0xff] %v4348_v22  ;;  %v4353_v17 = vadd.f32 %v3114_v52, %v1424_v18  ;;  %v1422_v9 = vadd.f32 %v1381_v36, %v4258_v13 }
 0x17c   : > { %v3119_v59 = vpop.f32.mrf.mxu1  ;;  %v4356_v3 = vpop.f32.mrf.mxu0 }
 0x17d   : > { %4782 = vst [vmem:[#allocation5_spill] sm:$0xff] %v4353_v17  ;;  %v4358_v55 = vadd.f32 %v1593_v49, %v1422_v9 }
 0x17e   : > { %v1687_v38 = vpop.f32.mrf.mxu1  ;;  %v4360_v0 = vpop.f32.mrf.mxu0 }
 0x17f   : > { %4783 = vst [vmem:[#allocation8_spill] sm:$0xff] %v4358_v55 }
 0x180   : > { %v4362_v28 = vpop.f32.mrf.mxu1  ;;  %v4364_v31 = vpop.f32.mrf.mxu0 }
 0x182   : > { %v4366_v10 = vpop.f32.mrf.mxu1  ;;  %v4368_v46 = vpop.f32.mrf.mxu0 }
 0x184   : > { %v4370_v33 = vpop.f32.mrf.mxu1  ;;  %v4372_v15 = vpop.f32.mrf.mxu0 }
 0x186   : > { %v4374_v13 = vpop.f32.mrf.mxu1  ;;  %v4376_v40 = vpop.f32.mrf.mxu0 }
 0x188   : > { %v4378_v39 = vpop.f32.mrf.mxu1  ;;  %v4380_v14 = vpop.f32.mrf.mxu0 }
 0x18a   : > { %v4382_v60 = vpop.f32.mrf.mxu1  ;;  %v4384_v29 = vpop.f32.mrf.mxu0 }
 0x18c   : > { %v4386_v34 = vpop.f32.mrf.mxu1  ;;  %v4388_v16 = vpop.f32.mrf.mxu0 }
 0x18e   : > { %v4390_v63 = vpop.f32.mrf.mxu1  ;;  %v4392_v58 = vpop.f32.mrf.mxu0 }
 0x190   : > { %v4394_v24 = vpop.f32.mrf.mxu1  ;;  %v4396_v37 = vpop.f32.mrf.mxu0 }
 0x192   : > { %v4398_v4 = vpop.f32.mrf.mxu1  ;;  %v4400_v62 = vpop.f32.mrf.mxu0 }
 0x194   : > { %v4402_v52 = vpop.f32.mrf.mxu1  ;;  %v4404_v32 = vpop.f32.mrf.mxu0 }
 0x196   : > { %v4406_v50 = vpop.f32.mrf.mxu1  ;;  %v4408_v49 = vpop.f32.mrf.mxu0 }
 0x198   : > { %v4410_v18 = vpop.f32.mrf.mxu1  ;;  %v4412_v36 = vpop.f32.mrf.mxu0 }
 0x19a   : > { %v4414_v9 = vpop.f32.mrf.mxu1  ;;  %v4416_v55 = vpop.f32.mrf.mxu0 }
 0x19c   : > { %v4418_v17 = vpop.f32.mrf.mxu1  ;;  %v4420_v22 = vpop.f32.mrf.mxu0 }
 0x19d   : > { %4784 = vst [vmem:[#allocation11_spill] sm:$0xff] %v4420_v22 }
 0x19e   : > { %v4422_v11 = vpop.f32.mrf.mxu1  ;;  %v4424_v26 = vpop.f32.mrf.mxu0 }
 0x19f   : > { %4785 = vst [vmem:[#allocation13_spill] sm:$0xff] %v4424_v26 }
 0x1a0   : > { %v4426_v57 = vpop.f32.mrf.mxu1  ;;  %v4428_v5 = vpop.f32.mrf.mxu0 }
 0x1a1   : > { %4786 = vst [vmem:[#allocation17_spill] sm:$0xff] %v4426_v57  ;;  %4787 = vst [vmem:[#allocation6_spill] sm:$0xff] %v4428_v5 }
 0x1a2   : > { %v4430_v1 = vpop.f32.mrf.mxu1  ;;  %v4432_v61 = vpop.f32.mrf.mxu0 }
 0x1a3   : > { %4788 = vst [vmem:[#allocation20_spill] sm:$0xff] %v4430_v1  ;;  %4789 = vst [vmem:[#allocation21_spill] sm:$0xff] %v4432_v61 }
 0x1a4   : > { %v4434_v56 = vpop.f32.mrf.mxu1  ;;  %v4436_v20 = vpop.f32.mrf.mxu0 }
 0x1a5   : > { %4790 = vst [vmem:[#allocation22_spill] sm:$0xff] %v4434_v56  ;;  %4791 = vst [vmem:[#allocation23_spill] sm:$0xff] %v4436_v20 }
 0x1a6   : > { %v4438_v6 = vpop.f32.mrf.mxu1  ;;  %v4440_v21 = vpop.f32.mrf.mxu0 }
 0x1a7   : > { %4792 = vst [vmem:[#allocation24_spill] sm:$0xff] %v4438_v6  ;;  %4793 = vst [vmem:[#allocation25_spill] sm:$0xff] %v4440_v21 }
 0x1a8   : > { %v4442_v22 = vpop.f32.mrf.mxu1  ;;  %v4444_v45 = vpop.f32.mrf.mxu0 }
 0x1a9   : > { %4794 = vst [vmem:[#allocation26_spill] sm:$0xff] %v4442_v22  ;;  %4795 = vst [vmem:[#allocation27_spill] sm:$0xff] %v4444_v45 }
 0x1aa   : > { %v4446_v26 = vpop.f32.mrf.mxu1  ;;  %v4448_v57 = vpop.f32.mrf.mxu0 }
 0x1ab   : > { %4796 = vst [vmem:[#allocation28_spill] sm:$0xff] %v4446_v26  ;;  %4797 = vst [vmem:[#allocation29_spill] sm:$0xff] %v4448_v57 }
 0x1ac   : > { %v4450_v5 = vpop.f32.mrf.mxu1  ;;  %v4452_v1 = vpop.f32.mrf.mxu0 }
 0x1ad   : > { %4798 = vst [vmem:[#allocation30_spill] sm:$0xff] %v4450_v5  ;;  %4799 = vst [vmem:[#allocation31_spill] sm:$0xff] %v4452_v1  ;;  %v1816_v1 = vadd.f32 %v3119_v59, %v4261_v35  ;;  %v1815_v35 = vadd.f32 %v4366_v10, %v4270_v47 }
 0x1ae   : > { %v4454_v61 = vpop.f32.mrf.mxu1  ;;  %v4456_v56 = vpop.f32.mrf.mxu0 }
 0x1af   : > { %4800 = vst [vmem:[#allocation32_spill] sm:$0xff] %v4454_v61  ;;  %4801 = vst [vmem:[#allocation33_spill] sm:$0xff] %v4456_v56 }
 0x1b0   : > { %v4458_v20 = vpop.f32.mrf.mxu1  ;;  %v4460_v6 = vpop.f32.mrf.mxu0 }
 0x1b1   : > { %4802 = vst [vmem:[#allocation34_spill] sm:$0xff] %v4458_v20  ;;  %4803 = vst [vmem:[#allocation35_spill] sm:$0xff] %v4460_v6  ;;  %v1814_v6 = vadd.f32 %v1687_v38, %v4264_v27  ;;  %v4493_v27 = vld [vmem:[%s4686_s2] ss:$0 sm:$0xff] }
 0x1b2   : > { %v4462_v21 = vpop.f32.mrf.mxu1  ;;  %v4464_v22 = vpop.f32.mrf.mxu0 }
 0x1b3   : > { %4804 = vst [vmem:[#allocation36_spill] sm:$0xff] %v4462_v21  ;;  %4805 = vst [vmem:[#allocation37_spill] sm:$0xff] %v4464_v22 }
 0x1b4   : > { %v4466_v45 = vpop.f32.mrf.mxu1  ;;  %v4468_v26 = vpop.f32.mrf.mxu0 }
 0x1b5   : > { %4806 = vst [vmem:[#allocation38_spill] sm:$0xff] %v4466_v45  ;;  %4807 = vst [vmem:[#allocation39_spill] sm:$0xff] %v4468_v26  ;;  %v2018_v45 = vadd.f32 %v4351_v30, %v1816_v1  ;;  %v1817_v26 = vadd.f32 %v4362_v28, %v4267_v42 }
 0x1b6   : > { %v4470_v57 = vpop.f32.mrf.mxu1  ;;  %v4472_v5 = vpop.f32.mrf.mxu0 }
 0x1b7   : > { %4808 = vst [vmem:[#allocation40_spill] sm:$0xff] %v4470_v57  ;;  %4809 = vst [vmem:[#allocation41_spill] sm:$0xff] %v4472_v5  ;;  %v2016_v5 = vadd.f32 %v4356_v3, %v1814_v6  ;;  %v2019_v42 = vadd.f32 %v4360_v0, %v1817_v26  ;;  %v1818_v6 = vadd.f32 %v4374_v13, %v4276_v12 }
 0x1b8   : > { %v4475_v61 = vpop.f32.mrf.mxu1  ;;  %v4477_v56 = vpop.f32.mrf.mxu0 }
 0x1b9   : > { %4810 = vst [vmem:[#allocation42_spill] sm:$0xff] %v4477_v56  ;;  %v1820_v56 = vadd.f32 %v4370_v33, %v4273_v44 }
 0x1ba   : > { %v4480_v21 = vpop.f32.mrf.mxu1  ;;  %v3221_v22 = vpop.f32.mrf.mxu0 }
 0x1bb   : > { %4811 = vst [vmem:[#allocation43_spill] sm:$0xff] %v4480_v21  ;;  %v2022_v33 = vadd.f32 %v4368_v46, %v1820_v56  ;;  %v1821_v21 = vadd.f32 %v4378_v39, %v4279_v54  ;;  %v2020_v56 = vadd.f32 %v4372_v15, %v1818_v6  ;;  %v1819_v54 = vadd.f32 %v4382_v60, %v4282_v25 }
 0x1bc   : > { %v3187_v57 = vpop.f32.mrf.mxu1  ;;  %v2310_v20 = vpop.f32.mrf.mxu0 }
 0x1bd   : > { %v2230_v59 = vadd.f32 %v3187_v57, %v2018_v45  ;;  %v2017_v57 = vadd.f32 %v4364_v31, %v1815_v35  ;;  %v2021_v6 = vadd.f32 %v4380_v14, %v1819_v54  ;;  %v1828_v54 = vadd.f32 %v4402_v52, %v4297_v41 }
 0x1be   : > { %v2101_v1 = vpop.f32.mrf.mxu1  ;;  %v3222_v30 = vpop.f32.mrf.mxu0 }
 0x1bf   : > { %v2439_v38 = vadd.f32 %v3221_v22, %v2230_v59  ;;  %v2228_v28 = vadd.f32 %v2101_v1, %v2016_v5  ;;  %v2023_v1 = vadd.f32 %v4376_v40, %v1821_v21 }
 0x1c0   : > { %v3188_v47 = vpop.f32.mrf.mxu1  ;;  %v2313_v45 = vpop.f32.mrf.mxu0 }
 0x1c1   : > { %v2478_v44 = vadd.f32 %v4493_v27, %v2439_v38  ;;  %v2437_v3 = vadd.f32 %v2310_v20, %v2228_v28  ;;  %v2231_v10 = vadd.f32 %v3188_v47, %v2019_v42  ;;  %v1822_v47 = vadd.f32 %v4390_v63, %v4288_v8 }
 0x1c2   : > { %v2104_v12 = vpop.f32.mrf.mxu1  ;;  %v3225_v5 = vpop.f32.mrf.mxu0 }
 0x1c3   : > { %v2510_v26 = vmax.f32 %v2478_v44, 0.0  ;;  %v2476_v22 = vadd.f32 %v4493_v27, %v2437_v3  ;;  %v2440_v20 = vadd.f32 %v3222_v30, %v2231_v10  ;;  %v2229_v0 = vadd.f32 %v2104_v12, %v2017_v57 }
 0x1c4   : > { %v3191_v31 = vpop.f32.mrf.mxu1  ;;  %v2326_v46 = vpop.f32.mrf.mxu0  ;;  %v1824_v30 = vadd.f32 %v4386_v34, %v4285_v48  ;;  %v1825_v3 = vadd.f32 %v4394_v24, %v4291_v23 }
 0x1c5   : > { %2543 = vst.msk [vmem:[%s4507_s15 + $0x10] sm:$0xff] %vm2540_vm4, %v2510_v26  ;;  %v2508_v13 = vmax.f32 %v2476_v22, 0.0  ;;  %v2479_v39 = vadd.f32 %v4493_v27, %v2440_v20  ;;  %v2438_v35 = vadd.f32 %v2313_v45, %v2229_v0  ;;  %v2234_v59 = vadd.f32 %v3191_v31, %v2022_v33 }
 0x1c6   : > { %v2117_v42 = vpop.f32.mrf.mxu1  ;;  %v3226_v15 = vpop.f32.mrf.mxu0  ;;  %v2026_v44 = vadd.f32 %v4384_v29, %v1824_v30  ;;  %v1823_v26 = vadd.f32 %v4398_v4, %v4294_v53 }
 0x1c7   : > { %2541 = vst.msk [vmem:[%s4507_s15] sm:$0xff] %vm2540_vm4, %v2508_v13  ;;  %v2511_v25 = vmax.f32 %v2479_v39, 0.0  ;;  %v2477_v60 = vadd.f32 %v4493_v27, %v2438_v35  ;;  %v2443_v38 = vadd.f32 %v3225_v5, %v2234_v59  ;;  %v2232_v28 = vadd.f32 %v2117_v42, %v2020_v56 }
 0x1c8   : > { %v3192_v45 = vpop.f32.mrf.mxu1  ;;  %v2329_v21 = vpop.f32.mrf.mxu0  ;;  %v2024_v5 = vadd.f32 %v4388_v16, %v1822_v47  ;;  %v2027_v56 = vadd.f32 %v4392_v58, %v1825_v3  ;;  %v2025_v39 = vadd.f32 %v4396_v37, %v1823_v26  ;;  %v1826_v35 = vadd.f32 %v4406_v50, %v4300_v51 }
 0x1c9   : > { %2544 = vst.msk [vmem:[%s4507_s15 + $0x18] sm:$0xff] %vm2540_vm4, %v2511_v25  ;;  %v2509_v48 = vmax.f32 %v2477_v60, 0.0  ;;  %v2482_v40 = vadd.f32 %v4493_v27, %v2443_v38  ;;  %v2441_v34 = vadd.f32 %v2326_v46, %v2232_v28  ;;  %v2235_v57 = vadd.f32 %v3192_v45, %v2023_v1 }
 0x1ca   : > { %v2120_v10 = vpop.f32.mrf.mxu1  ;;  %v3229_v14 = vpop.f32.mrf.mxu0  ;;  %v2030_v42 = vadd.f32 %v4400_v62, %v1828_v54  ;;  %v2028_v28 = vadd.f32 %v4404_v32, %v1826_v35  ;;  %v4818_v35 = vld [vmem:[#allocation15_spill] sm:$0xff] }
 0x1cb   : > { %2542 = vst.msk [vmem:[%s4507_s15 + $0x8] sm:$0xff] %vm2540_vm4, %v2509_v48  ;;  %v2514_v8 = vmax.f32 %v2482_v40, 0.0  ;;  %v2480_v63 = vadd.f32 %v4493_v27, %v2441_v34  ;;  %v2444_v33 = vadd.f32 %v3226_v15, %v2235_v57  ;;  %v2233_v12 = vadd.f32 %v2120_v10, %v2021_v6 }
 0x1cc   : > { %v3195_v22 = vpop.f32.mrf.mxu1  ;;  %v2342_v29 = vpop.f32.mrf.mxu0  ;;  %v1829_v15 = vadd.f32 %v4410_v18, %v4303_v43  ;;  %v1827_v6 = vadd.f32 %v4414_v9, %v4306_v19  ;;  %v1832_v40 = vadd.f32 %v4418_v17, %v4309_v7  ;;  %v1830_v10 = vadd.f32 %v4422_v11, %v4312_v2 }
 0x1cd   : > { %2547 = vst.msk [vmem:[%s4507_s15 + $0x30] sm:$0xff] %vm2540_vm4, %v2514_v8  ;;  %v2512_v23 = vmax.f32 %v2480_v63, 0.0  ;;  %v2483_v24 = vadd.f32 %v4493_v27, %v2444_v33  ;;  %v2442_v20 = vadd.f32 %v2329_v21, %v2233_v12  ;;  %v2238_v0 = vadd.f32 %v3195_v22, %v2026_v44  ;;  %v4812_v12 = vld [vmem:[#allocation9_spill] sm:$0xff] }
 0x1ce   : > { %v2133_v31 = vpop.f32.mrf.mxu1  ;;  %v3230_v16 = vpop.f32.mrf.mxu0  ;;  %v2031_v48 = vadd.f32 %v4408_v49, %v1829_v15  ;;  %v2029_v3 = vadd.f32 %v4412_v36, %v1827_v6  ;;  %v2034_v33 = vadd.f32 %v4416_v55, %v1832_v40 }
 0x1cf   : > { %2545 = vst.msk [vmem:[%s4507_s15 + $0x20] sm:$0xff] %vm2540_vm4, %v2512_v23  ;;  %v2515_v53 = vmax.f32 %v2483_v24, 0.0  ;;  %v2481_v4 = vadd.f32 %v4493_v27, %v2442_v20  ;;  %v2447_v46 = vadd.f32 %v3229_v14, %v2238_v0  ;;  %v2236_v13 = vadd.f32 %v2133_v31, %v2024_v5  ;;  %v4813_v5 = vld [vmem:[#allocation17_spill] sm:$0xff]  ;;  %v4814_v24 = vld [vmem:[#allocation11_spill] sm:$0xff]  ;;  %v4815_v0 = vld [vmem:[#allocation12_spill] sm:$0xff] }
 0x1d0   : > { %v3196_v59 = vpop.f32.mrf.mxu1  ;;  %v2345_v58 = vpop.f32.mrf.mxu0  ;;  %v1833_v26 = vadd.f32 %v4813_v5, %v4812_v12  ;;  %v2032_v20 = vadd.f32 %v4814_v24, %v1830_v10 }
 0x1d1   : > { %2548 = vst.msk [vmem:[%s4507_s15 + $0x38] sm:$0xff] %vm2540_vm4, %v2515_v53  ;;  %v2513_v41 = vmax.f32 %v2481_v4, 0.0  ;;  %v2486_v52 = vadd.f32 %v4493_v27, %v2447_v46  ;;  %v2445_v1 = vadd.f32 %v2342_v29, %v2236_v13  ;;  %v2239_v30 = vadd.f32 %v3196_v59, %v2027_v56  ;;  %v4816_v56 = vld [vmem:[#allocation20_spill] sm:$0xff]  ;;  %v4817_v13 = vld [vmem:[#allocation13_spill] sm:$0xff]  ;;  %v4819_v59 = vld [vmem:[#allocation22_spill] sm:$0xff] }
 0x1d2   : > { %v2136_v25 = vpop.f32.mrf.mxu1  ;;  %v3233_v37 = vpop.f32.mrf.mxu0  ;;  %v1831_v54 = vadd.f32 %v4816_v56, %v4815_v0 }
 0x1d3   : > { %2546 = vst.msk [vmem:[%s4507_s15 + $0x28] sm:$0xff] %vm2540_vm4, %v2513_v41  ;;  %v2518_v51 = vmax.f32 %v2486_v52, 0.0  ;;  %v2484_v50 = vadd.f32 %v4493_v27, %v2445_v1  ;;  %v2448_v60 = vadd.f32 %v3230_v16, %v2239_v30  ;;  %v2237_v38 = vadd.f32 %v2136_v25, %v2025_v39  ;;  %v4820_v25 = vld [vmem:[#allocation6_spill] sm:$0xff] }
 0x1d4   : > { %v3199_v47 = vpop.f32.mrf.mxu1  ;;  %v2358_v62 = vpop.f32.mrf.mxu0  ;;  %v2035_v39 = vadd.f32 %v4817_v13, %v1833_v26  ;;  %v4829_v26 = vld [vmem:[#allocation25_spill] sm:$0xff] }
 0x1d5   : > { %2551 = vst.msk [vmem:[%s4507_s15 + $0x50] sm:$0xff] %vm2540_vm4, %v2518_v51  ;;  %v2516_v43 = vmax.f32 %v2484_v50, 0.0  ;;  %v2487_v18 = vadd.f32 %v4493_v27, %v2448_v60  ;;  %v2446_v45 = vadd.f32 %v2345_v58, %v2237_v38  ;;  %v2242_v21 = vadd.f32 %v3199_v47, %v2030_v42  ;;  %v4821_v51 = vld [vmem:[#allocation4_spill] sm:$0xff] }
 0x1d6   : > { %v2149_v34 = vpop.f32.mrf.mxu1  ;;  %v3234_v32 = vpop.f32.mrf.mxu0  ;;  %v1836_v58 = vadd.f32 %v4819_v59, %v4818_v35  ;;  %v4822_v50 = vld [vmem:[#allocation24_spill] sm:$0xff] }
 0x1d7   : > { %2549 = vst.msk [vmem:[%s4507_s15 + $0x40] sm:$0xff] %vm2540_vm4, %v2516_v43  ;;  %v2519_v19 = vmax.f32 %v2487_v18, 0.0  ;;  %v2485_v9 = vadd.f32 %v4493_v27, %v2446_v45  ;;  %v2451_v57 = vadd.f32 %v3233_v37, %v2242_v21  ;;  %v2240_v44 = vadd.f32 %v2149_v34, %v2028_v28  ;;  %v4823_v18 = vld [vmem:[#allocation21_spill] sm:$0xff]  ;;  %v4824_v21 = vld [vmem:[#allocation7_spill] sm:$0xff] }
 0x1d8   : > { %v3200_v14 = vpop.f32.mrf.mxu1  ;;  %v2361_v49 = vpop.f32.mrf.mxu0  ;;  %v2033_v37 = vadd.f32 %v4820_v25, %v1831_v54  ;;  %v1834_v60 = vadd.f32 %v4822_v50, %v4821_v51  ;;  %v2038_v45 = vadd.f32 %v4823_v18, %v1836_v58  ;;  %v4832_v54 = vld [vmem:[#allocation27_spill] sm:$0xff]  ;;  %v4835_v58 = vld [vmem:[#allocation29_spill] sm:$0xff] }
 0x1d9   : > { %2552 = vst.msk [vmem:[%s4507_s15 + $0x58] sm:$0xff] %vm2540_vm4, %v2519_v19  ;;  %v2517_v7 = vmax.f32 %v2485_v9, 0.0  ;;  %v2490_v17 = vadd.f32 %v4493_v27, %v2451_v57  ;;  %v2449_v8 = vadd.f32 %v2358_v62, %v2240_v44  ;;  %v2243_v63 = vadd.f32 %v3200_v14, %v2031_v48  ;;  %v4825_v48 = vld [vmem:[#allocation26_spill] sm:$0xff] }
 0x1da   : > { %v2152_v22 = vpop.f32.mrf.mxu1  ;;  %v3237_v36 = vpop.f32.mrf.mxu0  ;;  %v1837_v40 = vadd.f32 %v4825_v48, %v4824_v21  ;;  %v4827_v14 = vld [vmem:[#allocation10_spill] sm:$0xff] }
 0x1db   : > { %2550 = vst.msk [vmem:[%s4507_s15 + $0x48] sm:$0xff] %vm2540_vm4, %v2517_v7  ;;  %v2522_v2 = vmax.f32 %v2490_v17, 0.0  ;;  %v2488_v11 = vadd.f32 %v4493_v27, %v2449_v8  ;;  %v2452_v29 = vadd.f32 %v3234_v32, %v2243_v63  ;;  %v2241_v23 = vadd.f32 %v2152_v22, %v2029_v3  ;;  %v4826_v3 = vld [vmem:[#allocation23_spill] sm:$0xff] }
 0x1dc   : > { %v3203_v31 = vpop.f32.mrf.mxu1  ;;  %v2374_v55 = vpop.f32.mrf.mxu0  ;;  %v2036_v10 = vadd.f32 %v4826_v3, %v1834_v60  ;;  %v2039_v22 = vadd.f32 %v4829_v26, %v1837_v40  ;;  %v4838_v60 = vld [vmem:[#allocation31_spill] sm:$0xff]  ;;  %v4841_v40 = vld [vmem:[#allocation33_spill] sm:$0xff] }
 0x1dd   : > { %2555 = vst.msk [vmem:[%s4507_s15 + $0x70] sm:$0xff] %vm2540_vm4, %v2522_v2  ;;  %v2520_v16 = vmax.f32 %v2488_v11, 0.0  ;;  %v2491_v53 = vadd.f32 %v4493_v27, %v2452_v29  ;;  %v2450_v4 = vadd.f32 %v2361_v49, %v2241_v23  ;;  %v2246_v46 = vadd.f32 %v3203_v31, %v2034_v33  ;;  %v4828_v49 = vld [vmem:[#allocation28_spill] sm:$0xff]  ;;  %v4831_v2 = vld [vmem:[#allocation30_spill] sm:$0xff] }
 0x1de   : > { %v2165_v41 = vpop.f32.mrf.mxu1  ;;  %v3238_v52 = vpop.f32.mrf.mxu0  ;;  %v1835_v7 = vadd.f32 %v4828_v49, %v4827_v14 }
 0x1df   : > { %2553 = vst.msk [vmem:[%s4507_s15 + $0x60] sm:$0xff] %vm2540_vm4, %v2520_v16  ;;  %v2523_v1 = vmax.f32 %v2491_v53, 0.0  ;;  %v2489_v30 = vadd.f32 %v4493_v27, %v2450_v4  ;;  %v2455_v42 = vadd.f32 %v3237_v36, %v2246_v46  ;;  %v2244_v15 = vadd.f32 %v2165_v41, %v2032_v20  ;;  %v4830_v36 = vld [vmem:[#allocation14_spill] sm:$0xff]  ;;  %v4834_v16 = vld [vmem:[#allocation32_spill] sm:$0xff] }
 0x1e0   : > { %v3204_v38 = vpop.f32.mrf.mxu1  ;;  %v2377_v28 = vpop.f32.mrf.mxu0  ;;  %v1840_v11 = vadd.f32 %v4831_v2, %v4830_v36  ;;  %v2037_v31 = vadd.f32 %v4832_v54, %v1835_v7  ;;  %v4844_v7 = vld [vmem:[#allocation35_spill] sm:$0xff] }
 0x1e1   : > { %2556 = vst.msk [vmem:[%s4507_s15 + $0x78] sm:$0xff] %vm2540_vm4, %v2523_v1  ;;  %v2521_v6 = vmax.f32 %v2489_v30, 0.0  ;;  %v2494_v47 = vadd.f32 %v4493_v27, %v2455_v42  ;;  %v2453_v62 = vadd.f32 %v2374_v55, %v2244_v15  ;;  %v2247_v43 = vadd.f32 %v3204_v38, %v2035_v39  ;;  %v4833_v55 = vld [vmem:[#allocation16_spill] sm:$0xff]  ;;  %v4837_v1 = vld [vmem:[#allocation34_spill] sm:$0xff] }
 0x1e2   : > { %v2168_v34 = vpop.f32.mrf.mxu1  ;;  %v3241_v32 = vpop.f32.mrf.mxu0  ;;  %v1838_v53 = vadd.f32 %v4834_v16, %v4833_v55  ;;  %v2042_v41 = vadd.f32 %v4835_v58, %v1840_v11  ;;  %v4847_v11 = vld [vmem:[#allocation37_spill] sm:$0xff]  ;;  %v4849_v16 = vld [vmem:[#allocation39_spill] sm:$0xff] }
 0x1e3   : > { %2554 = vst.msk [vmem:[%s4507_s15 + $0x68] sm:$0xff] %vm2540_vm4, %v2521_v6  ;;  %v2526_v19 = vmax.f32 %v2494_v47, 0.0  ;;  %v2492_v9 = vadd.f32 %v4493_v27, %v2453_v62  ;;  %v2456_v57 = vadd.f32 %v3238_v52, %v2247_v43  ;;  %v2245_v44 = vadd.f32 %v2168_v34, %v2033_v37  ;;  %v4836_v52 = vld [vmem:[#allocation19_spill] sm:$0xff]  ;;  %v4840_v6 = vld [vmem:[#allocation36_spill] sm:$0xff] }
 0x1e4   : > { %v3207_v17 = vpop.f32.mrf.mxu1  ;;  %v2390_v8 = vpop.f32.mrf.mxu0  ;;  %v1841_v30 = vadd.f32 %v4837_v1, %v4836_v52  ;;  %v2040_v38 = vadd.f32 %v4838_v60, %v1838_v53  ;;  %v4852_v52 = vld [vmem:[#allocation41_spill] sm:$0xff] }
 0x1e5   : > { %2559 = vst.msk [vmem:[%s4507_s15 + $0x90] sm:$0xff] %vm2540_vm4, %v2526_v19  ;;  %v2524_v63 = vmax.f32 %v2492_v9, 0.0  ;;  %v2495_v33 = vadd.f32 %v4493_v27, %v2456_v57  ;;  %v2454_v12 = vadd.f32 %v2377_v28, %v2245_v44  ;;  %v2250_v5 = vadd.f32 %v3207_v17, %v2038_v45  ;;  %v4839_v28 = vld [vmem:[#allocation2_spill] sm:$0xff] }
 0x1e6   : > { %v2181_v29 = vpop.f32.mrf.mxu1  ;;  %v3242_v23 = vpop.f32.mrf.mxu0  ;;  %v1839_v47 = vadd.f32 %v4840_v6, %v4839_v28  ;;  %v2043_v34 = vadd.f32 %v4841_v40, %v1841_v30  ;;  %v4843_v19 = vld [vmem:[#allocation38_spill] sm:$0xff] }
 0x1e7   : > { %2557 = vst.msk [vmem:[%s4507_s15 + $0x80] sm:$0xff] %vm2540_vm4, %v2524_v63  ;;  %v2527_v24 = vmax.f32 %v2495_v33, 0.0  ;;  %v2493_v20 = vadd.f32 %v4493_v27, %v2454_v12  ;;  %v2459_v0 = vadd.f32 %v3241_v32, %v2250_v5  ;;  %v2248_v56 = vadd.f32 %v2181_v29, %v2036_v10  ;;  %v4842_v32 = vld [vmem:[#allocation18_spill] sm:$0xff]  ;;  %v4846_v63 = vld [vmem:[#allocation40_spill] sm:$0xff] }
 0x1e8   : > { %v3208_v4 = vpop.f32.mrf.mxu1  ;;  %v2393_v46 = vpop.f32.mrf.mxu0  ;;  %v1844_v9 = vadd.f32 %v4843_v19, %v4842_v32  ;;  %v2041_v17 = vadd.f32 %v4844_v7, %v1839_v47 }
 0x1e9   : > { %2560 = vst.msk [vmem:[%s4507_s15 + $0x98] sm:$0xff] %vm2540_vm4, %v2527_v24  ;;  %v2525_v13 = vmax.f32 %v2493_v20, 0.0  ;;  %v2498_v39 = vadd.f32 %v4493_v27, %v2459_v0  ;;  %v2457_v35 = vadd.f32 %v2390_v8, %v2248_v56  ;;  %v2251_v59 = vadd.f32 %v3208_v4, %v2039_v22  ;;  %v4845_v8 = vld [vmem:[#allocation3_spill] sm:$0xff]  ;;  %v4850_v4 = vld [vmem:[#allocation8_spill] sm:$0xff] }
 0x1ea   : > { %v2184_v42 = vpop.f32.mrf.mxu1  ;;  %v3245_v15 = vpop.f32.mrf.mxu0  ;;  %v1842_v33 = vadd.f32 %v4846_v63, %v4845_v8  ;;  %v2046_v29 = vadd.f32 %v4847_v11, %v1844_v9 }
 0x1eb   : > { %2558 = vst.msk [vmem:[%s4507_s15 + $0x88] sm:$0xff] %vm2540_vm4, %v2525_v13  ;;  %v2530_v25 = vmax.f32 %v2498_v39, 0.0  ;;  %v2496_v37 = vadd.f32 %v4493_v27, %v2457_v35  ;;  %v2460_v51 = vadd.f32 %v3242_v23, %v2251_v59  ;;  %v2249_v50 = vadd.f32 %v2184_v42, %v2037_v31  ;;  %v4848_v23 = vld [vmem:[#allocation5_spill] sm:$0xff] }
 0x1ec   : > { %v3211_v62 = vpop.f32.mrf.mxu1  ;;  %v2406_v43 = vpop.f32.mrf.mxu0  ;;  %v1845_v24 = vadd.f32 %v4475_v61, %v4848_v23  ;;  %v2044_v53 = vadd.f32 %v4849_v16, %v1842_v33 }
 0x1ed   : > { %2563 = vst.msk [vmem:[%s4507_s15 + $0xb0] sm:$0xff] %vm2540_vm4, %v2530_v25  ;;  %v2528_v18 = vmax.f32 %v2496_v37, 0.0  ;;  %v2499_v45 = vadd.f32 %v4493_v27, %v2460_v51  ;;  %v2458_v21 = vadd.f32 %v2393_v46, %v2249_v50  ;;  %v2254_v48 = vadd.f32 %v3211_v62, %v2042_v41  ;;  %v4851_v46 = vld [vmem:[#allocation43_spill] sm:$0xff]  ;;  %v4853_v51 = vld [vmem:[#allocation42_spill] sm:$0xff] }
 0x1ee   : > { %v2197_v57 = vpop.f32.mrf.mxu1  ;;  %v3246_v44 = vpop.f32.mrf.mxu0  ;;  %v1843_v13 = vadd.f32 %v4851_v46, %v4850_v4  ;;  %v2047_v1 = vadd.f32 %v4852_v52, %v1845_v24 }
 0x1ef   : > { %2561 = vst.msk [vmem:[%s4507_s15 + $0xa0] sm:$0xff] %vm2540_vm4, %v2528_v18  ;;  %v2531_v3 = vmax.f32 %v2499_v45, 0.0  ;;  %v2497_v10 = vadd.f32 %v4493_v27, %v2458_v21  ;;  %v2463_v14 = vadd.f32 %v3245_v15, %v2254_v48  ;;  %v2252_v49 = vadd.f32 %v2197_v57, %v2040_v38 }
 0x1f0   : > { %v3212_v12 = vpop.f32.mrf.mxu1  ;;  %v2409_v5 = vpop.f32.mrf.mxu0  ;;  %v2045_v50 = vadd.f32 %v4853_v51, %v1843_v13 }
 0x1f1   : > { %2564 = vst.msk [vmem:[%s4507_s15 + $0xb8] sm:$0xff] %vm2540_vm4, %v2531_v3  ;;  %v2529_v26 = vmax.f32 %v2497_v10, 0.0  ;;  %v2502_v22 = vadd.f32 %v4493_v27, %v2463_v14  ;;  %v2461_v36 = vadd.f32 %v2406_v43, %v2252_v49  ;;  %v2255_v2 = vadd.f32 %v3212_v12, %v2043_v34 }
 0x1f2   : > { %v2200_v20 = vpop.f32.mrf.mxu1  ;;  %v3249_v0 = vpop.f32.mrf.mxu0 }
 0x1f3   : > { %2562 = vst.msk [vmem:[%s4507_s15 + $0xa8] sm:$0xff] %vm2540_vm4, %v2529_v26  ;;  %v2534_v56 = vmax.f32 %v2502_v22, 0.0  ;;  %v2500_v54 = vadd.f32 %v4493_v27, %v2461_v36  ;;  %v2464_v31 = vadd.f32 %v3246_v44, %v2255_v2  ;;  %v2253_v55 = vadd.f32 %v2200_v20, %v2041_v17 }
 0x1f4   : > { %v3215_v39 = vpop.f32.mrf.mxu1  ;;  %v2422_v35 = vpop.f32.mrf.mxu0 }
 0x1f5   : > { %2567 = vst.msk [vmem:[%s4507_s15 + $0xd0] sm:$0xff] %vm2540_vm4, %v2534_v56  ;;  %v2532_v61 = vmax.f32 %v2500_v54, 0.0  ;;  %v2503_v59 = vadd.f32 %v4493_v27, %v2464_v31  ;;  %v2462_v58 = vadd.f32 %v2409_v5, %v2253_v55  ;;  %v2258_v41 = vadd.f32 %v3215_v39, %v2046_v29 }
 0x1f6   : > { %v2213_v30 = vpop.f32.mrf.mxu1  ;;  %v3250_v38 = vpop.f32.mrf.mxu0 }
 0x1f7   : > { %2565 = vst.msk [vmem:[%s4507_s15 + $0xc0] sm:$0xff] %vm2540_vm4, %v2532_v61  ;;  %v2535_v42 = vmax.f32 %v2503_v59, 0.0  ;;  %v2501_v15 = vadd.f32 %v4493_v27, %v2462_v58  ;;  %v2467_v25 = vadd.f32 %v3249_v0, %v2258_v41  ;;  %v2256_v37 = vadd.f32 %v2213_v30, %v2044_v53 }
 0x1f8   : > { %v3216_v60 = vpop.f32.mrf.mxu1  ;;  %v2425_v40 = vpop.f32.mrf.mxu0 }
 0x1f9   : > { %2568 = vst.msk [vmem:[%s4507_s15 + $0xd8] sm:$0xff] %vm2540_vm4, %v2535_v42  ;;  %v2533_v28 = vmax.f32 %v2501_v15, 0.0  ;;  %v2506_v6 = vadd.f32 %v4493_v27, %v2467_v25  ;;  %v2465_v47 = vadd.f32 %v2422_v35, %v2256_v37  ;;  %v2259_v62 = vadd.f32 %v3216_v60, %v2047_v1 }
 0x1fa   : > { %v2216_v43 = vpop.f32.mrf.mxu1 }
 0x1fb   : > { %2566 = vst.msk [vmem:[%s4507_s15 + $0xc8] sm:$0xff] %vm2540_vm4, %v2533_v28  ;;  %v2538_v18 = vmax.f32 %v2506_v6, 0.0  ;;  %v2504_v45 = vadd.f32 %v4493_v27, %v2465_v47  ;;  %v2468_v21 = vadd.f32 %v3250_v38, %v2259_v62  ;;  %v2257_v48 = vadd.f32 %v2216_v43, %v2045_v50 }
 0x1fd   : > { %2571 = vst.msk [vmem:[%s4507_s15 + $0xf0] sm:$0xff] %vm2540_vm4, %v2538_v18  ;;  %v2536_v34 = vmax.f32 %v2504_v45, 0.0  ;;  %v2507_v32 = vadd.f32 %v4493_v27, %v2468_v21  ;;  %v2466_v19 = vadd.f32 %v2425_v40, %v2257_v48 }
 0x1ff   : > { %2569 = vst.msk [vmem:[%s4507_s15 + $0xe0] sm:$0xff] %vm2540_vm4, %v2536_v34  ;;  %v2539_v9 = vmax.f32 %v2507_v32, 0.0  ;;  %v2505_v57 = vadd.f32 %v4493_v27, %v2466_v19 }
 0x201   : > { %2572 = vst.msk [vmem:[%s4507_s15 + $0xf8] sm:$0xff] %vm2540_vm4, %v2539_v9  ;;  %v2537_v44 = vmax.f32 %v2505_v57, 0.0 }
 0x203   : > { %2570 = vst.msk [vmem:[%s4507_s15 + $0xe8] sm:$0xff] %vm2540_vm4, %v2537_v44 }
 0x204 PF: > { %s13_s12 = sadd.s32 1, %s3278_s12  }
 0x205   : > { %p10_p4 = scmp.ge.s32.totalorder %s13_s12, 4  }
 0x207   :  { %12 = sbr.rel (!%p10_p4) target bundleno = 1 (0x1), region = 70 }

// kernel: inception_forward.9
= control target key start
LH: loop header
LB: loop body
LE: loop exit
PB: predicated region body
PF: predicated region fallthrough
CT: control target
= control target key end

     0   :  { %s1151_s12 = smov 0   ;;  %s1566_s0 = inlined_call_operand.vmem [shape: f32[2,18,18,16], index: 0, kind: input, shape index: {}]   ;;  %s1567_s1 = inlined_call_operand.vmem [shape: bf16[16,8], index: 1, kind: input, shape index: {}]   ;;  %s1568_s2 = inlined_call_operand.vmem [shape: f32[1,8], index: 2, kind: input, shape index: {}]   ;;  %s1569_s3 = inlined_call_operand.vmem [shape: f32[2,16,16,8], index: 3, kind: output, shape index: {}]  }
   0x1 LB: > { %s1031_s13 = sadd.s32 4294967295, %s1129_s12   ;;  %p1035_p0 = scmp.ge.s32.totalorder %s1129_s12, 1  ;;  %s1129_s12 = sphi %s1151_s12, %s13_s12  }
   0x2   : > { %p137_p1 = scmp.lt.s32.totalorder %s1129_s12, 3 }
   0x4   : > { %p138_p2 = pnand %p1035_p0, %p137_p1 }
   0x5   : > { %p161_p3 = scmp.lt.s32.totalorder (!%p138_p2), %s1031_s13, 1 }
   0x6   : > { %141 = sbr.rel (%p138_p2) target bundleno = 309 (0x135), region = 32 }
   0xb   : > { %v1122_v0 = vld [vmem:[%s1567_s1] sm:$0xff]   ;;  %s1571_s13 = smov (!%p161_p3, %s1031_s13), 1  ;;  %vm280_vm0 = vcmask 1046528   ;;  %vm443_vm1 = vcmask 1045504   ;;  %vm701_vm2 = vcmask 130048   ;;  %vm943_vm3 = vcmask 64512  }
   0xc   : > { %1077 = vmatprep.subr.bf16.mxu0 %v1122_v0  ;;  %1111 = vmatprep.subr.bf16.mxu1 %v1122_v0  ;;  %s1113_s16 = smul.u32 432, %s1571_s13  ;;  %s1059_s22 = sshll.u32 %s1571_s13, 8 }
   0xd   : > { %1078 = vmatpush3.bf16.msra.mxu0 %v1122_v0  ;;  %1112 = vmatpush3.bf16.msra.mxu1 %v1122_v0  ;;  %s1466_s25 = scalar_lea.vmem %s1569_s3, %s1059_s22 }
   0xe   : > { %s1168_s19 = scalar_lea.vmem %s1566_s0, %s1113_s16 }
   0xf   : > { %v172_v1 = vld [vmem:[%s1168_s19] sm:$0xff]  ;;  %v173_v2 = vld [vmem:[%s1168_s19 + $0x8] sm:$0xff]  ;;  %v174_v3 = vld [vmem:[%s1168_s19 + $0x10] sm:$0x3] }
  0x10   : > { %v175_v4 = vld [vmem:[%s1168_s19 + $0x18] sm:$0xff]  ;;  %v176_v5 = vld [vmem:[%s1168_s19 + $0x20] sm:$0xff]  ;;  %v177_v6 = vld [vmem:[%s1168_s19 + $0x28] sm:$0x3]  ;;  %v281_v7 = vrot.slane %v172_v1, 1  ;;  %v282_v8 = vrot.slane %v173_v2, 1 }
  0x11   : > { %v178_v9 = vld [vmem:[%s1168_s19 + $0x30] sm:$0xff]  ;;  %v179_v10 = vld [vmem:[%s1168_s19 + $0x38] sm:$0xff]  ;;  %v180_v11 = vld [vmem:[%s1168_s19 + $0x40] sm:$0x3]  ;;  %v284_v12 = vrot.slane %v174_v3, 1  ;;  %v286_v13 = vrot.slane %v175_v4, 1 }
  0x12   : > { %v283_v14 = vsel %vm280_vm0, %v281_v7, %v282_v8  ;;  %v287_v15 = vrot.slane %v176_v5, 1  ;;  %v289_v16 = vrot.slane %v177_v6, 1  ;;  %v291_v17 = vrot.slane %v178_v9, 1  ;;  %v1188_v42 = vld [vmem:[%s1168_s19 + $0xc0] sm:$0xff]  ;;  %v1191_v43 = vld [vmem:[%s1168_s19 + $0xc8] sm:$0xff]  ;;  %v199_v49 = vld [vmem:[%s1168_s19 + $0xd8] sm:$0xff] }
  0x13   : > { %v285_v18 = vsel %vm280_vm0, %v282_v8, %v284_v12  ;;  %v292_v19 = vrot.slane %v179_v10, 1  ;;  %v294_v20 = vrot.slane %v180_v11, 1  ;;  %v407_v21 = vmax.f32 %v172_v1, %v283_v14  ;;  %v198_v48 = vld [vmem:[%s1168_s19 + $0xd0] sm:$0x3]  ;;  %v200_v54 = vld [vmem:[%s1168_s19 + $0xe0] sm:$0xff]  ;;  %v203_v63 = vld [vmem:[%s1168_s19 + $0xf8] sm:$0xff] }
  0x14   : > { %v288_v22 = vsel %vm280_vm0, %v286_v13, %v287_v15  ;;  %v290_v23 = vsel %vm280_vm0, %v287_v15, %v289_v16  ;;  %v408_v24 = vmax.f32 %v173_v2, %v285_v18  ;;  %v444_v25 = vrot.slane %v172_v1, 2  ;;  %v201_v57 = vld [vmem:[%s1168_s19 + $0xe8] sm:$0x3]  ;;  %v202_v62 = vld [vmem:[%s1168_s19 + $0xf0] sm:$0xff]  ;;  %v204_v0 = vld [vmem:[%s1168_s19 + $0x100] sm:$0x3] }
  0x15   : > { %v293_v26 = vsel %vm280_vm0, %v291_v17, %v292_v19  ;;  %v295_v27 = vsel %vm280_vm0, %v292_v19, %v294_v20  ;;  %v409_v28 = vmax.f32 %v175_v4, %v288_v22  ;;  %v410_v29 = vmax.f32 %v176_v5, %v290_v23 }
  0x16   : > { %v411_v30 = vmax.f32 %v178_v9, %v293_v26  ;;  %v412_v31 = vmax.f32 %v179_v10, %v295_v27  ;;  %v445_v32 = vrot.slane %v173_v2, 2  ;;  %v447_v33 = vrot.slane %v174_v3, 2 }
  0x17   : > { %v449_v34 = vrot.slane %v175_v4, 2  ;;  %v450_v35 = vrot.slane %v176_v5, 2  ;;  %v452_v36 = vrot.slane %v177_v6, 2  ;;  %v454_v37 = vrot.slane %v178_v9, 2 }
  0x18   : > { %v446_v38 = vsel %vm443_vm1, %v444_v25, %v445_v32  ;;  %v448_v39 = vsel %vm443_vm1, %v445_v32, %v447_v33  ;;  %v455_v40 = vrot.slane %v179_v10, 2  ;;  %v457_v41 = vrot.slane %v180_v11, 2 }
  0x19   : > { %v451_v44 = vsel %vm443_vm1, %v449_v34, %v450_v35  ;;  %v453_v45 = vsel %vm443_vm1, %v450_v35, %v452_v36  ;;  %v570_v46 = vmax.f32 %v407_v21, %v446_v38  ;;  %v571_v47 = vmax.f32 %v408_v24, %v448_v39  ;;  %v181_v35 = vld [vmem:[%s1168_s19 + $0x48] sm:$0xff] }
  0x1a   : > { %v456_v50 = vsel %vm443_vm1, %v454_v37, %v455_v40  ;;  %v458_v51 = vsel %vm443_vm1, %v455_v40, %v457_v41  ;;  %v1199_v52 = vmax.f32 %v409_v28, %v451_v44  ;;  %v1201_v53 = vmax.f32 %v410_v29, %v453_v45  ;;  %v182_v40 = vld [vmem:[%s1168_s19 + $0x50] sm:$0xff]  ;;  %v183_v41 = vld [vmem:[%s1168_s19 + $0x58] sm:$0x3] }
  0x1b   : > { %v1204_v55 = vmax.f32 %v411_v30, %v456_v50  ;;  %v1206_v56 = vmax.f32 %v412_v31, %v458_v51  ;;  %v321_v58 = vrot.slane %v1188_v42, 1  ;;  %v322_v59 = vrot.slane %v1191_v43, 1  ;;  %v206_v51 = vld [vmem:[%s1168_s19 + $0x110] sm:$0xff] }
  0x1c   : > { %v606_v60 = vmax.f32 %v570_v46, %v1199_v52  ;;  %v607_v61 = vmax.f32 %v571_v47, %v1201_v53  ;;  %v324_v1 = vrot.slane %v198_v48, 1  ;;  %v326_v2 = vrot.slane %v199_v49, 1  ;;  %v205_v46 = vld [vmem:[%s1168_s19 + $0x108] sm:$0xff] }
  0x1d   : > { %v608_v3 = vmax.f32 %v1199_v52, %v1204_v55  ;;  %v609_v4 = vmax.f32 %v1201_v53, %v1206_v56  ;;  %v323_v5 = vsel %vm280_vm0, %v321_v58, %v322_v59  ;;  %v327_v6 = vrot.slane %v200_v54, 1 }
  0x1e   : > { %v638_v7 = vmax.f32 %v606_v60, %v1204_v55  ;;  %v639_v8 = vmax.f32 %v607_v61, %v1206_v56  ;;  %v325_v9 = vsel %vm280_vm0, %v322_v59, %v324_v1  ;;  %v329_v10 = vrot.slane %v201_v57, 1 }
  0x1f   : > { %v328_v11 = vsel %vm280_vm0, %v326_v2, %v327_v6  ;;  %v331_v12 = vrot.slane %v202_v62, 1  ;;  %v332_v13 = vrot.slane %v203_v63, 1  ;;  %v334_v14 = vrot.slane %v204_v0, 1 }
  0x20   : > { %v670_v15 = vpack.c.bf16 %v639_v8, %v638_v7  ;;  %v330_v16 = vsel %vm280_vm0, %v327_v6, %v329_v10  ;;  %v423_v17 = vmax.f32 %v1188_v42, %v323_v5  ;;  %v424_v18 = vmax.f32 %v1191_v43, %v325_v9 }
  0x21   : > { %v333_v19 = vsel %vm280_vm0, %v331_v12, %v332_v13  ;;  %v335_v20 = vsel %vm280_vm0, %v332_v13, %v334_v14  ;;  %v425_v21 = vmax.f32 %v199_v49, %v328_v11  ;;  %v426_v22 = vmax.f32 %v200_v54, %v330_v16 }
  0x22   : > { %1079 = vmatprep.mubr.msk.bf16.mxu0 %vm701_vm2, %v670_v15  ;;  %v427_v23 = vmax.f32 %v202_v62, %v333_v19  ;;  %v428_v24 = vmax.f32 %v203_v63, %v335_v20  ;;  %v484_v25 = vrot.slane %v1188_v42, 2  ;;  %v485_v26 = vrot.slane %v1191_v43, 2  ;;  %v184_v19 = vld [vmem:[%s1168_s19 + $0x60] sm:$0xff]  ;;  %v185_v20 = vld [vmem:[%s1168_s19 + $0x68] sm:$0xff] }
  0x23   : > { %v487_v27 = vrot.slane %v198_v48, 2  ;;  %v489_v28 = vrot.slane %v199_v49, 2  ;;  %v490_v29 = vrot.slane %v200_v54, 2  ;;  %v492_v30 = vrot.slane %v201_v57, 2 }
  0x24   : > { %v486_v31 = vsel %vm443_vm1, %v484_v25, %v485_v26  ;;  %v494_v32 = vrot.slane %v202_v62, 2  ;;  %v495_v33 = vrot.slane %v203_v63, 2  ;;  %v497_v34 = vrot.slane %v204_v0, 2  ;;  %v207_v63 = vld [vmem:[%s1168_s19 + $0x118] sm:$0x3] }
  0x25   : > { %v488_v36 = vsel %vm443_vm1, %v485_v26, %v487_v27  ;;  %v491_v37 = vsel %vm443_vm1, %v489_v28, %v490_v29  ;;  %v493_v38 = vsel %vm443_vm1, %v490_v29, %v492_v30  ;;  %v1238_v39 = vmax.f32 %v423_v17, %v486_v31  ;;  %v186_v25 = vld [vmem:[%s1168_s19 + $0x70] sm:$0x3] }
  0x26   : > { %v496_v42 = vsel %vm443_vm1, %v494_v32, %v495_v33  ;;  %v498_v43 = vsel %vm443_vm1, %v495_v33, %v497_v34  ;;  %v1244_v44 = vmax.f32 %v424_v18, %v488_v36  ;;  %v1246_v45 = vmax.f32 %v425_v21, %v491_v37 }
  0x27   : > { %v1249_v47 = vmax.f32 %v426_v22, %v493_v38  ;;  %v1251_v48 = vmax.f32 %v427_v23, %v496_v42  ;;  %v1253_v49 = vmax.f32 %v428_v24, %v498_v43  ;;  %v296_v50 = vrot.slane %v181_v35, 1  ;;  %v208_v38 = vld [vmem:[%s1168_s19 + $0x120] sm:$0xff] }
  0x28   : > { %v622_v54 = vmax.f32 %v1238_v39, %v1246_v45  ;;  %v297_v57 = vrot.slane %v182_v40, 1  ;;  %v299_v58 = vrot.slane %v183_v41, 1  ;;  %v459_v59 = vrot.slane %v181_v35, 2 }
  0x29   : > { %v623_v60 = vmax.f32 %v1244_v44, %v1249_v47  ;;  %v460_v61 = vrot.slane %v182_v40, 2  ;;  %v462_v62 = vrot.slane %v183_v41, 2  ;;  %v336_v0 = vrot.slane %v205_v46, 1 }
  0x2a   : > { %v654_v1 = vmax.f32 %v622_v54, %v1251_v48  ;;  %v298_v2 = vsel %vm280_vm0, %v296_v50, %v297_v57  ;;  %v300_v5 = vsel %vm280_vm0, %v297_v57, %v299_v58  ;;  %v337_v6 = vrot.slane %v206_v51, 1  ;;  %v210_v50 = vld [vmem:[%s1168_s19 + $0x130] sm:$0x3] }
  0x2b   : > { %v655_v7 = vmax.f32 %v623_v60, %v1253_v49  ;;  %v413_v8 = vmax.f32 %v181_v35, %v298_v2  ;;  %v414_v9 = vmax.f32 %v182_v40, %v300_v5  ;;  %v461_v10 = vsel %vm443_vm1, %v459_v59, %v460_v61 }
  0x2c   : > { %v463_v11 = vsel %vm443_vm1, %v460_v61, %v462_v62  ;;  %v338_v12 = vsel %vm280_vm0, %v336_v0, %v337_v6  ;;  %v339_v13 = vrot.slane %v207_v63, 1  ;;  %v499_v14 = vrot.slane %v205_v46, 2 }
  0x2d   : > { %v678_v15 = vpack.c.bf16 %v655_v7, %v654_v1  ;;  %v1268_v16 = vmax.f32 %v413_v8, %v461_v10  ;;  %v1270_v17 = vmax.f32 %v414_v9, %v463_v11  ;;  %v429_v18 = vmax.f32 %v205_v46, %v338_v12  ;;  %v209_v46 = vld [vmem:[%s1168_s19 + $0x128] sm:$0xff]  ;;  %v187_v8 = vld [vmem:[%s1168_s19 + $0x78] sm:$0xff]  ;;  %v188_v9 = vld [vmem:[%s1168_s19 + $0x80] sm:$0xff] }
  0x2e   : > { %v340_v21 = vsel %vm280_vm0, %v337_v6, %v339_v13  ;;  %v500_v22 = vrot.slane %v206_v51, 2  ;;  %v502_v23 = vrot.slane %v207_v63, 2  ;;  %v624_v24 = vmax.f32 %v1246_v45, %v1251_v48  ;;  %v189_v10 = vld [vmem:[%s1168_s19 + $0x88] sm:$0x3] }
  0x2f   : > { %1095 = vmatprep.mubr.msk.bf16.mxu1 %vm701_vm2, %v678_v15  ;;  %v640_v26 = vmax.f32 %v608_v3, %v1268_v16  ;;  %v641_v27 = vmax.f32 %v609_v4, %v1270_v17  ;;  %v430_v28 = vmax.f32 %v206_v51, %v340_v21  ;;  %v625_v29 = vmax.f32 %v1249_v47, %v1253_v49 }
  0x30   : > { %v501_v30 = vsel %vm443_vm1, %v499_v14, %v500_v22  ;;  %v503_v31 = vsel %vm443_vm1, %v500_v22, %v502_v23  ;;  %v301_v32 = vrot.slane %v184_v19, 1  ;;  %v302_v33 = vrot.slane %v185_v20, 1 }
  0x31   : > { %v671_v52 = vpack.c.bf16 %v641_v27, %v640_v26  ;;  %v1291_v3 = vmax.f32 %v429_v18, %v501_v30  ;;  %v1293_v34 = vmax.f32 %v430_v28, %v503_v31  ;;  %v304_v53 = vrot.slane %v186_v25, 1  ;;  %v211_v27 = vld [vmem:[%s1168_s19 + $0x138] sm:$0xff]  ;;  %v212_v31 = vld [vmem:[%s1168_s19 + $0x140] sm:$0xff] }
  0x32   : > { %v303_v4 = vsel %vm280_vm0, %v301_v32, %v302_v33  ;;  %v464_v35 = vrot.slane %v184_v19, 2  ;;  %v465_v36 = vrot.slane %v185_v20, 2  ;;  %v467_v37 = vrot.slane %v186_v25, 2 }
  0x33   : > { %1080 = vmatmul.mubr.msk.bf16.vlgmr.msra.gmra.mxu0 %vm701_vm2, %v671_v52  ;;  %v656_v40 = vmax.f32 %v624_v24, %v1291_v3  ;;  %v657_v41 = vmax.f32 %v625_v29, %v1293_v34  ;;  %v305_v42 = vsel %vm280_vm0, %v302_v33, %v304_v53  ;;  %v415_v43 = vmax.f32 %v184_v19, %v303_v4  ;;  %v213_v4 = vld [vmem:[%s1168_s19 + $0x148] sm:$0x3] }
  0x34   : > { %v416_v51 = vmax.f32 %v185_v20, %v305_v42  ;;  %v466_v54 = vsel %vm443_vm1, %v464_v35, %v465_v36  ;;  %v468_v57 = vsel %vm443_vm1, %v465_v36, %v467_v37  ;;  %v610_v58 = vmax.f32 %v1204_v55, %v1268_v16 }
  0x35   : > { %v679_v59 = vpack.c.bf16 %v657_v41, %v656_v40  ;;  %v1307_v60 = vmax.f32 %v415_v43, %v466_v54  ;;  %v611_v61 = vmax.f32 %v1206_v56, %v1270_v17  ;;  %v341_v62 = vrot.slane %v208_v38, 1  ;;  %v190_v54 = vld [vmem:[%s1168_s19 + $0x90] sm:$0xff] }
  0x36   : > { %v1311_v63 = vmax.f32 %v416_v51, %v468_v57  ;;  %v342_v0 = vrot.slane %v209_v46, 1  ;;  %v344_v1 = vrot.slane %v210_v50, 1  ;;  %v504_v2 = vrot.slane %v208_v38, 2 }
  0x37   : > { %1096 = vmatmul.mubr.msk.bf16.vlgmr.msra.gmra.mxu1 %vm701_vm2, %v679_v59  ;;  %v642_v5 = vmax.f32 %v610_v58, %v1307_v60  ;;  %v505_v6 = vrot.slane %v209_v46, 2  ;;  %v507_v7 = vrot.slane %v210_v50, 2  ;;  %v626_v55 = vmax.f32 %v1251_v48, %v1291_v3 }
  0x38   : > { %v643_v56 = vmax.f32 %v611_v61, %v1311_v63  ;;  %v343_v11 = vsel %vm280_vm0, %v341_v62, %v342_v0  ;;  %v345_v12 = vsel %vm280_vm0, %v342_v0, %v344_v1  ;;  %v627_v13 = vmax.f32 %v1253_v49, %v1293_v34  ;;  %v191_v61 = vld [vmem:[%s1168_s19 + $0x98] sm:$0xff]  ;;  %v192_v62 = vld [vmem:[%s1168_s19 + $0xa0] sm:$0x3] }
  0x39   : > { %v431_v14 = vmax.f32 %v208_v38, %v343_v11  ;;  %v432_v15 = vmax.f32 %v209_v46, %v345_v12  ;;  %v506_v18 = vsel %vm443_vm1, %v504_v2, %v505_v6  ;;  %v508_v48 = vsel %vm443_vm1, %v505_v6, %v507_v7 }
  0x3a   : > { %v672_v19 = vpack.c.bf16 %v643_v56, %v642_v5  ;;  %v306_v20 = vrot.slane %v187_v8, 1  ;;  %v307_v21 = vrot.slane %v188_v9, 1  ;;  %v309_v22 = vrot.slane %v189_v10, 1 }
  0x3b   : > { %v1327_v23 = vmax.f32 %v431_v14, %v506_v18  ;;  %v1329_v24 = vmax.f32 %v432_v15, %v508_v48  ;;  %v469_v25 = vrot.slane %v187_v8, 2  ;;  %v470_v26 = vrot.slane %v188_v9, 2  ;;  %v214_v15 = vld [vmem:[%s1168_s19 + $0x150] sm:$0xff]  ;;  %v215_v18 = vld [vmem:[%s1168_s19 + $0x158] sm:$0xff]  ;;  %v216_v48 = vld [vmem:[%s1168_s19 + $0x160] sm:$0x3] }
  0x3c   : > { %1083 = vmatprep.mubr.msk.bf16.mxu0 %vm701_vm2, %v672_v19  ;;  %v308_v49 = vsel %vm280_vm0, %v306_v20, %v307_v21  ;;  %v310_v28 = vsel %vm280_vm0, %v307_v21, %v309_v22  ;;  %v472_v29 = vrot.slane %v189_v10, 2  ;;  %v612_v30 = vmax.f32 %v1268_v16, %v1307_v60 }
  0x3d   : > { %v658_v32 = vmax.f32 %v626_v55, %v1327_v23  ;;  %v659_v33 = vmax.f32 %v627_v13, %v1329_v24  ;;  %v417_v52 = vmax.f32 %v187_v8, %v308_v49  ;;  %v418_v53 = vmax.f32 %v188_v9, %v310_v28 }
  0x3e   : > { %v471_v35 = vsel %vm443_vm1, %v469_v25, %v470_v26  ;;  %v473_v36 = vsel %vm443_vm1, %v470_v26, %v472_v29  ;;  %v613_v37 = vmax.f32 %v1270_v17, %v1311_v63  ;;  %v346_v38 = vrot.slane %v211_v27, 1 }
  0x3f   : > { %v680_v16 = vpack.c.bf16 %v659_v33, %v658_v32  ;;  %v1345_v40 = vmax.f32 %v417_v52, %v471_v35  ;;  %v1347_v41 = vmax.f32 %v418_v53, %v473_v36  ;;  %v347_v42 = vrot.slane %v212_v31, 1  ;;  %v193_v35 = vld [vmem:[%s1168_s19 + $0xa8] sm:$0xff] }
  0x40   : > { %v349_v43 = vrot.slane %v213_v4, 1  ;;  %v509_v46 = vrot.slane %v211_v27, 2  ;;  %v510_v50 = vrot.slane %v212_v31, 2  ;;  %v512_v51 = vrot.slane %v213_v4, 2 }
  0x41   : > { %1099 = vmatprep.mubr.msk.bf16.mxu1 %vm701_vm2, %v680_v16  ;;  %v644_v57 = vmax.f32 %v612_v30, %v1345_v40  ;;  %v645_v17 = vmax.f32 %v613_v37, %v1347_v41  ;;  %v348_v58 = vsel %vm280_vm0, %v346_v38, %v347_v42  ;;  %v628_v59 = vmax.f32 %v1291_v3, %v1327_v23 }
  0x42   : > { %v350_v0 = vsel %vm280_vm0, %v347_v42, %v349_v43  ;;  %v433_v1 = vmax.f32 %v211_v27, %v348_v58  ;;  %v511_v2 = vsel %vm443_vm1, %v509_v46, %v510_v50  ;;  %v513_v5 = vsel %vm443_vm1, %v510_v50, %v512_v51  ;;  %v194_v42 = vld [vmem:[%s1168_s19 + $0xb0] sm:$0xff]  ;;  %v195_v43 = vld [vmem:[%s1168_s19 + $0xb8] sm:$0x3] }
  0x43   : > { %v673_v6 = vpack.c.bf16 %v645_v17, %v644_v57  ;;  %v434_v7 = vmax.f32 %v212_v31, %v350_v0  ;;  %v629_v55 = vmax.f32 %v1293_v34, %v1329_v24  ;;  %v311_v8 = vrot.slane %v190_v54, 1 }
  0x44   : > { %v1363_v9 = vmax.f32 %v433_v1, %v511_v2  ;;  %v312_v3 = vrot.slane %v191_v61, 1  ;;  %v314_v10 = vrot.slane %v192_v62, 1  ;;  %v474_v56 = vrot.slane %v190_v54, 2 }
  0x45   : > { %1084 = vmatmul.mubr.msk.bf16.gmra.mxu0 %vm701_vm2, %v673_v6  ;;  %v1366_v11 = vmax.f32 %v434_v7, %v513_v5  ;;  %v475_v12 = vrot.slane %v191_v61, 2  ;;  %v477_v13 = vrot.slane %v192_v62, 2  ;;  %v614_v14 = vmax.f32 %v1307_v60, %v1345_v40  ;;  %v217_v6 = vld [vmem:[%s1168_s19 + $0x168] sm:$0xff]  ;;  %v218_v7 = vld [vmem:[%s1168_s19 + $0x170] sm:$0xff] }
  0x46   : > { %v660_v34 = vmax.f32 %v628_v59, %v1363_v9  ;;  %v313_v19 = vsel %vm280_vm0, %v311_v8, %v312_v3  ;;  %v315_v20 = vsel %vm280_vm0, %v312_v3, %v314_v10  ;;  %v615_v21 = vmax.f32 %v1311_v63, %v1347_v41 }
  0x47   : > { %v661_v22 = vmax.f32 %v629_v55, %v1366_v11  ;;  %v419_v25 = vmax.f32 %v190_v54, %v313_v19  ;;  %v420_v26 = vmax.f32 %v191_v61, %v315_v20  ;;  %v476_v27 = vsel %vm443_vm1, %v474_v56, %v475_v12  ;;  %v219_v55 = vld [vmem:[%s1168_s19 + $0x178] sm:$0x3] }
  0x48   : > { %v478_v60 = vsel %vm443_vm1, %v475_v12, %v477_v13  ;;  %v351_v49 = vrot.slane %v214_v15, 1  ;;  %v352_v28 = vrot.slane %v215_v18, 1  ;;  %v354_v29 = vrot.slane %v216_v48, 1 }
  0x49   : > { %v681_v30 = vpack.c.bf16 %v661_v22, %v660_v34  ;;  %v1381_v31 = vmax.f32 %v419_v25, %v476_v27  ;;  %v1383_v32 = vmax.f32 %v420_v26, %v478_v60  ;;  %v514_v63 = vrot.slane %v214_v15, 2  ;;  %v220_v60 = vld [vmem:[%s1168_s19 + $0x180] sm:$0xff] }
  0x4a   : > { %v353_v33 = vsel %vm280_vm0, %v351_v49, %v352_v28  ;;  %v355_v52 = vsel %vm280_vm0, %v352_v28, %v354_v29  ;;  %v515_v53 = vrot.slane %v215_v18, 2  ;;  %v517_v4 = vrot.slane %v216_v48, 2 }
  0x4b   : > { %1100 = vmatmul.mubr.msk.bf16.gmra.mxu1 %vm701_vm2, %v681_v30  ;;  %v646_v36 = vmax.f32 %v614_v14, %v1381_v31  ;;  %v647_v37 = vmax.f32 %v615_v21, %v1383_v32  ;;  %v435_v38 = vmax.f32 %v214_v15, %v353_v33  ;;  %v436_v16 = vmax.f32 %v215_v18, %v355_v52  ;;  %v222_v33 = vld [vmem:[%s1168_s19 + $0x190] sm:$0x3] }
  0x4c   : > { %v516_v46 = vsel %vm443_vm1, %v514_v63, %v515_v53  ;;  %v518_v50 = vsel %vm443_vm1, %v515_v53, %v517_v4  ;;  %v630_v51 = vmax.f32 %v1327_v23, %v1363_v9  ;;  %v631_v54 = vmax.f32 %v1329_v24, %v1366_v11  ;;  %v221_v63 = vld [vmem:[%s1168_s19 + $0x188] sm:$0xff] }
  0x4d   : > { %v674_v57 = vpack.c.bf16 %v647_v37, %v646_v36  ;;  %v1399_v17 = vmax.f32 %v435_v38, %v516_v46  ;;  %v1401_v58 = vmax.f32 %v436_v16, %v518_v50  ;;  %v316_v59 = vrot.slane %v193_v35, 1 }
  0x4e   : > { %v317_v61 = vrot.slane %v194_v42, 1  ;;  %v319_v62 = vrot.slane %v195_v43, 1  ;;  %v479_v0 = vrot.slane %v193_v35, 2  ;;  %v480_v1 = vrot.slane %v194_v42, 2 }
  0x4f   : > { %1087 = vmatprep.mubr.msk.bf16.mxu0 %vm701_vm2, %v674_v57  ;;  %v662_v2 = vmax.f32 %v630_v51, %v1399_v17  ;;  %v663_v23 = vmax.f32 %v631_v54, %v1401_v58  ;;  %v482_v5 = vrot.slane %v195_v43, 2  ;;  %v616_v24 = vmax.f32 %v1345_v40, %v1381_v31 }
  0x50   : > { %v318_v8 = vsel %vm280_vm0, %v316_v59, %v317_v61  ;;  %v320_v3 = vsel %vm280_vm0, %v317_v61, %v319_v62  ;;  %v481_v10 = vsel %vm443_vm1, %v479_v0, %v480_v1  ;;  %v617_v56 = vmax.f32 %v1347_v41, %v1383_v32  ;;  %v223_v61 = vld [vmem:[%s1168_s19 + $0x198] sm:$0xff] }
  0x51   : > { %v682_v12 = vpack.c.bf16 %v663_v23, %v662_v2  ;;  %v421_v13 = vmax.f32 %v193_v35, %v318_v8  ;;  %v422_v14 = vmax.f32 %v194_v42, %v320_v3  ;;  %v483_v15 = vsel %vm443_vm1, %v480_v1, %v482_v5  ;;  %v224_v23 = vld [vmem:[%s1168_s19 + $0x1a0] sm:$0xff]  ;;  %v225_v5 = vld [vmem:[%s1168_s19 + $0x1a8] sm:$0x3] }
  0x52   : > { %v356_v18 = vrot.slane %v217_v6, 1  ;;  %v357_v40 = vrot.slane %v218_v7, 1  ;;  %v359_v48 = vrot.slane %v219_v55, 1  ;;  %v519_v34 = vrot.slane %v217_v6, 2 }
  0x53   : > { %1103 = vmatprep.mubr.msk.bf16.mxu1 %vm701_vm2, %v682_v12  ;;  %v584_v19 = vmax.f32 %v421_v13, %v481_v10  ;;  %v585_v20 = vmax.f32 %v422_v14, %v483_v15  ;;  %v520_v21 = vrot.slane %v218_v7, 2  ;;  %v522_v22 = vrot.slane %v219_v55, 2 }
  0x54   : > { %v358_v41 = vsel %vm280_vm0, %v356_v18, %v357_v40  ;;  %v360_v25 = vsel %vm280_vm0, %v357_v40, %v359_v48  ;;  %v632_v26 = vmax.f32 %v1363_v9, %v1399_v17  ;;  %v633_v27 = vmax.f32 %v1366_v11, %v1401_v58 }
  0x55   : > { %v648_v49 = vmax.f32 %v616_v24, %v584_v19  ;;  %v649_v28 = vmax.f32 %v617_v56, %v585_v20  ;;  %v437_v29 = vmax.f32 %v217_v6, %v358_v41  ;;  %v438_v30 = vmax.f32 %v218_v7, %v360_v25 }
  0x56   : > { %v521_v52 = vsel %vm443_vm1, %v519_v34, %v520_v21  ;;  %v523_v53 = vsel %vm443_vm1, %v520_v21, %v522_v22  ;;  %v618_v4 = vmax.f32 %v1381_v31, %v584_v19  ;;  %v619_v35 = vmax.f32 %v1383_v32, %v585_v20 }
  0x57   : > { %v675_v36 = vpack.c.bf16 %v649_v28, %v648_v49  ;;  %v600_v9 = vmax.f32 %v437_v29, %v521_v52  ;;  %v601_v37 = vmax.f32 %v438_v30, %v523_v53  ;;  %v361_v11 = vrot.slane %v220_v60, 1  ;;  %v1459_v28 = vld [vmem:[%s1568_s2] ss:$0 sm:$0xff] }
  0x58   : > { %v650_v38 = vmax.f32 %v618_v4, %v1238_v39  ;;  %v651_v16 = vmax.f32 %v619_v35, %v1244_v44  ;;  %v362_v42 = vrot.slane %v221_v63, 1  ;;  %v364_v43 = vrot.slane %v222_v33, 1 }
  0x59   : > { %1088 = vmatmul.mubr.msk.bf16.gmra.mxu0 %vm701_vm2, %v675_v36  ;;  %v664_v46 = vmax.f32 %v632_v26, %v600_v9  ;;  %v665_v50 = vmax.f32 %v633_v27, %v601_v37  ;;  %v524_v31 = vrot.slane %v220_v60, 2  ;;  %v525_v51 = vrot.slane %v221_v63, 2 }
  0x5a   : > { %v676_v32 = vpack.c.bf16 %v651_v16, %v650_v38  ;;  %v363_v54 = vsel %vm280_vm0, %v361_v11, %v362_v42  ;;  %v365_v57 = vsel %vm280_vm0, %v362_v42, %v364_v43  ;;  %v527_v59 = vrot.slane %v222_v33, 2 }
  0x5b   : > { %v683_v62 = vpack.c.bf16 %v665_v50, %v664_v46  ;;  %v439_v0 = vmax.f32 %v220_v60, %v363_v54  ;;  %v440_v1 = vmax.f32 %v221_v63, %v365_v57  ;;  %v526_v2 = vsel %vm443_vm1, %v524_v31, %v525_v51 }
  0x5c   : > { %1091 = vmatprep.mubr.msk.bf16.mxu0 %vm701_vm2, %v676_v32  ;;  %v528_v24 = vsel %vm443_vm1, %v525_v51, %v527_v59  ;;  %v634_v6 = vmax.f32 %v1399_v17, %v600_v9  ;;  %v635_v7 = vmax.f32 %v1401_v58, %v601_v37  ;;  %v620_v55 = vmax.f32 %v584_v19, %v1238_v39 }
  0x5d   : > { %1104 = vmatmul.mubr.msk.bf16.gmra.mxu1 %vm701_vm2, %v683_v62  ;;  %v602_v8 = vmax.f32 %v439_v0, %v526_v2  ;;  %v603_v3 = vmax.f32 %v440_v1, %v528_v24  ;;  %v621_v10 = vmax.f32 %v585_v20, %v1244_v44  ;;  %v366_v56 = vrot.slane %v223_v61, 1 }
  0x5e   : > { %v652_v12 = vmax.f32 %v620_v55, %v1246_v45  ;;  %v367_v13 = vrot.slane %v224_v23, 1  ;;  %v369_v14 = vrot.slane %v225_v5, 1  ;;  %v529_v15 = vrot.slane %v223_v61, 2 }
  0x5f   : > { %v666_v18 = vmax.f32 %v634_v6, %v602_v8  ;;  %v667_v40 = vmax.f32 %v635_v7, %v603_v3  ;;  %v653_v17 = vmax.f32 %v621_v10, %v1249_v47  ;;  %v530_v48 = vrot.slane %v224_v23, 2 }
  0x60   : > { %v368_v58 = vsel %vm280_vm0, %v366_v56, %v367_v13  ;;  %v370_v39 = vsel %vm280_vm0, %v367_v13, %v369_v14  ;;  %v532_v34 = vrot.slane %v225_v5, 2  ;;  %v636_v19 = vmax.f32 %v600_v9, %v602_v8 }
  0x61   : > { %v684_v21 = vpack.c.bf16 %v667_v40, %v666_v18  ;;  %v677_v44 = vpack.c.bf16 %v653_v17, %v652_v12  ;;  %v441_v20 = vmax.f32 %v223_v61, %v368_v58  ;;  %v442_v22 = vmax.f32 %v224_v23, %v370_v39 }
  0x62   : > { %v531_v45 = vsel %vm443_vm1, %v529_v15, %v530_v48  ;;  %v533_v41 = vsel %vm443_vm1, %v530_v48, %v532_v34  ;;  %v637_v25 = vmax.f32 %v601_v37, %v603_v3 }
  0x63   : > { %1107 = vmatprep.mubr.msk.bf16.mxu1 %vm701_vm2, %v684_v21  ;;  %1092 = vmatmul.mubr.msk.bf16.gmra.mxu0 %vm701_vm2, %v677_v44  ;;  %v604_v47 = vmax.f32 %v441_v20, %v531_v45  ;;  %v605_v26 = vmax.f32 %v442_v22, %v533_v41 }
  0x65   : > { %v668_v27 = vmax.f32 %v636_v19, %v604_v47  ;;  %v669_v60 = vmax.f32 %v637_v25, %v605_v26 }
  0x67   : > { %v685_v49 = vpack.c.bf16 %v669_v60, %v668_v27 }
  0x69   : > { %1108 = vmatmul.mubr.msk.bf16.gmra.mxu1 %vm701_vm2, %v685_v49 }
  0xf3   : > { %v1081_v29 = vpop.f32.mrf.mxu0 }
  0xf4   : > { %v793_v30 = vadd.f32 %v1081_v29, %v1459_v28 }
  0xf5   : > { %v784_v63 = vpop.f32.mrf.mxu0 }
  0xf6   : > { %v913_v33 = vmax.f32 %v793_v30, 0.0  ;;  %v785_v52 = vadd.f32 %v1459_v28, %v784_v63 }
  0xf7   : > { %v1097_v53 = vpop.f32.mrf.mxu1  ;;  %v1082_v4 = vpop.f32.mrf.mxu0 }
  0xf8   : > { %946 = vst.msk [vmem:[%s1466_s25 + $0x10] sm:$0xff] %vm943_vm3, %v913_v33  ;;  %v857_v35 = vadd.f32 %v1097_v53, %v1459_v28  ;;  %v911_v36 = vmax.f32 %v785_v52, 0.0  ;;  %v796_v9 = vadd.f32 %v1082_v4, %v1459_v28 }
  0xf9   : > { %v848_v37 = vpop.f32.mrf.mxu1  ;;  %v787_v11 = vpop.f32.mrf.mxu0 }
  0xfa   : > { %v929_v38 = vmax.f32 %v857_v35, 0.0  ;;  %944 = vst.msk [vmem:[%s1466_s25] sm:$0xff] %vm943_vm3, %v911_v36  ;;  %v849_v16 = vadd.f32 %v1459_v28, %v848_v37  ;;  %v914_v42 = vmax.f32 %v796_v9, 0.0  ;;  %v788_v43 = vadd.f32 %v1459_v28, %v787_v11 }
  0xfb   : > { %v1098_v46 = vpop.f32.mrf.mxu1 }
  0xfc   : > { %962 = vst.msk [vmem:[%s1466_s25 + $0x90] sm:$0xff] %vm943_vm3, %v929_v38  ;;  %v927_v50 = vmax.f32 %v849_v16, 0.0  ;;  %947 = vst.msk [vmem:[%s1466_s25 + $0x18] sm:$0xff] %vm943_vm3, %v914_v42  ;;  %v860_v31 = vadd.f32 %v1098_v46, %v1459_v28  ;;  %v912_v51 = vmax.f32 %v788_v43, 0.0 }
  0xfd   : > { %v851_v32 = vpop.f32.mrf.mxu1 }
  0xfe   : > { %960 = vst.msk [vmem:[%s1466_s25 + $0x80] sm:$0xff] %vm943_vm3, %v927_v50  ;;  %v930_v54 = vmax.f32 %v860_v31, 0.0  ;;  %945 = vst.msk [vmem:[%s1466_s25 + $0x8] sm:$0xff] %vm943_vm3, %v912_v51  ;;  %v852_v57 = vadd.f32 %v1459_v28, %v851_v32 }
 0x100   : > { %963 = vst.msk [vmem:[%s1466_s25 + $0x98] sm:$0xff] %vm943_vm3, %v930_v54  ;;  %v928_v59 = vmax.f32 %v852_v57, 0.0 }
 0x102   : > { %961 = vst.msk [vmem:[%s1466_s25 + $0x88] sm:$0xff] %vm943_vm3, %v928_v59 }
 0x105   : > { %v1085_v61 = vpop.f32.mrf.mxu0 }
 0x106   : > { %v809_v62 = vadd.f32 %v1085_v61, %v1459_v28 }
 0x107   : > { %v800_v0 = vpop.f32.mrf.mxu0 }
 0x108   : > { %v917_v1 = vmax.f32 %v809_v62, 0.0  ;;  %v801_v2 = vadd.f32 %v1459_v28, %v800_v0 }
 0x109   : > { %v1086_v23 = vpop.f32.mrf.mxu0 }
 0x10a   : > { %950 = vst.msk [vmem:[%s1466_s25 + $0x30] sm:$0xff] %vm943_vm3, %v917_v1  ;;  %v915_v5 = vmax.f32 %v801_v2, 0.0  ;;  %v812_v24 = vadd.f32 %v1086_v23, %v1459_v28 }
 0x10b   : > { %v1101_v6 = vpop.f32.mrf.mxu1  ;;  %v803_v7 = vpop.f32.mrf.mxu0 }
 0x10c   : > { %v873_v55 = vadd.f32 %v1101_v6, %v1459_v28  ;;  %948 = vst.msk [vmem:[%s1466_s25 + $0x20] sm:$0xff] %vm943_vm3, %v915_v5  ;;  %v918_v8 = vmax.f32 %v812_v24, 0.0  ;;  %v804_v3 = vadd.f32 %v1459_v28, %v803_v7 }
 0x10d   : > { %v864_v10 = vpop.f32.mrf.mxu1 }
 0x10e   : > { %v933_v56 = vmax.f32 %v873_v55, 0.0  ;;  %v865_v12 = vadd.f32 %v1459_v28, %v864_v10  ;;  %951 = vst.msk [vmem:[%s1466_s25 + $0x38] sm:$0xff] %vm943_vm3, %v918_v8  ;;  %v916_v13 = vmax.f32 %v804_v3, 0.0 }
 0x10f   : > { %v1102_v14 = vpop.f32.mrf.mxu1 }
 0x110   : > { %966 = vst.msk [vmem:[%s1466_s25 + $0xb0] sm:$0xff] %vm943_vm3, %v933_v56  ;;  %v931_v15 = vmax.f32 %v865_v12, 0.0  ;;  %v876_v18 = vadd.f32 %v1102_v14, %v1459_v28  ;;  %949 = vst.msk [vmem:[%s1466_s25 + $0x28] sm:$0xff] %vm943_vm3, %v916_v13 }
 0x111   : > { %v867_v40 = vpop.f32.mrf.mxu1 }
 0x112   : > { %964 = vst.msk [vmem:[%s1466_s25 + $0xa0] sm:$0xff] %vm943_vm3, %v931_v15  ;;  %v934_v17 = vmax.f32 %v876_v18, 0.0  ;;  %v868_v48 = vadd.f32 %v1459_v28, %v867_v40 }
 0x114   : > { %967 = vst.msk [vmem:[%s1466_s25 + $0xb8] sm:$0xff] %vm943_vm3, %v934_v17  ;;  %v932_v58 = vmax.f32 %v868_v48, 0.0 }
 0x116   : > { %965 = vst.msk [vmem:[%s1466_s25 + $0xa8] sm:$0xff] %vm943_vm3, %v932_v58 }
 0x119   : > { %v1089_v39 = vpop.f32.mrf.mxu0 }
 0x11a   : > { %v825_v34 = vadd.f32 %v1089_v39, %v1459_v28 }
 0x11b   : > { %v816_v19 = vpop.f32.mrf.mxu0 }
 0x11c   : > { %v921_v21 = vmax.f32 %v825_v34, 0.0  ;;  %v817_v44 = vadd.f32 %v1459_v28, %v816_v19 }
 0x11d   : > { %v1105_v20 = vpop.f32.mrf.mxu1  ;;  %v1090_v22 = vpop.f32.mrf.mxu0 }
 0x11e   : > { %954 = vst.msk [vmem:[%s1466_s25 + $0x50] sm:$0xff] %vm943_vm3, %v921_v21  ;;  %v889_v45 = vadd.f32 %v1105_v20, %v1459_v28  ;;  %v919_v41 = vmax.f32 %v817_v44, 0.0  ;;  %v828_v25 = vadd.f32 %v1090_v22, %v1459_v28 }
 0x11f   : > { %v880_v47 = vpop.f32.mrf.mxu1  ;;  %v819_v26 = vpop.f32.mrf.mxu0 }
 0x120   : > { %v937_v27 = vmax.f32 %v889_v45, 0.0  ;;  %952 = vst.msk [vmem:[%s1466_s25 + $0x40] sm:$0xff] %vm943_vm3, %v919_v41  ;;  %v881_v60 = vadd.f32 %v1459_v28, %v880_v47  ;;  %v922_v49 = vmax.f32 %v828_v25, 0.0  ;;  %v820_v29 = vadd.f32 %v1459_v28, %v819_v26 }
 0x121   : > { %v1106_v30 = vpop.f32.mrf.mxu1 }
 0x122   : > { %970 = vst.msk [vmem:[%s1466_s25 + $0xd0] sm:$0xff] %vm943_vm3, %v937_v27  ;;  %v935_v63 = vmax.f32 %v881_v60, 0.0  ;;  %955 = vst.msk [vmem:[%s1466_s25 + $0x58] sm:$0xff] %vm943_vm3, %v922_v49  ;;  %v892_v33 = vadd.f32 %v1106_v30, %v1459_v28  ;;  %v920_v52 = vmax.f32 %v820_v29, 0.0 }
 0x123   : > { %v883_v53 = vpop.f32.mrf.mxu1  ;;  %v1093_v4 = vpop.f32.mrf.mxu0 }
 0x124   : > { %968 = vst.msk [vmem:[%s1466_s25 + $0xc0] sm:$0xff] %vm943_vm3, %v935_v63  ;;  %v938_v35 = vmax.f32 %v892_v33, 0.0  ;;  %953 = vst.msk [vmem:[%s1466_s25 + $0x48] sm:$0xff] %vm943_vm3, %v920_v52  ;;  %v884_v36 = vadd.f32 %v1459_v28, %v883_v53  ;;  %v841_v9 = vadd.f32 %v1093_v4, %v1459_v28 }
 0x125   : > { %v832_v37 = vpop.f32.mrf.mxu0 }
 0x126   : > { %971 = vst.msk [vmem:[%s1466_s25 + $0xd8] sm:$0xff] %vm943_vm3, %v938_v35  ;;  %v936_v11 = vmax.f32 %v884_v36, 0.0  ;;  %v925_v38 = vmax.f32 %v841_v9, 0.0  ;;  %v833_v16 = vadd.f32 %v1459_v28, %v832_v37 }
 0x127   : > { %v1094_v42 = vpop.f32.mrf.mxu0 }
 0x128   : > { %969 = vst.msk [vmem:[%s1466_s25 + $0xc8] sm:$0xff] %vm943_vm3, %v936_v11  ;;  %958 = vst.msk [vmem:[%s1466_s25 + $0x70] sm:$0xff] %vm943_vm3, %v925_v38  ;;  %v923_v43 = vmax.f32 %v833_v16, 0.0  ;;  %v844_v46 = vadd.f32 %v1094_v42, %v1459_v28 }
 0x129   : > { %v1109_v50 = vpop.f32.mrf.mxu1  ;;  %v835_v31 = vpop.f32.mrf.mxu0 }
 0x12a   : > { %v905_v51 = vadd.f32 %v1109_v50, %v1459_v28  ;;  %956 = vst.msk [vmem:[%s1466_s25 + $0x60] sm:$0xff] %vm943_vm3, %v923_v43  ;;  %v926_v32 = vmax.f32 %v844_v46, 0.0  ;;  %v836_v54 = vadd.f32 %v1459_v28, %v835_v31 }
 0x12b   : > { %v896_v57 = vpop.f32.mrf.mxu1 }
 0x12c   : > { %v941_v59 = vmax.f32 %v905_v51, 0.0  ;;  %v897_v61 = vadd.f32 %v1459_v28, %v896_v57  ;;  %959 = vst.msk [vmem:[%s1466_s25 + $0x78] sm:$0xff] %vm943_vm3, %v926_v32  ;;  %v924_v62 = vmax.f32 %v836_v54, 0.0 }
 0x12d   : > { %v1110_v0 = vpop.f32.mrf.mxu1 }
 0x12e   : > { %974 = vst.msk [vmem:[%s1466_s25 + $0xf0] sm:$0xff] %vm943_vm3, %v941_v59  ;;  %v939_v1 = vmax.f32 %v897_v61, 0.0  ;;  %v908_v2 = vadd.f32 %v1110_v0, %v1459_v28  ;;  %957 = vst.msk [vmem:[%s1466_s25 + $0x68] sm:$0xff] %vm943_vm3, %v924_v62 }
 0x12f   : > { %v899_v23 = vpop.f32.mrf.mxu1 }
 0x130   : > { %972 = vst.msk [vmem:[%s1466_s25 + $0xe0] sm:$0xff] %vm943_vm3, %v939_v1  ;;  %v942_v5 = vmax.f32 %v908_v2, 0.0  ;;  %v900_v24 = vadd.f32 %v1459_v28, %v899_v23 }
 0x132   : > { %975 = vst.msk [vmem:[%s1466_s25 + $0xf8] sm:$0xff] %vm943_vm3, %v942_v5  ;;  %v940_v6 = vmax.f32 %v900_v24, 0.0 }
 0x134   : > { %973 = vst.msk [vmem:[%s1466_s25 + $0xe8] sm:$0xff] %vm943_vm3, %v940_v6 }
 0x135 PF: > { %s13_s12 = sadd.s32 1, %s1129_s12  }
 0x136   : > { %p10_p4 = scmp.ge.s32.totalorder %s13_s12, 4  }
 0x138   :  { %12 = sbr.rel (!%p10_p4) target bundleno = 1 (0x1), region = 62 }

// kernel: inception_forward.8
= control target key start
LH: loop header
LB: loop body
LE: loop exit
PB: predicated region body
PF: predicated region fallthrough
CT: control target
= control target key end

     0   :  { %s3378_s12 = smov 0   ;;  %s4771_s0 = inlined_call_operand.vmem [shape: f32[2,18,18,12], index: 0, kind: input, shape index: {}]   ;;  %s4772_s1 = inlined_call_operand.vmem [shape: bf16[9,12,12], index: 1, kind: input, shape index: {}]   ;;  %s4773_s2 = inlined_call_operand.vmem [shape: f32[1,12], index: 2, kind: input, shape index: {}]   ;;  %s4774_s3 = inlined_call_operand.vmem [shape: f32[2,16,16,12], index: 3, kind: output, shape index: {}]  }
   0x1 LB: > { %s2680_s13 = sadd.s32 4294967295, %s3356_s12   ;;  %p2684_p0 = scmp.ge.s32.totalorder %s3356_s12, 1  ;;  %s3356_s12 = sphi %s3378_s12, %s13_s12  }
   0x2   : > { %p137_p1 = scmp.lt.s32.totalorder %s3356_s12, 3 }
   0x4   : > { %p138_p2 = pnand %p2684_p0, %p137_p1 }
   0x6   : > { %141 = sbr.rel (%p138_p2) target bundleno = 516 (0x204), region = 32 }
   0xb   : > { %v3341_v0 = vld [vmem:[%s4772_s1 + $0x8] sm:$0x3f]   ;;  %vm478_vm0 = vcmask 1045504   ;;  %p161_p3 = scmp.lt.s32.totalorder %s2680_s13, 1  ;;  %v3342_v2 = vld [vmem:[%s4772_s1] sm:$0x3f]  }
   0xc   : > { %3323 = vmatprep.subr.msk.bf16.mxu1 %vm478_vm0, %v3341_v0  ;;  %3322 = vmatprep.subr.msk.bf16.mxu0 %vm478_vm0, %v3341_v0  ;;  %v480_v1 = vsel %vm478_vm0, %v3341_v0, 0  ;;  %v3343_v3 = vld [vmem:[%s4772_s1 + $0x10] sm:$0x3f]   ;;  %vm292_vm1 = vcmask 1046528   ;;  %vm429_vm2 = vcmask 97280   ;;  %v3444_v21 = vsel %vm478_vm0, %v3342_v2, 0 }
   0xd   : > { %3321 = vmatpush3.bf16.msra.mxu1 %v480_v1  ;;  %3015 = vmatpush3.bf16.msra.mxu0 %v480_v1  ;;  %s4942_s13 = smov (!%p161_p3, %s2680_s13), 1  ;;  %v1045_v32 = vsel %vm478_vm0, %v3343_v3, 0  ;;  %v3506_v53 = vld [vmem:[%s4772_s1 + $0x18] sm:$0x3f]   ;;  %v3511_v54 = vld [vmem:[%s4772_s1 + $0x20] sm:$0x3f]  }
   0xe   : > { %3324 = vmatprep.subr.msk.bf16.mxu1 %vm478_vm0, %v3342_v2  ;;  %s3332_s20 = smul.u32 432, %s4942_s13  ;;  %3325 = vmatprep.subr.msk.bf16.mxu0 %vm478_vm0, %v3343_v3  ;;  %s2860_s11 = sshll.u32 %s4942_s13, 8 }
   0xf   : > { %s4594_s15 = scalar_lea.vmem %s4774_s3, %s2860_s11 }
  0x10   : > { %s3406_s23 = scalar_lea.vmem %s4771_s0, %s3332_s20 }
  0x11   : > { %v3409_v4 = vld [vmem:[%s3406_s23] sm:$0xff]  ;;  %v3412_v5 = vld [vmem:[%s3406_s23 + $0x8] sm:$0xff]  ;;  %v3415_v6 = vld [vmem:[%s3406_s23 + $0x10] sm:$0x3] }
  0x12   : > { %v293_v7 = vrot.slane %v3409_v4, 1  ;;  %v294_v8 = vrot.slane %v3412_v5, 1  ;;  %v296_v9 = vrot.slane %v3415_v6, 1  ;;  %v3421_v10 = vld [vmem:[%s3406_s23 + $0xc0] sm:$0xff]  ;;  %v3424_v11 = vld [vmem:[%s3406_s23 + $0xc8] sm:$0xff]  ;;  %v3435_v18 = vld [vmem:[%s3406_s23 + $0x18] sm:$0xff] }
  0x13   : > { %v3427_v12 = vld [vmem:[%s3406_s23 + $0xd0] sm:$0x3]  ;;  %v333_v13 = vrot.slane %v3421_v10, 1  ;;  %v334_v14 = vrot.slane %v3424_v11, 1  ;;  %v3438_v19 = vld [vmem:[%s3406_s23 + $0x20] sm:$0xff]  ;;  %v298_v24 = vrot.slane %v3435_v18, 1 }
  0x14   : > { %v295_v15 = vsel %vm292_vm1, %v293_v7, %v294_v8  ;;  %v297_v16 = vsel %vm292_vm1, %v294_v8, %v296_v9  ;;  %v336_v17 = vrot.slane %v3427_v12, 1  ;;  %v3441_v20 = vld [vmem:[%s3406_s23 + $0x28] sm:$0x3]  ;;  %v299_v25 = vrot.slane %v3438_v19, 1  ;;  %v3450_v26 = vld [vmem:[%s3406_s23 + $0xd8] sm:$0xff]  ;;  %v3453_v27 = vld [vmem:[%s3406_s23 + $0xe0] sm:$0xff] }
  0x15   : > { %v405_v22 = vpack.c.bf16 %v297_v16, %v295_v15  ;;  %v335_v23 = vsel %vm292_vm1, %v333_v13, %v334_v14  ;;  %v3456_v28 = vld [vmem:[%s3406_s23 + $0xe8] sm:$0x3]  ;;  %v301_v31 = vrot.slane %v3441_v20, 1  ;;  %v3463_v33 = vld [vmem:[%s3406_s23 + $0x30] sm:$0xff]  ;;  %v3466_v34 = vld [vmem:[%s3406_s23 + $0x38] sm:$0xff]  ;;  %v338_v39 = vrot.slane %v3450_v26, 1 }
  0x16   : > { %4802 = vst [vmem:[#allocation2_spill] sm:$0xff] %v3456_v28  ;;  %v337_v30 = vsel %vm292_vm1, %v334_v14, %v336_v17  ;;  %v3469_v35 = vld [vmem:[%s3406_s23 + $0xf0] sm:$0xff]  ;;  %v300_v38 = vsel %vm292_vm1, %v298_v24, %v299_v25  ;;  %v3478_v40 = vld [vmem:[%s3406_s23 + $0x40] sm:$0x3]  ;;  %v3481_v41 = vld [vmem:[%s3406_s23 + $0xf8] sm:$0xff]  ;;  %v339_v43 = vrot.slane %v3453_v27, 1 }
  0x17   : > { %3016 = vmatprep.mubr.msk.bf16.mxu0 %vm429_vm2, %v405_v22  ;;  %v3473_v37 = vpack.c.bf16 %v337_v30, %v335_v23  ;;  %v302_v42 = vsel %vm292_vm1, %v299_v25, %v301_v31  ;;  %v341_v44 = vrot.slane %v3456_v28, 1  ;;  %v303_v45 = vrot.slane %v3463_v33, 1  ;;  %v3488_v46 = vld [vmem:[%s3406_s23 + $0x100] sm:$0x3]  ;;  %v3491_v47 = vld [vmem:[%s3406_s23 + $0x48] sm:$0xff]  ;;  %v3501_v52 = vld [vmem:[%s3406_s23 + $0x50] sm:$0xff] }
  0x18   : > { %4804 = vst [vmem:[#allocation4_spill] sm:$0xff] %v3488_v46  ;;  %v3495_v48 = vpack.c.bf16 %v302_v42, %v300_v38  ;;  %v304_v49 = vrot.slane %v3466_v34, 1  ;;  %v306_v50 = vrot.slane %v3478_v40, 1  ;;  %v343_v51 = vrot.slane %v3469_v35, 1  ;;  %v3518_v59 = vld [vmem:[%s3406_s23 + $0x58] sm:$0x3] }
  0x19   : > { %4803 = vst [vmem:[#allocation3_spill] sm:$0xff] %v3473_v37  ;;  %3032 = vmatprep.mubr.msk.bf16.mxu1 %vm429_vm2, %v3473_v37  ;;  %v340_v55 = vsel %vm292_vm1, %v338_v39, %v339_v43  ;;  %v342_v56 = vsel %vm292_vm1, %v339_v43, %v341_v44  ;;  %v344_v57 = vrot.slane %v3481_v41, 1  ;;  %v346_v58 = vrot.slane %v3488_v46, 1  ;;  %v3521_v60 = vld [vmem:[%s3406_s23 + $0x108] sm:$0xff]  ;;  %v3524_v61 = vld [vmem:[%s3406_s23 + $0x110] sm:$0xff]  ;;  %v3537_v3 = vld [vmem:[%s3406_s23 + $0x60] sm:$0xff] }
  0x1a   : > { %4805 = vst [vmem:[#allocation5_spill] sm:$0xff] %v3495_v48  ;;  %3017 = vmatmul.mubr.msk.bf16.vlgmr.msra.gmra.mxu0 %vm429_vm2, %v3495_v48  ;;  %v3528_v62 = vpack.c.bf16 %v342_v56, %v340_v55  ;;  %v305_v63 = vsel %vm292_vm1, %v303_v45, %v304_v49  ;;  %v307_v0 = vsel %vm292_vm1, %v304_v49, %v306_v50  ;;  %v308_v1 = vrot.slane %v3491_v47, 1  ;;  %v3534_v2 = vld [vmem:[%s3406_s23 + $0x118] sm:$0x3]  ;;  %v3540_v7 = vld [vmem:[%s3406_s23 + $0x68] sm:$0xff]  ;;  %v3551_v16 = vld [vmem:[%s3406_s23 + $0x120] sm:$0xff] }
  0x1b   : > { %4807 = vst [vmem:[#allocation7_spill] sm:$0xff] %v3534_v2  ;;  %3083 = vmatpush3.bf16.msra.mxu0 %v1045_v32  ;;  %v3542_v8 = vpack.c.bf16 %v307_v0, %v305_v63  ;;  %v345_v9 = vsel %vm292_vm1, %v343_v51, %v344_v57  ;;  %v347_v13 = vsel %vm292_vm1, %v344_v57, %v346_v58  ;;  %v309_v14 = vrot.slane %v3501_v52, 1  ;;  %v3548_v15 = vld [vmem:[%s3406_s23 + $0x70] sm:$0x3]  ;;  %v3561_v25 = vld [vmem:[%s3406_s23 + $0x128] sm:$0xff]  ;;  %v3576_v42 = vld [vmem:[%s3406_s23 + $0x78] sm:$0xff] }
  0x1c   : > { %4806 = vst [vmem:[#allocation6_spill] sm:$0xff] %v3528_v62  ;;  %3033 = vmatmul.mubr.msk.bf16.vlgmr.msra.gmra.mxu1 %vm429_vm2, %v3528_v62  ;;  %v3555_v17 = vpack.c.bf16 %v347_v13, %v345_v9  ;;  %v311_v22 = vrot.slane %v3518_v59, 1  ;;  %v348_v23 = vrot.slane %v3521_v60, 1  ;;  %v349_v24 = vrot.slane %v3524_v61, 1  ;;  %3327 = vmatprep.subr.msk.bf16.mxu0 %vm478_vm0, %v3511_v54  ;;  %v3573_v39 = vld [vmem:[%s3406_s23 + $0x130] sm:$0x3] }
  0x1d   : > { %4808 = vst [vmem:[#allocation8_spill] sm:$0xff] %v3542_v8  ;;  %3049 = vmatpush3.bf16.msra.mxu1 %v3444_v21  ;;  %3020 = vmatprep.mubr.msk.bf16.mxu0 %vm429_vm2, %v3542_v8  ;;  %v310_v30 = vsel %vm292_vm1, %v308_v1, %v309_v14  ;;  %v351_v31 = vrot.slane %v3534_v2, 1  ;;  %v313_v32 = vrot.slane %v3537_v3, 1  ;;  %v314_v38 = vrot.slane %v3540_v7, 1  ;;  %4810 = vst [vmem:[#allocation10_spill] sm:$0xff] %v3573_v39  ;;  %v3585_v49 = vld [vmem:[%s3406_s23 + $0x80] sm:$0xff] }
  0x1e   : > { %4809 = vst [vmem:[#allocation9_spill] sm:$0xff] %v3555_v17  ;;  %3036 = vmatprep.mubr.msk.bf16.mxu1 %vm429_vm2, %v3555_v17  ;;  %v312_v21 = vsel %vm292_vm1, %v309_v14, %v311_v22  ;;  %v350_v43 = vsel %vm292_vm1, %v348_v23, %v349_v24  ;;  %v316_v44 = vrot.slane %v3548_v15, 1  ;;  %v353_v45 = vrot.slane %v3551_v16, 1  ;;  %v3588_v50 = vld [vmem:[%s3406_s23 + $0x88] sm:$0x3]  ;;  %3326 = vmatprep.subr.msk.bf16.mxu1 %vm478_vm0, %v3506_v53  ;;  %v3598_v58 = vld [vmem:[%s3406_s23 + $0x138] sm:$0xff] }
  0x1f   : > { %v3592_v51 = vpack.c.bf16 %v312_v21, %v310_v30  ;;  %v352_v55 = vsel %vm292_vm1, %v349_v24, %v351_v31  ;;  %v315_v56 = vsel %vm292_vm1, %v313_v32, %v314_v38  ;;  %v354_v57 = vrot.slane %v3561_v25, 1  ;;  %v3601_v63 = vld [vmem:[%s3406_s23 + $0x140] sm:$0xff]  ;;  %v3604_v0 = vld [vmem:[%s3406_s23 + $0x148] sm:$0x3]  ;;  %v3612_v22 = vld [vmem:[%s3406_s23 + $0x90] sm:$0xff] }
  0x20   : > { %4812 = vst [vmem:[#allocation12_spill] sm:$0xff] %v3604_v0  ;;  %v3606_v1 = vpack.c.bf16 %v352_v55, %v350_v43  ;;  %v317_v9 = vsel %vm292_vm1, %v314_v38, %v316_v44  ;;  %v356_v13 = vrot.slane %v3573_v39, 1  ;;  %v318_v14 = vrot.slane %v3576_v42, 1  ;;  %v3615_v23 = vld [vmem:[%s3406_s23 + $0x98] sm:$0xff]  ;;  %v3618_v24 = vld [vmem:[%s3406_s23 + $0x150] sm:$0xff] }
  0x21   : > { %4811 = vst [vmem:[#allocation11_spill] sm:$0xff] %v3592_v51  ;;  %v3620_v30 = vpack.c.bf16 %v317_v9, %v315_v56  ;;  %v355_v31 = vsel %vm292_vm1, %v353_v45, %v354_v57  ;;  %v319_v32 = vrot.slane %v3585_v49, 1  ;;  %v321_v38 = vrot.slane %v3588_v50, 1  ;;  %v3626_v21 = vld [vmem:[%s3406_s23 + $0xa0] sm:$0x3]  ;;  %v3638_v9 = vld [vmem:[%s3406_s23 + $0x158] sm:$0xff] }
  0x22   : > { %4813 = vst [vmem:[#allocation13_spill] sm:$0xff] %v3606_v1  ;;  %v3629_v43 = vld [vmem:[%s3406_s23 + $0x160] sm:$0x3]  ;;  %3021 = vmatmul.mubr.msk.bf16.gmra.mxu0 %vm429_vm2, %v3592_v51  ;;  %v357_v44 = vsel %vm292_vm1, %v354_v57, %v356_v13  ;;  %v358_v55 = vrot.slane %v3598_v58, 1  ;;  %v359_v45 = vrot.slane %v3601_v63, 1  ;;  %v361_v56 = vrot.slane %v3604_v0, 1 }
  0x23   : > { %4814 = vst [vmem:[#allocation14_spill] sm:$0xff] %v3620_v30  ;;  %4815 = vst [vmem:[#allocation15_spill] sm:$0xff] %v3629_v43  ;;  %3024 = vmatprep.mubr.msk.bf16.mxu0 %vm429_vm2, %v3620_v30  ;;  %v3642_v29 = vpack.c.bf16 %v357_v44, %v355_v31  ;;  %v320_v36 = vsel %vm292_vm1, %v318_v14, %v319_v32  ;;  %v322_v17 = vsel %vm292_vm1, %v319_v32, %v321_v38  ;;  %v3648_v13 = vld [vmem:[%s3406_s23 + $0xa8] sm:$0xff]  ;;  %v3651_v62 = vld [vmem:[%s3406_s23 + $0xb0] sm:$0xff] }
  0x24   : > { %v323_v57 = vrot.slane %v3612_v22, 1  ;;  %3037 = vmatmul.mubr.msk.bf16.gmra.mxu1 %vm429_vm2, %v3606_v1  ;;  %v360_v37 = vsel %vm292_vm1, %v358_v55, %v359_v45  ;;  %v324_v31 = vrot.slane %v3615_v23, 1  ;;  %v3658_v44 = vld [vmem:[%s3406_s23 + $0xb8] sm:$0x3]  ;;  %v3661_v30 = vld [vmem:[%s3406_s23 + $0x168] sm:$0xff]  ;;  %v362_v14 = vsel %vm292_vm1, %v359_v45, %v361_v56  ;;  %v3670_v1 = vld [vmem:[%s3406_s23 + $0x170] sm:$0xff] }
  0x25   : > { %4816 = vst [vmem:[#allocation16_spill] sm:$0xff] %v3642_v29  ;;  %3040 = vmatprep.mubr.msk.bf16.mxu1 %vm429_vm2, %v3642_v29  ;;  %v326_v32 = vrot.slane %v3626_v21, 1  ;;  %v363_v38 = vrot.slane %v3618_v24, 1  ;;  %v364_v51 = vrot.slane %v3638_v9, 1  ;;  %v3672_v55 = vpack.c.bf16 %v322_v17, %v320_v36  ;;  %v3678_v39 = vld [vmem:[%s3406_s23 + $0x178] sm:$0x3] }
  0x26   : > { %v325_v8 = vsel %vm292_vm1, %v323_v57, %v324_v31  ;;  %v366_v48 = vrot.slane %v3629_v43, 1  ;;  %v328_v0 = vrot.slane %v3648_v13, 1  ;;  %v329_v29 = vrot.slane %v3651_v62, 1 }
  0x27   : > { %v327_v45 = vsel %vm292_vm1, %v324_v31, %v326_v32  ;;  %v365_v56 = vsel %vm292_vm1, %v363_v38, %v364_v51  ;;  %v331_v2 = vrot.slane %v3658_v44, 1  ;;  %v863_v46 = vrot.slane %v3415_v6, 2 }
  0x28   : > { %v3685_v36 = vpack.c.bf16 %v362_v14, %v360_v37  ;;  %v3687_v17 = vpack.c.bf16 %v327_v45, %v325_v8  ;;  %v367_v57 = vsel %vm292_vm1, %v364_v51, %v366_v48  ;;  %v368_v28 = vrot.slane %v3661_v30, 1 }
  0x29   : > { %v3690_v43 = vpack.c.bf16 %v367_v57, %v365_v56  ;;  %v369_v31 = vrot.slane %v3670_v1, 1  ;;  %v371_v32 = vrot.slane %v3678_v39, 1  ;;  %v330_v6 = vsel %vm292_vm1, %v328_v0, %v329_v29 }
  0x2a   : > { %3025 = vmatmul.mubr.msk.bf16.gmra.mxu0 %vm429_vm2, %v3672_v55  ;;  %v332_v37 = vsel %vm292_vm1, %v329_v29, %v331_v2  ;;  %v4818_v48 = vrot.slane %v3412_v5, 2  ;;  %v4819_v8 = vrot.slane %v3409_v4, 2  ;;  %v865_v45 = vrot.slane %v3435_v18, 2 }
  0x2b   : > { %4817 = vst [vmem:[#allocation17_spill] sm:$0xff] %v3690_v43  ;;  %3028 = vmatprep.mubr.msk.bf16.mxu0 %vm429_vm2, %v3687_v17  ;;  %v370_v0 = vsel %vm292_vm1, %v368_v28, %v369_v31  ;;  %v372_v29 = vsel %vm292_vm1, %v369_v31, %v371_v32  ;;  %v3715_v2 = vpack.c.bf16 %v332_v37, %v330_v6  ;;  %v866_v56 = vrot.slane %v3438_v19, 2 }
  0x2c   : > { %3041 = vmatmul.mubr.msk.bf16.gmra.mxu1 %vm429_vm2, %v3685_v36  ;;  %v862_v51 = vsel %vm478_vm0, %v4819_v8, %v4818_v48  ;;  %v4820_v14 = vmov %v4818_v48  ;;  %v868_v57 = vrot.slane %v3441_v20, 2  ;;  %v3720_v8 = vpack.c.bf16 %v372_v29, %v370_v0 }
  0x2d   : > { %v864_v38 = vsel %vm478_vm0, %v4820_v14, %v863_v46  ;;  %3044 = vmatprep.mubr.msk.bf16.mxu1 %vm429_vm2, %v3690_v43  ;;  %v870_v46 = vrot.slane %v3463_v33, 2  ;;  %v871_v14 = vrot.slane %v3466_v34, 2  ;;  %v873_v43 = vrot.slane %v3478_v40, 2 }
  0x2e   : > { %v972_v48 = vpack.c.bf16 %v864_v38, %v862_v51  ;;  %4821 = vst [vmem:[#allocation18_spill] sm:$0xff] %v3720_v8  ;;  %v226_v28 = vpack.c.bf16 %v3412_v5, %v3409_v4  ;;  %v867_v31 = vsel %vm478_vm0, %v865_v45, %v866_v56  ;;  %v869_v20 = vsel %vm478_vm0, %v866_v56, %v868_v57  ;;  %v3764_v56 = vld [vmem:[%s4772_s1 + $0x30] sm:$0x3f]  }
  0x2f   : > { %v872_v32 = vsel %vm478_vm0, %v870_v46, %v871_v14  ;;  %v874_v6 = vsel %vm478_vm0, %v871_v14, %v873_v43  ;;  %v3739_v4 = vpack.c.bf16 %v3438_v19, %v3435_v18  ;;  %v3741_v5 = vpack.c.bf16 %v869_v20, %v867_v31 }
  0x30   : > { %v875_v40 = vrot.slane %v3491_v47, 2  ;;  %v3746_v37 = vpack.c.bf16 %v3424_v11, %v3421_v10  ;;  %v3748_v51 = vpack.c.bf16 %v874_v6, %v872_v32  ;;  %v876_v38 = vrot.slane %v3501_v52, 2 }
  0x31   : > { %v878_v43 = vrot.slane %v3518_v59, 2  ;;  %v3754_v0 = vpack.c.bf16 %v3453_v27, %v3450_v26  ;;  %v1471_v18 = vsel %vm478_vm0, %v3511_v54, 0  ;;  %v880_v19 = vrot.slane %v3537_v3, 2 }
  0x32   : > { %3029 = vmatmul.mubr.msk.bf16.gmra.mxu0 %vm429_vm2, %v3715_v2  ;;  %v881_v29 = vrot.slane %v3540_v7, 2  ;;  %v883_v45 = vrot.slane %v3548_v15, 2  ;;  %v3768_v59 = vpack.c.bf16 %v3466_v34, %v3463_v33  ;;  %v3772_v57 = vpack.c.bf16 %v3481_v41, %v3469_v35  ;;  %v3781_v15 = vld [vmem:[%s4772_s1 + $0x28] sm:$0x3f]  }
  0x33   : > { %3084 = vmatprep.mubr.msk.bf16.mxu0 %vm429_vm2, %v972_v48  ;;  %v1253_v54 = vsel %vm478_vm0, %v3506_v53, 0  ;;  %v877_v33 = vsel %vm478_vm0, %v875_v40, %v876_v38  ;;  %v879_v34 = vsel %vm478_vm0, %v876_v38, %v878_v43  ;;  %v3789_v48 = vpack.c.bf16 %v3524_v61, %v3521_v60 }
  0x34   : > { %3045 = vmatmul.mubr.msk.bf16.gmra.mxu1 %vm429_vm2, %v3720_v8  ;;  %v882_v53 = vsel %vm478_vm0, %v880_v19, %v881_v29  ;;  %v884_v46 = vsel %vm478_vm0, %v881_v29, %v883_v45  ;;  %v3797_v14 = vpack.c.bf16 %v3561_v25, %v3551_v16  ;;  %v3807_v31 = vpack.c.bf16 %v879_v34, %v877_v33 }
  0x35   : > { %3050 = vmatprep.mubr.msk.bf16.mxu1 %vm429_vm2, %v226_v28  ;;  %v3805_v28 = vpack.c.bf16 %v3501_v52, %v3491_v47  ;;  %v885_v20 = vrot.slane %v3576_v42, 2  ;;  %v3812_v32 = vpack.c.bf16 %v884_v46, %v882_v53  ;;  %v886_v6 = vrot.slane %v3585_v49, 2 }
  0x36   : > { %v888_v40 = vrot.slane %v3588_v50, 2  ;;  %v3818_v38 = vpack.c.bf16 %v3601_v63, %v3598_v58  ;;  %v890_v47 = vrot.slane %v3612_v22, 2  ;;  %v891_v52 = vrot.slane %v3615_v23, 2 }
  0x37   : > { %v893_v43 = vrot.slane %v3626_v21, 2  ;;  %v3829_v19 = vpack.c.bf16 %v3540_v7, %v3537_v3  ;;  %v3835_v50 = vpack.c.bf16 %v3670_v1, %v3661_v30  ;;  %v887_v21 = vsel %vm478_vm0, %v885_v20, %v886_v6 }
  0x38   : > { %v889_v29 = vsel %vm478_vm0, %v886_v6, %v888_v40  ;;  %v892_v3 = vsel %vm478_vm0, %v890_v47, %v891_v52  ;;  %v895_v33 = vrot.slane %v3648_v13, 2  ;;  %v896_v34 = vrot.slane %v3651_v62, 2 }
  0x39   : > { %v894_v7 = vsel %vm478_vm0, %v891_v52, %v893_v43  ;;  %v3847_v45 = vpack.c.bf16 %v889_v29, %v887_v21  ;;  %v898_v53 = vrot.slane %v3658_v44, 2  ;;  %v903_v46 = vrot.slane %v3427_v12, 2  ;;  %v4822_v52 = vld [vmem:[#allocation2_spill] sm:$0xff] }
  0x3a   : > { %3085 = vmatmul.mubr.msk.bf16.vlgmr.msra.gmra.mxu0 %vm429_vm2, %v3741_v5  ;;  %v3857_v20 = vpack.c.bf16 %v3585_v49, %v3576_v42  ;;  %v900_v6 = vrot.slane %v3421_v10, 2  ;;  %v901_v40 = vrot.slane %v3424_v11, 2  ;;  %v3863_v47 = vpack.c.bf16 %v3615_v23, %v3612_v22 }
  0x3b   : > { %3151 = vmatpush3.bf16.msra.mxu0 %v1471_v18  ;;  %3088 = vmatprep.mubr.msk.bf16.mxu0 %vm429_vm2, %v3748_v51  ;;  %v3825_v18 = vpack.c.bf16 %v3638_v9, %v3618_v24  ;;  %v897_v12 = vsel %vm478_vm0, %v895_v33, %v896_v34  ;;  %v899_v44 = vsel %vm478_vm0, %v896_v34, %v898_v53  ;;  %v905_v22 = vrot.slane %v3450_v26, 2 }
  0x3c   : > { %3051 = vmatmul.mubr.msk.bf16.vlgmr.msra.gmra.mxu1 %vm429_vm2, %v3739_v4  ;;  %3329 = vmatprep.subr.msk.bf16.mxu0 %vm478_vm0, %v3764_v56  ;;  %v902_v10 = vsel %vm478_vm0, %v900_v6, %v901_v40  ;;  %v904_v11 = vsel %vm478_vm0, %v901_v40, %v903_v46  ;;  %v3877_v42 = vpack.c.bf16 %v899_v44, %v897_v12  ;;  %v906_v23 = vrot.slane %v3453_v27, 2  ;;  %v4824_v46 = vld [vmem:[#allocation7_spill] sm:$0xff]  ;;  %v4825_v44 = vld [vmem:[#allocation10_spill] sm:$0xff] }
  0x3d   : > { %3117 = vmatpush3.bf16.msra.mxu1 %v1253_v54  ;;  %3054 = vmatprep.mubr.msk.bf16.mxu1 %vm429_vm2, %v3768_v59  ;;  %v3849_v54 = vpack.c.bf16 %v894_v7, %v892_v3  ;;  %v3879_v49 = vpack.c.bf16 %v904_v11, %v902_v10  ;;  %v908_v43 = vrot.slane %v4822_v52, 2  ;;  %v3886_v21 = vpack.c.bf16 %v3651_v62, %v3648_v13  ;;  %v4823_v7 = vld [vmem:[#allocation4_spill] sm:$0xff] }
  0x3e   : > { %3328 = vmatprep.subr.msk.bf16.mxu1 %vm478_vm0, %v3781_v15  ;;  %v910_v29 = vrot.slane %v3469_v35, 2  ;;  %v911_v3 = vrot.slane %v3481_v41, 2  ;;  %v913_v33 = vrot.slane %v4823_v7, 2  ;;  %v907_v26 = vsel %vm478_vm0, %v905_v22, %v906_v23 }
  0x3f   : > { %v909_v27 = vsel %vm478_vm0, %v906_v23, %v908_v43  ;;  %v915_v34 = vrot.slane %v3521_v60, 2  ;;  %v916_v53 = vrot.slane %v3524_v61, 2  ;;  %v918_v6 = vrot.slane %v4824_v46, 2  ;;  %v4826_v43 = vld [vmem:[#allocation12_spill] sm:$0xff] }
  0x40   : > { %v912_v62 = vsel %vm478_vm0, %v910_v29, %v911_v3  ;;  %v914_v35 = vsel %vm478_vm0, %v911_v3, %v913_v33  ;;  %v3903_v41 = vpack.c.bf16 %v909_v27, %v907_v26  ;;  %v920_v40 = vrot.slane %v3551_v16, 2  ;;  %v4827_v33 = vld [vmem:[#allocation15_spill] sm:$0xff] }
  0x41   : > { %v3905_v13 = vpack.c.bf16 %v914_v35, %v912_v62  ;;  %v921_v12 = vrot.slane %v3561_v25, 2  ;;  %v923_v10 = vrot.slane %v4825_v44, 2  ;;  %v917_v11 = vsel %vm478_vm0, %v915_v34, %v916_v53  ;;  %v222_v44 = vld [vmem:[%s3406_s23 + $0x190] sm:$0x3] }
  0x42   : > { %3089 = vmatmul.mubr.msk.bf16.gmra.mxu0 %vm429_vm2, %v3807_v31  ;;  %v919_v60 = vsel %vm478_vm0, %v916_v53, %v918_v6  ;;  %v925_v23 = vrot.slane %v3598_v58, 2  ;;  %v926_v52 = vrot.slane %v3601_v63, 2  ;;  %v928_v29 = vrot.slane %v4826_v43, 2  ;;  %v4829_v43 = vld [vmem:[#allocation8_spill] sm:$0xff] }
  0x43   : > { %3092 = vmatprep.mubr.msk.bf16.mxu0 %vm429_vm2, %v3812_v32  ;;  %v922_v61 = vsel %vm478_vm0, %v920_v40, %v921_v12  ;;  %v924_v16 = vsel %vm478_vm0, %v921_v12, %v923_v10  ;;  %v3925_v25 = vpack.c.bf16 %v919_v60, %v917_v11  ;;  %v930_v3 = vrot.slane %v3618_v24, 2  ;;  %v220_v40 = vld [vmem:[%s3406_s23 + $0x180] sm:$0xff]  ;;  %v221_v12 = vld [vmem:[%s3406_s23 + $0x188] sm:$0xff] }
  0x44   : > { %3055 = vmatmul.mubr.msk.bf16.gmra.mxu1 %vm429_vm2, %v3805_v28  ;;  %v3927_v22 = vpack.c.bf16 %v924_v16, %v922_v61  ;;  %v931_v7 = vrot.slane %v3638_v9, 2  ;;  %v933_v26 = vrot.slane %v4827_v33, 2  ;;  %v927_v27 = vsel %vm478_vm0, %v925_v23, %v926_v52  ;;  %v4828_v16 = vld [vmem:[#allocation5_spill] sm:$0xff] }
  0x45   : > { %3058 = vmatprep.mubr.msk.bf16.mxu1 %vm429_vm2, %v3829_v19  ;;  %v929_v58 = vsel %vm478_vm0, %v926_v52, %v928_v29  ;;  %v935_v35 = vrot.slane %v3661_v30, 2  ;;  %v936_v34 = vrot.slane %v3670_v1, 2  ;;  %v938_v53 = vrot.slane %v3678_v39, 2  ;;  %v3349_v52 = vld [vmem:[%s4772_s1 + $0x40] sm:$0x3f]   ;;  %v4834_v33 = vld [vmem:[#allocation9_spill] sm:$0xff] }
  0x46   : > { %v932_v63 = vsel %vm478_vm0, %v930_v3, %v931_v7  ;;  %v934_v24 = vsel %vm478_vm0, %v931_v7, %v933_v26  ;;  %v3947_v9 = vpack.c.bf16 %v929_v58, %v927_v27  ;;  %v1666_v1 = vrot.slane %v220_v40, 2  ;;  %v3348_v3 = vld [vmem:[%s4772_s1 + $0x38] sm:$0x3f]   ;;  %v4830_v7 = vld [vmem:[#allocation11_spill] sm:$0xff]  ;;  %v4836_v27 = vld [vmem:[#allocation16_spill] sm:$0xff] }
  0x47   : > { %v3949_v62 = vpack.c.bf16 %v934_v24, %v932_v63  ;;  %v937_v46 = vsel %vm478_vm0, %v935_v35, %v936_v34  ;;  %v939_v6 = vsel %vm478_vm0, %v936_v34, %v938_v53  ;;  %v1667_v39 = vrot.slane %v221_v12, 2  ;;  %v4835_v26 = vld [vmem:[#allocation13_spill] sm:$0xff] }
  0x48   : > { %v3966_v30 = vpack.c.bf16 %v939_v6, %v937_v46  ;;  %v1669_v10 = vrot.slane %v222_v44, 2  ;;  %v1894_v23 = vsel %vm478_vm0, %v3764_v56, 0  ;;  %v1686_v29 = vsel %vm478_vm0, %v3781_v15, 0  ;;  %v4832_v56 = vld [vmem:[#allocation3_spill] sm:$0xff]  ;;  %v4833_v15 = vld [vmem:[#allocation6_spill] sm:$0xff]  ;;  %v4837_v35 = vld [vmem:[#allocation17_spill] sm:$0xff] }
  0x49   : > { %v1668_v11 = vsel %vm478_vm0, %v1666_v1, %v1667_v39  ;;  %v1451_v58 = vrot.slane %v220_v40, 1  ;;  %v1452_v63 = vrot.slane %v221_v12, 1  ;;  %v1454_v24 = vrot.slane %v222_v44, 1 }
  0x4a   : > { %3093 = vmatmul.mubr.msk.bf16.gmra.mxu0 %vm429_vm2, %v3847_v45  ;;  %v1670_v60 = vsel %vm478_vm0, %v1667_v39, %v1669_v10  ;;  %v1240_v6 = vpack.c.bf16 %v221_v12, %v220_v40  ;;  %v2327_v1 = vsel %vm478_vm0, %v3349_v52, 0  ;;  %v2112_v39 = vsel %vm478_vm0, %v3348_v3, 0  ;;  %v4140_v10 = vld [vmem:[%s3406_s23 + $0x198] sm:$0xff] }
  0x4b   : > { %3096 = vmatprep.mubr.msk.bf16.mxu0 %vm429_vm2, %v3849_v54  ;;  %v3973_v61 = vpack.c.bf16 %v1670_v60, %v1668_v11  ;;  %v1453_v34 = vsel %vm292_vm1, %v1451_v58, %v1452_v63  ;;  %v1455_v53 = vsel %vm292_vm1, %v1452_v63, %v1454_v24  ;;  %v4143_v11 = vld [vmem:[%s3406_s23 + $0x1a0] sm:$0xff] }
  0x4c   : > { %3059 = vmatmul.mubr.msk.bf16.gmra.mxu1 %vm429_vm2, %v3857_v20  ;;  %v4051_v46 = vpack.c.bf16 %v1455_v53, %v1453_v34 }
  0x4d   : > { %3062 = vmatprep.mubr.msk.bf16.mxu1 %vm429_vm2, %v3863_v47 }
  0x4e   : > { %4838 = vst [vmem:[#allocation2_spill] sm:$0xff] %v4051_v46 }
  0x52   : > { %3097 = vmatmul.mubr.msk.bf16.gmra.mxu0 %vm429_vm2, %v3877_v42 }
  0x53   : > { %3100 = vmatprep.mubr.msk.bf16.mxu0 %vm429_vm2, %v3879_v49 }
  0x54   : > { %3063 = vmatmul.mubr.msk.bf16.gmra.mxu1 %vm429_vm2, %v3886_v21 }
  0x55   : > { %3066 = vmatprep.mubr.msk.bf16.mxu1 %vm429_vm2, %v3746_v37 }
  0x5a   : > { %3101 = vmatmul.mubr.msk.bf16.gmra.mxu0 %vm429_vm2, %v3903_v41 }
  0x5b   : > { %3104 = vmatprep.mubr.msk.bf16.mxu0 %vm429_vm2, %v3905_v13 }
  0x5c   : > { %3067 = vmatmul.mubr.msk.bf16.gmra.mxu1 %vm429_vm2, %v3754_v0 }
  0x5d   : > { %3070 = vmatprep.mubr.msk.bf16.mxu1 %vm429_vm2, %v3772_v57 }
  0x62   : > { %3105 = vmatmul.mubr.msk.bf16.gmra.mxu0 %vm429_vm2, %v3925_v25 }
  0x63   : > { %3108 = vmatprep.mubr.msk.bf16.mxu0 %vm429_vm2, %v3927_v22 }
  0x64   : > { %3071 = vmatmul.mubr.msk.bf16.gmra.mxu1 %vm429_vm2, %v3789_v48 }
  0x65   : > { %3074 = vmatprep.mubr.msk.bf16.mxu1 %vm429_vm2, %v3797_v14 }
  0x6a   : > { %3109 = vmatmul.mubr.msk.bf16.gmra.mxu0 %vm429_vm2, %v3947_v9 }
  0x6b   : > { %3112 = vmatprep.mubr.msk.bf16.mxu0 %vm429_vm2, %v3949_v62 }
  0x6c   : > { %3075 = vmatmul.mubr.msk.bf16.gmra.mxu1 %vm429_vm2, %v3818_v38 }
  0x6d   : > { %3078 = vmatprep.mubr.msk.bf16.mxu1 %vm429_vm2, %v3825_v18 }
  0x72   : > { %3113 = vmatmul.mubr.msk.bf16.gmra.mxu0 %vm429_vm2, %v3966_v30 }
  0x73   : > { %3152 = vmatprep.mubr.msk.bf16.mxu0 %vm429_vm2, %v4828_v16 }
  0x74   : > { %3079 = vmatmul.mubr.msk.bf16.gmra.mxu1 %vm429_vm2, %v3835_v50 }
  0x75   : > { %3118 = vmatprep.mubr.msk.bf16.mxu1 %vm429_vm2, %v3739_v4  ;;  %v4831_v4 = vld [vmem:[#allocation14_spill] sm:$0xff] }
  0x7a   : > { %3153 = vmatmul.mubr.msk.bf16.vlgmr.msra.gmra.mxu0 %vm429_vm2, %v4829_v43 }
  0x7b   : > { %3219 = vmatpush3.bf16.msra.mxu0 %v1894_v23  ;;  %3156 = vmatprep.mubr.msk.bf16.mxu0 %vm429_vm2, %v4830_v7 }
  0x7c   : > { %3119 = vmatmul.mubr.msk.bf16.vlgmr.msra.gmra.mxu1 %vm429_vm2, %v3768_v59  ;;  %3331 = vmatprep.subr.msk.bf16.mxu0 %vm478_vm0, %v3349_v52 }
  0x7d   : > { %3185 = vmatpush3.bf16.msra.mxu1 %v1686_v29  ;;  %3122 = vmatprep.mubr.msk.bf16.mxu1 %vm429_vm2, %v3805_v28 }
  0x7e   : > { %3330 = vmatprep.subr.msk.bf16.mxu1 %vm478_vm0, %v3348_v3 }
  0x82   : > { %3157 = vmatmul.mubr.msk.bf16.gmra.mxu0 %vm429_vm2, %v4831_v4 }
  0x83   : > { %3160 = vmatprep.mubr.msk.bf16.mxu0 %vm429_vm2, %v3672_v55 }
  0x84   : > { %3123 = vmatmul.mubr.msk.bf16.gmra.mxu1 %vm429_vm2, %v3829_v19 }
  0x85   : > { %3126 = vmatprep.mubr.msk.bf16.mxu1 %vm429_vm2, %v3857_v20 }
  0x8a   : > { %3161 = vmatmul.mubr.msk.bf16.gmra.mxu0 %vm429_vm2, %v3687_v17 }
  0x8b   : > { %3164 = vmatprep.mubr.msk.bf16.mxu0 %vm429_vm2, %v3715_v2 }
  0x8c   : > { %3127 = vmatmul.mubr.msk.bf16.gmra.mxu1 %vm429_vm2, %v3863_v47 }
  0x8d   : > { %3130 = vmatprep.mubr.msk.bf16.mxu1 %vm429_vm2, %v3886_v21 }
  0x92   : > { %3165 = vmatmul.mubr.msk.bf16.gmra.mxu0 %vm429_vm2, %v4832_v56 }
  0x93   : > { %3168 = vmatprep.mubr.msk.bf16.mxu0 %vm429_vm2, %v4833_v15 }
  0x94   : > { %3131 = vmatmul.mubr.msk.bf16.gmra.mxu1 %vm429_vm2, %v3746_v37 }
  0x95   : > { %3134 = vmatprep.mubr.msk.bf16.mxu1 %vm429_vm2, %v3754_v0 }
  0x9a   : > { %3169 = vmatmul.mubr.msk.bf16.gmra.mxu0 %vm429_vm2, %v4834_v33 }
  0x9b   : > { %3172 = vmatprep.mubr.msk.bf16.mxu0 %vm429_vm2, %v4835_v26 }
  0x9c   : > { %3135 = vmatmul.mubr.msk.bf16.gmra.mxu1 %vm429_vm2, %v3772_v57 }
  0x9d   : > { %3138 = vmatprep.mubr.msk.bf16.mxu1 %vm429_vm2, %v3789_v48 }
  0xa2   : > { %3173 = vmatmul.mubr.msk.bf16.gmra.mxu0 %vm429_vm2, %v4836_v27 }
  0xa3   : > { %3176 = vmatprep.mubr.msk.bf16.mxu0 %vm429_vm2, %v3685_v36 }
  0xa4   : > { %3139 = vmatmul.mubr.msk.bf16.gmra.mxu1 %vm429_vm2, %v3797_v14 }
  0xa5   : > { %3142 = vmatprep.mubr.msk.bf16.mxu1 %vm429_vm2, %v3818_v38 }
  0xaa   : > { %3177 = vmatmul.mubr.msk.bf16.gmra.mxu0 %vm429_vm2, %v4837_v35 }
  0xab   : > { %3180 = vmatprep.mubr.msk.bf16.mxu0 %vm429_vm2, %v3720_v8 }
  0xac   : > { %3143 = vmatmul.mubr.msk.bf16.gmra.mxu1 %vm429_vm2, %v3825_v18 }
  0xad   : > { %3146 = vmatprep.mubr.msk.bf16.mxu1 %vm429_vm2, %v3835_v50 }
  0xb2   : > { %3181 = vmatmul.mubr.msk.bf16.gmra.mxu0 %vm429_vm2, %v4051_v46 }
  0xb3   : > { %3220 = vmatprep.mubr.msk.bf16.mxu0 %vm429_vm2, %v3768_v59 }
  0xb4   : > { %3147 = vmatmul.mubr.msk.bf16.gmra.mxu1 %vm429_vm2, %v1240_v6 }
  0xb5   : > { %3186 = vmatprep.mubr.msk.bf16.mxu1 %vm429_vm2, %v3741_v5 }
  0xba   : > { %3221 = vmatmul.mubr.msk.bf16.vlgmr.msra.gmra.mxu0 %vm429_vm2, %v3805_v28 }
  0xbb   : > { %3287 = vmatpush3.bf16.msra.mxu0 %v2327_v1  ;;  %3224 = vmatprep.mubr.msk.bf16.mxu0 %vm429_vm2, %v3829_v19 }
  0xbc   : > { %3187 = vmatmul.mubr.msk.bf16.vlgmr.msra.gmra.mxu1 %vm429_vm2, %v3748_v51 }
  0xbd   : > { %3253 = vmatpush3.bf16.msra.mxu1 %v2112_v39  ;;  %3190 = vmatprep.mubr.msk.bf16.mxu1 %vm429_vm2, %v3807_v31 }
  0xc2   : > { %3225 = vmatmul.mubr.msk.bf16.gmra.mxu0 %vm429_vm2, %v3857_v20 }
  0xc3   : > { %3228 = vmatprep.mubr.msk.bf16.mxu0 %vm429_vm2, %v3863_v47 }
  0xc4   : > { %3191 = vmatmul.mubr.msk.bf16.gmra.mxu1 %vm429_vm2, %v3812_v32 }
  0xc5   : > { %3194 = vmatprep.mubr.msk.bf16.mxu1 %vm429_vm2, %v3847_v45 }
  0xca   : > { %3229 = vmatmul.mubr.msk.bf16.gmra.mxu0 %vm429_vm2, %v3886_v21 }
  0xcb   : > { %3232 = vmatprep.mubr.msk.bf16.mxu0 %vm429_vm2, %v3746_v37 }
  0xcc   : > { %3195 = vmatmul.mubr.msk.bf16.gmra.mxu1 %vm429_vm2, %v3849_v54 }
  0xcd   : > { %3198 = vmatprep.mubr.msk.bf16.mxu1 %vm429_vm2, %v3877_v42 }
  0xd2   : > { %3233 = vmatmul.mubr.msk.bf16.gmra.mxu0 %vm429_vm2, %v3754_v0 }
  0xd3   : > { %3236 = vmatprep.mubr.msk.bf16.mxu0 %vm429_vm2, %v3772_v57 }
  0xd4   : > { %3199 = vmatmul.mubr.msk.bf16.gmra.mxu1 %vm429_vm2, %v3879_v49 }
  0xd5   : > { %3202 = vmatprep.mubr.msk.bf16.mxu1 %vm429_vm2, %v3903_v41 }
  0xda   : > { %v3018_v5 = vpop.f32.mrf.mxu0  ;;  %3237 = vmatmul.mubr.msk.bf16.gmra.mxu0 %vm429_vm2, %v3789_v48 }
  0xdb   : > { %3240 = vmatprep.mubr.msk.bf16.mxu0 %vm429_vm2, %v3797_v14 }
  0xdc   : > { %v4098_v37 = vpop.f32.mrf.mxu1  ;;  %3203 = vmatmul.mubr.msk.bf16.gmra.mxu1 %vm429_vm2, %v3905_v13  ;;  %v516_v0 = vpop.f32.mrf.mxu0 }
  0xdd   : > { %3206 = vmatprep.mubr.msk.bf16.mxu1 %vm429_vm2, %v3925_v25 }
  0xde   : > { %v4104_v59 = vpop.f32.mrf.mxu1  ;;  %v3019_v57 = vpop.f32.mrf.mxu0 }
  0xe0   : > { %v4106_v28 = vpop.f32.mrf.mxu1  ;;  %v519_v19 = vpop.f32.mrf.mxu0 }
  0xe2   : > { %v4108_v20 = vpop.f32.mrf.mxu1  ;;  %v4110_v48 = vpop.f32.mrf.mxu0  ;;  %3241 = vmatmul.mubr.msk.bf16.gmra.mxu0 %vm429_vm2, %v3818_v38 }
  0xe3   : > { %3244 = vmatprep.mubr.msk.bf16.mxu0 %vm429_vm2, %v3825_v18 }
  0xe4   : > { %v4116_v14 = vpop.f32.mrf.mxu1  ;;  %3207 = vmatmul.mubr.msk.bf16.gmra.mxu1 %vm429_vm2, %v3927_v22  ;;  %v4120_v47 = vpop.f32.mrf.mxu0 }
  0xe5   : > { %3210 = vmatprep.mubr.msk.bf16.mxu1 %vm429_vm2, %v3947_v9 }
  0xe6   : > { %v4124_v21 = vpop.f32.mrf.mxu1  ;;  %v4126_v40 = vpop.f32.mrf.mxu0 }
  0xe8   : > { %v4128_v12 = vpop.f32.mrf.mxu1  ;;  %v4130_v38 = vpop.f32.mrf.mxu0 }
  0xea   : > { %v4132_v44 = vpop.f32.mrf.mxu1  ;;  %v4134_v18 = vpop.f32.mrf.mxu0  ;;  %3245 = vmatmul.mubr.msk.bf16.gmra.mxu0 %vm429_vm2, %v3835_v50  ;;  %v1881_v50 = vpack.c.bf16 %v4143_v11, %v4140_v10 }
  0xeb   : > { %3248 = vmatprep.mubr.msk.bf16.mxu0 %vm429_vm2, %v1240_v6 }
  0xec   : > { %v4145_v60 = vpop.f32.mrf.mxu1  ;;  %3211 = vmatmul.mubr.msk.bf16.gmra.mxu1 %vm429_vm2, %v3949_v62  ;;  %v4149_v16 = vpop.f32.mrf.mxu0 }
  0xed   : > { %4839 = vst [vmem:[#allocation4_spill] sm:$0xff] %v4145_v60  ;;  %3214 = vmatprep.mubr.msk.bf16.mxu1 %vm429_vm2, %v3966_v30 }
  0xee   : > { %v4153_v23 = vpop.f32.mrf.mxu1  ;;  %v4155_v52 = vpop.f32.mrf.mxu0 }
  0xef   : > { %4840 = vst [vmem:[#allocation7_spill] sm:$0xff] %v4153_v23 }
  0xf0   : > { %v4159_v29 = vpop.f32.mrf.mxu1  ;;  %v4161_v3 = vpop.f32.mrf.mxu0 }
  0xf1   : > { %4841 = vst [vmem:[#allocation10_spill] sm:$0xff] %v4159_v29 }
  0xf2   : > { %v4163_v58 = vpop.f32.mrf.mxu1  ;;  %v4165_v63 = vpop.f32.mrf.mxu0  ;;  %3249 = vmatmul.mubr.msk.bf16.gmra.mxu0 %vm429_vm2, %v1881_v50 }
  0xf3   : > { %4842 = vst [vmem:[#allocation12_spill] sm:$0xff] %v4163_v58  ;;  %3288 = vmatprep.mubr.msk.bf16.mxu0 %vm429_vm2, %v3748_v51 }
  0xf4   : > { %v4170_v24 = vpop.f32.mrf.mxu1  ;;  %3215 = vmatmul.mubr.msk.bf16.gmra.mxu1 %vm429_vm2, %v3973_v61  ;;  %v4174_v34 = vpop.f32.mrf.mxu0 }
  0xf5   : > { %4843 = vst [vmem:[#allocation15_spill] sm:$0xff] %v4170_v24  ;;  %3254 = vmatprep.mubr.msk.bf16.mxu1 %vm429_vm2, %v4829_v43 }
  0xf6   : > { %v4178_v53 = vpop.f32.mrf.mxu1  ;;  %v4180_v6 = vpop.f32.mrf.mxu0 }
  0xf7   : > { %4844 = vst [vmem:[#allocation5_spill] sm:$0xff] %v4178_v53 }
  0xf8   : > { %v4182_v1 = vpop.f32.mrf.mxu1  ;;  %v4184_v39 = vpop.f32.mrf.mxu0 }
  0xf9   : > { %4845 = vst [vmem:[#allocation8_spill] sm:$0xff] %v4182_v1 }
  0xfa   : > { %v4186_v50 = vpop.f32.mrf.mxu1  ;;  %v3086_v51 = vpop.f32.mrf.mxu0  ;;  %3289 = vmatmul.mubr.msk.bf16.vlgmr.msra.gmra.mxu0 %vm429_vm2, %v3807_v31 }
  0xfb   : > { %4846 = vst [vmem:[#allocation11_spill] sm:$0xff] %v4186_v50  ;;  %3292 = vmatprep.mubr.msk.bf16.mxu0 %vm429_vm2, %v3812_v32 }
  0xfc   : > { %v3052_v24 = vpop.f32.mrf.mxu1  ;;  %3255 = vmatmul.mubr.msk.bf16.vlgmr.msra.gmra.mxu1 %vm429_vm2, %v4830_v7  ;;  %v1081_v43 = vpop.f32.mrf.mxu0 }
  0xfd   : > { %v742_v53 = vadd.f32 %v3052_v24, %v3018_v5  ;;  %3258 = vmatprep.mubr.msk.bf16.mxu1 %vm429_vm2, %v4831_v4 }
  0xfe   : > { %v733_v1 = vpop.f32.mrf.mxu1  ;;  %v3087_v58 = vpop.f32.mrf.mxu0 }
  0xff   : > { %v4196_v29 = vadd.f32 %v3086_v51, %v742_v53  ;;  %v734_v50 = vadd.f32 %v733_v1, %v516_v0 }
 0x100   : > { %v3053_v23 = vpop.f32.mrf.mxu1  ;;  %v1084_v46 = vpop.f32.mrf.mxu0 }
 0x101   : > { %v4198_v31 = vadd.f32 %v1081_v43, %v734_v50  ;;  %v745_v60 = vadd.f32 %v3053_v23, %v3019_v57 }
 0x102   : > { %v736_v32 = vpop.f32.mrf.mxu1  ;;  %v3090_v8 = vpop.f32.mrf.mxu0  ;;  %3293 = vmatmul.mubr.msk.bf16.gmra.mxu0 %vm429_vm2, %v3847_v45 }
 0x103   : > { %v4202_v7 = vadd.f32 %v3087_v58, %v745_v60  ;;  %v737_v5 = vadd.f32 %v736_v32, %v519_v19  ;;  %3296 = vmatprep.mubr.msk.bf16.mxu0 %vm429_vm2, %v3849_v54 }
 0x104   : > { %v3056_v4 = vpop.f32.mrf.mxu1  ;;  %3259 = vmatmul.mubr.msk.bf16.gmra.mxu1 %vm429_vm2, %v3672_v55  ;;  %v1097_v0 = vpop.f32.mrf.mxu0 }
 0x105   : > { %v4208_v24 = vadd.f32 %v1084_v46, %v737_v5  ;;  %v758_v57 = vadd.f32 %v3056_v4, %v4110_v48  ;;  %3262 = vmatprep.mubr.msk.bf16.mxu1 %vm429_vm2, %v3687_v17 }
 0x106   : > { %v749_v23 = vpop.f32.mrf.mxu1  ;;  %v3091_v45 = vpop.f32.mrf.mxu0 }
 0x107   : > { %v4213_v60 = vadd.f32 %v3090_v8, %v758_v57  ;;  %v750_v19 = vadd.f32 %v749_v23, %v4120_v47 }
 0x108   : > { %v3057_v58 = vpop.f32.mrf.mxu1  ;;  %v1100_v54 = vpop.f32.mrf.mxu0 }
 0x109   : > { %v4216_v53 = vadd.f32 %v1097_v0, %v750_v19  ;;  %v761_v55 = vadd.f32 %v3057_v58, %v4126_v40 }
 0x10a   : > { %v752_v1 = vpop.f32.mrf.mxu1  ;;  %v3094_v46 = vpop.f32.mrf.mxu0  ;;  %3297 = vmatmul.mubr.msk.bf16.gmra.mxu0 %vm429_vm2, %v3877_v42 }
 0x10b   : > { %v4221_v48 = vadd.f32 %v3091_v45, %v761_v55  ;;  %v753_v17 = vadd.f32 %v752_v1, %v4130_v38  ;;  %3300 = vmatprep.mubr.msk.bf16.mxu0 %vm429_vm2, %v3879_v49 }
 0x10c   : > { %v3060_v8 = vpop.f32.mrf.mxu1  ;;  %3263 = vmatmul.mubr.msk.bf16.gmra.mxu1 %vm429_vm2, %v3715_v2  ;;  %v1113_v47 = vpop.f32.mrf.mxu0 }
 0x10d   : > { %v4228_v50 = vadd.f32 %v1100_v54, %v753_v17  ;;  %v774_v40 = vadd.f32 %v3060_v8, %v4134_v18  ;;  %3266 = vmatprep.mubr.msk.bf16.mxu1 %vm429_vm2, %v4832_v56 }
 0x10e   : > { %v765_v42 = vpop.f32.mrf.mxu1  ;;  %v3095_v51 = vpop.f32.mrf.mxu0 }
 0x10f   : > { %v4233_v43 = vadd.f32 %v3094_v46, %v774_v40  ;;  %v766_v38 = vadd.f32 %v765_v42, %v4149_v16 }
 0x110   : > { %v3061_v32 = vpop.f32.mrf.mxu1  ;;  %v1116_v49 = vpop.f32.mrf.mxu0 }
 0x111   : > { %v4236_v5 = vadd.f32 %v1113_v47, %v766_v38  ;;  %v777_v2 = vadd.f32 %v3061_v32, %v4155_v52 }
 0x112   : > { %v768_v4 = vpop.f32.mrf.mxu1  ;;  %v3098_v0 = vpop.f32.mrf.mxu0  ;;  %3301 = vmatmul.mubr.msk.bf16.gmra.mxu0 %vm429_vm2, %v3903_v41 }
 0x113   : > { %v4241_v18 = vadd.f32 %v3095_v51, %v777_v2  ;;  %v769_v56 = vadd.f32 %v768_v4, %v4161_v3  ;;  %3304 = vmatprep.mubr.msk.bf16.mxu0 %vm429_vm2, %v3905_v13 }
 0x114   : > { %v3064_v57 = vpop.f32.mrf.mxu1  ;;  %3267 = vmatmul.mubr.msk.bf16.gmra.mxu1 %vm429_vm2, %v4833_v15  ;;  %v1129_v16 = vpop.f32.mrf.mxu0 }
 0x115   : > { %v4248_v23 = vadd.f32 %v1116_v49, %v769_v56  ;;  %v790_v52 = vadd.f32 %v3064_v57, %v4165_v63  ;;  %3270 = vmatprep.mubr.msk.bf16.mxu1 %vm429_vm2, %v4834_v33  ;;  %v225_v49 = vld [vmem:[%s3406_s23 + $0x1a8] sm:$0x3]  ;;  %v2092_v57 = vrot.slane %v4140_v10, 1 }
 0x116   : > { %v781_v41 = vpop.f32.mrf.mxu1  ;;  %v3099_v45 = vpop.f32.mrf.mxu0 }
 0x117   : > { %v4253_v19 = vadd.f32 %v3098_v0, %v790_v52  ;;  %v782_v3 = vadd.f32 %v781_v41, %v4174_v34  ;;  %v2308_v0 = vrot.slane %v4143_v11, 2 }
 0x118   : > { %v3065_v58 = vpop.f32.mrf.mxu1  ;;  %v1132_v13 = vpop.f32.mrf.mxu0 }
 0x119   : > { %v4256_v54 = vadd.f32 %v1129_v16, %v782_v3  ;;  %v793_v15 = vadd.f32 %v3065_v58, %v4180_v6 }
 0x11a   : > { %v784_v55 = vpop.f32.mrf.mxu1  ;;  %v3102_v1 = vpop.f32.mrf.mxu0  ;;  %3305 = vmatmul.mubr.msk.bf16.gmra.mxu0 %vm429_vm2, %v3925_v25 }
 0x11b   : > { %v4261_v63 = vadd.f32 %v3099_v45, %v793_v15  ;;  %v785_v33 = vadd.f32 %v784_v55, %v4184_v39  ;;  %3308 = vmatprep.mubr.msk.bf16.mxu0 %vm429_vm2, %v3927_v22  ;;  %v2095_v45 = vrot.slane %v225_v49, 1  ;;  %v4847_v55 = vld [vmem:[#allocation18_spill] sm:$0xff] }
 0x11c   : > { %v3068_v46 = vpop.f32.mrf.mxu1  ;;  %3271 = vmatmul.mubr.msk.bf16.gmra.mxu1 %vm429_vm2, %v4835_v26  ;;  %v1145_v34 = vpop.f32.mrf.mxu0 }
 0x11d   : > { %v4268_v17 = vadd.f32 %v1132_v13, %v785_v33  ;;  %v806_v6 = vadd.f32 %v3068_v46, %v4098_v37  ;;  %3274 = vmatprep.mubr.msk.bf16.mxu1 %vm429_vm2, %v4836_v27  ;;  %v4848_v33 = vld [vmem:[#allocation4_spill] sm:$0xff]  ;;  %v4849_v46 = vld [vmem:[#allocation2_spill] sm:$0xff] }
 0x11e   : > { %v797_v25 = vpop.f32.mrf.mxu1  ;;  %v3103_v8 = vpop.f32.mrf.mxu0 }
 0x11f   : > { %v4273_v47 = vadd.f32 %v3102_v1, %v806_v6  ;;  %v798_v39 = vadd.f32 %v797_v25, %v4104_v59 }
 0x120   : > { %v3069_v22 = vpop.f32.mrf.mxu1  ;;  %v1148_v40 = vpop.f32.mrf.mxu0 }
 0x121   : > { %v4276_v42 = vadd.f32 %v1145_v34, %v798_v39  ;;  %v809_v26 = vadd.f32 %v3069_v22, %v4106_v28  ;;  %v4850_v39 = vld [vmem:[#allocation7_spill] sm:$0xff] }
 0x122   : > { %v800_v51 = vpop.f32.mrf.mxu1  ;;  %v3106_v38 = vpop.f32.mrf.mxu0  ;;  %3309 = vmatmul.mubr.msk.bf16.gmra.mxu0 %vm429_vm2, %v3947_v9  ;;  %v2307_v9 = vrot.slane %v4140_v10, 2 }
 0x123   : > { %v4281_v37 = vadd.f32 %v3103_v8, %v809_v26  ;;  %v801_v27 = vadd.f32 %v800_v51, %v4108_v20  ;;  %3312 = vmatprep.mubr.msk.bf16.mxu0 %vm429_vm2, %v3949_v62 }
 0x124   : > { %v3072_v32 = vpop.f32.mrf.mxu1  ;;  %3275 = vmatmul.mubr.msk.bf16.gmra.mxu1 %vm429_vm2, %v3685_v36  ;;  %v1161_v59 = vpop.f32.mrf.mxu0  ;;  %v2310_v36 = vrot.slane %v225_v49, 2  ;;  %v2309_v10 = vsel %vm478_vm0, %v2307_v9, %v2308_v0  ;;  %v4852_v9 = vld [vmem:[#allocation12_spill] sm:$0xff] }
 0x125   : > { %v4289_v2 = vadd.f32 %v1148_v40, %v801_v27  ;;  %v822_v28 = vadd.f32 %v3072_v32, %v4116_v14  ;;  %3278 = vmatprep.mubr.msk.bf16.mxu1 %vm429_vm2, %v4837_v35  ;;  %v2093_v14 = vrot.slane %v4143_v11, 1  ;;  %v4851_v27 = vld [vmem:[#allocation10_spill] sm:$0xff] }
 0x126   : > { %v813_v4 = vpop.f32.mrf.mxu1  ;;  %v3107_v20 = vpop.f32.mrf.mxu0  ;;  %v2311_v11 = vsel %vm478_vm0, %v2308_v0, %v2310_v36  ;;  %v4853_v36 = vld [vmem:[#allocation15_spill] sm:$0xff] }
 0x127   : > { %v4296_v62 = vadd.f32 %v3106_v38, %v822_v28  ;;  %v814_v56 = vadd.f32 %v813_v4, %v4124_v21  ;;  %v2314_v25 = vpack.c.bf16 %v2311_v11, %v2309_v10  ;;  %v4855_v10 = vld [vmem:[#allocation8_spill] sm:$0xff] }
 0x128   : > { %v3073_v16 = vpop.f32.mrf.mxu1  ;;  %v1164_v52 = vpop.f32.mrf.mxu0 }
 0x129   : > { %v4301_v41 = vadd.f32 %v1161_v59, %v814_v56  ;;  %v825_v35 = vadd.f32 %v3073_v16, %v4128_v12 }
 0x12a   : > { %v816_v3 = vpop.f32.mrf.mxu1  ;;  %v3110_v58 = vpop.f32.mrf.mxu0  ;;  %3313 = vmatmul.mubr.msk.bf16.gmra.mxu0 %vm429_vm2, %v3966_v30 }
 0x12b   : > { %v4306_v13 = vadd.f32 %v3107_v20, %v825_v35  ;;  %v817_v21 = vadd.f32 %v816_v3, %v4132_v44  ;;  %3316 = vmatprep.mubr.msk.bf16.mxu0 %vm429_vm2, %v3973_v61  ;;  %v2094_v44 = vsel %vm292_vm1, %v2092_v57, %v2093_v14  ;;  %v2096_v61 = vsel %vm292_vm1, %v2093_v14, %v2095_v45  ;;  %v4854_v35 = vld [vmem:[#allocation5_spill] sm:$0xff] }
 0x12c   : > { %v3076_v15 = vpop.f32.mrf.mxu1  ;;  %3279 = vmatmul.mubr.msk.bf16.gmra.mxu1 %vm429_vm2, %v4847_v55  ;;  %v1177_v12 = vpop.f32.mrf.mxu0  ;;  %v2099_v51 = vpack.c.bf16 %v2096_v61, %v2094_v44 }
 0x12d   : > { %v4315_v1 = vadd.f32 %v1164_v52, %v817_v21  ;;  %v838_v30 = vadd.f32 %v3076_v15, %v4848_v33  ;;  %3282 = vmatprep.mubr.msk.bf16.mxu1 %vm429_vm2, %v4849_v46  ;;  %v4856_v33 = vld [vmem:[#allocation11_spill] sm:$0xff] }
 0x12e   : > { %v829_v34 = vpop.f32.mrf.mxu1  ;;  %v3111_v6 = vpop.f32.mrf.mxu0 }
 0x12f   : > { %v4322_v8 = vadd.f32 %v3110_v58, %v838_v30  ;;  %v830_v22 = vadd.f32 %v829_v34, %v4850_v39 }
 0x130   : > { %v3077_v40 = vpop.f32.mrf.mxu1  ;;  %v1180_v26 = vpop.f32.mrf.mxu0 }
 0x131   : > { %v4325_v38 = vadd.f32 %v1177_v12, %v830_v22  ;;  %v841_v32 = vadd.f32 %v3077_v40, %v4851_v27 }
 0x132   : > { %v832_v59 = vpop.f32.mrf.mxu1  ;;  %v3114_v49 = vpop.f32.mrf.mxu0  ;;  %3317 = vmatmul.mubr.msk.bf16.gmra.mxu0 %vm429_vm2, %v2314_v25 }
 0x133   : > { %v4329_v28 = vadd.f32 %v3111_v6, %v841_v32  ;;  %v833_v4 = vadd.f32 %v832_v59, %v4852_v9 }
 0x134   : > { %v3080_v20 = vpop.f32.mrf.mxu1  ;;  %3283 = vmatmul.mubr.msk.bf16.gmra.mxu1 %vm429_vm2, %v2099_v51  ;;  %v1193_v0 = vpop.f32.mrf.mxu0 }
 0x135   : > { %v4333_v56 = vadd.f32 %v1180_v26, %v833_v4  ;;  %v854_v57 = vadd.f32 %v3080_v20, %v4853_v36 }
 0x136   : > { %v845_v16 = vpop.f32.mrf.mxu1  ;;  %v3115_v52 = vpop.f32.mrf.mxu0 }
 0x137   : > { %v4336_v14 = vadd.f32 %v3114_v49, %v854_v57  ;;  %v846_v45 = vadd.f32 %v845_v16, %v4854_v35 }
 0x138   : > { %v3081_v3 = vpop.f32.mrf.mxu1  ;;  %v1196_v58 = vpop.f32.mrf.mxu0 }
 0x139   : > { %v4339_v21 = vadd.f32 %v1193_v0, %v846_v45  ;;  %v857_v11 = vadd.f32 %v3081_v3, %v4855_v10 }
 0x13a   : > { %v848_v15 = vpop.f32.mrf.mxu1  ;;  %v3154_v55 = vpop.f32.mrf.mxu0 }
 0x13b   : > { %v4342_v12 = vadd.f32 %v3115_v52, %v857_v11  ;;  %v849_v30 = vadd.f32 %v848_v15, %v4856_v33 }
 0x13c   : > { %v3120_v46 = vpop.f32.mrf.mxu1  ;;  %v1507_v44 = vpop.f32.mrf.mxu0 }
 0x13d   : > { %v4345_v61 = vadd.f32 %v1196_v58, %v849_v30  ;;  %v1418_v34 = vadd.f32 %v3120_v46, %v4196_v29 }
 0x13e   : > { %v1289_v6 = vpop.f32.mrf.mxu1  ;;  %v3155_v25 = vpop.f32.mrf.mxu0 }
 0x13f   : > { %v4348_v39 = vadd.f32 %v3154_v55, %v1418_v34  ;;  %v1416_v22 = vadd.f32 %v1289_v6, %v4198_v31 }
 0x140   : > { %v3121_v40 = vpop.f32.mrf.mxu1  ;;  %v1510_v26 = vpop.f32.mrf.mxu0 }
 0x141   : > { %v4351_v51 = vadd.f32 %v1507_v44, %v1416_v22  ;;  %v1419_v27 = vadd.f32 %v3121_v40, %v4202_v7 }
 0x142   : > { %v1292_v32 = vpop.f32.mrf.mxu1  ;;  %v3158_v59 = vpop.f32.mrf.mxu0 }
 0x143   : > { %v4354_v49 = vadd.f32 %v3155_v25, %v1419_v27  ;;  %v1417_v9 = vadd.f32 %v1292_v32, %v4208_v24 }
 0x144   : > { %v3124_v4 = vpop.f32.mrf.mxu1  ;;  %v1523_v29 = vpop.f32.mrf.mxu0 }
 0x145   : > { %v4357_v20 = vadd.f32 %v1510_v26, %v1417_v9  ;;  %v1422_v0 = vadd.f32 %v3124_v4, %v4213_v60 }
 0x146   : > { %v1305_v36 = vpop.f32.mrf.mxu1  ;;  %v3159_v31 = vpop.f32.mrf.mxu0 }
 0x147   : > { %v4360_v57 = vadd.f32 %v3158_v59, %v1422_v0  ;;  %v1420_v16 = vadd.f32 %v1305_v36, %v4216_v53 }
 0x148   : > { %v3125_v52 = vpop.f32.mrf.mxu1  ;;  %v1526_v7 = vpop.f32.mrf.mxu0 }
 0x149   : > { %v4363_v35 = vadd.f32 %v1523_v29, %v1420_v16  ;;  %v1423_v45 = vadd.f32 %v3125_v52, %v4221_v48 }
 0x14a   : > { %v1308_v3 = vpop.f32.mrf.mxu1  ;;  %v3162_v24 = vpop.f32.mrf.mxu0 }
 0x14b   : > { %v4366_v58 = vadd.f32 %v3159_v31, %v1423_v45  ;;  %v1421_v10 = vadd.f32 %v1308_v3, %v4228_v50 }
 0x14c   : > { %v3128_v11 = vpop.f32.mrf.mxu1  ;;  %v1539_v60 = vpop.f32.mrf.mxu0 }
 0x14d   : > { %v4369_v15 = vadd.f32 %v1526_v7, %v1421_v10  ;;  %v1426_v55 = vadd.f32 %v3128_v11, %v4233_v43 }
 0x14e   : > { %v1321_v33 = vpop.f32.mrf.mxu1  ;;  %v3163_v53 = vpop.f32.mrf.mxu0 }
 0x14f   : > { %v4372_v30 = vadd.f32 %v3162_v24, %v1426_v55  ;;  %v1424_v46 = vadd.f32 %v1321_v33, %v4236_v5 }
 0x150   : > { %v3129_v44 = vpop.f32.mrf.mxu1  ;;  %v1542_v48 = vpop.f32.mrf.mxu0 }
 0x151   : > { %v4375_v34 = vadd.f32 %v1539_v60, %v1424_v46  ;;  %v1427_v6 = vadd.f32 %v3129_v44, %v4241_v18 }
 0x152   : > { %v1324_v25 = vpop.f32.mrf.mxu1  ;;  %v3166_v50 = vpop.f32.mrf.mxu0 }
 0x153   : > { %v4378_v22 = vadd.f32 %v3163_v53, %v1427_v6  ;;  %v1425_v40 = vadd.f32 %v1324_v25, %v4248_v23 }
 0x154   : > { %v3132_v26 = vpop.f32.mrf.mxu1  ;;  %v1555_v43 = vpop.f32.mrf.mxu0 }
 0x155   : > { %v4381_v27 = vadd.f32 %v1542_v48, %v1425_v40  ;;  %v1430_v32 = vadd.f32 %v3132_v26, %v4253_v19 }
 0x156   : > { %v1337_v59 = vpop.f32.mrf.mxu1  ;;  %v3167_v5 = vpop.f32.mrf.mxu0 }
 0x157   : > { %v4384_v9 = vadd.f32 %v3166_v50, %v1430_v32  ;;  %v1428_v4 = vadd.f32 %v1337_v59, %v4256_v54 }
 0x158   : > { %v3133_v29 = vpop.f32.mrf.mxu1  ;;  %v1558_v18 = vpop.f32.mrf.mxu0 }
 0x159   : > { %v4387_v0 = vadd.f32 %v1555_v43, %v1428_v4  ;;  %v1431_v36 = vadd.f32 %v3133_v29, %v4261_v63 }
 0x15a   : > { %v1340_v31 = vpop.f32.mrf.mxu1  ;;  %v3170_v23 = vpop.f32.mrf.mxu0 }
 0x15b   : > { %v4390_v16 = vadd.f32 %v3167_v5, %v1431_v36  ;;  %v1429_v52 = vadd.f32 %v1340_v31, %v4268_v17 }
 0x15c   : > { %v3136_v7 = vpop.f32.mrf.mxu1  ;;  %v1571_v19 = vpop.f32.mrf.mxu0 }
 0x15d   : > { %v4393_v45 = vadd.f32 %v1558_v18, %v1429_v52  ;;  %v1434_v3 = vadd.f32 %v3136_v7, %v4273_v47 }
 0x15e   : > { %v1353_v24 = vpop.f32.mrf.mxu1  ;;  %v3171_v54 = vpop.f32.mrf.mxu0 }
 0x15f   : > { %v4396_v10 = vadd.f32 %v3170_v23, %v1434_v3  ;;  %v1432_v11 = vadd.f32 %v1353_v24, %v4276_v42 }
 0x160   : > { %v3137_v60 = vpop.f32.mrf.mxu1  ;;  %v1574_v63 = vpop.f32.mrf.mxu0 }
 0x161   : > { %v4399_v55 = vadd.f32 %v1571_v19, %v1432_v11  ;;  %v1435_v33 = vadd.f32 %v3137_v60, %v4281_v37 }
 0x162   : > { %v1356_v53 = vpop.f32.mrf.mxu1  ;;  %v3174_v17 = vpop.f32.mrf.mxu0 }
 0x163   : > { %v4402_v46 = vadd.f32 %v3171_v54, %v1435_v33  ;;  %v1433_v44 = vadd.f32 %v1356_v53, %v4289_v2 }
 0x164   : > { %v3140_v48 = vpop.f32.mrf.mxu1  ;;  %v1587_v47 = vpop.f32.mrf.mxu0 }
 0x165   : > { %4857 = vst [vmem:[#allocation14_spill] sm:$0xff] %v4402_v46  ;;  %v4405_v6 = vadd.f32 %v1574_v63, %v1433_v44  ;;  %v1438_v25 = vadd.f32 %v3140_v48, %v4296_v62 }
 0x166   : > { %v1369_v50 = vpop.f32.mrf.mxu1  ;;  %v3175_v42 = vpop.f32.mrf.mxu0 }
 0x167   : > { %4858 = vst [vmem:[#allocation3_spill] sm:$0xff] %v4405_v6  ;;  %v4408_v40 = vadd.f32 %v3174_v17, %v1438_v25  ;;  %v1436_v26 = vadd.f32 %v1369_v50, %v4301_v41 }
 0x168   : > { %v3141_v43 = vpop.f32.mrf.mxu1  ;;  %v1590_v37 = vpop.f32.mrf.mxu0 }
 0x169   : > { %4859 = vst [vmem:[#allocation6_spill] sm:$0xff] %v4408_v40  ;;  %v4411_v32 = vadd.f32 %v1587_v47, %v1436_v26  ;;  %v1439_v59 = vadd.f32 %v3141_v43, %v4306_v13 }
 0x16a   : > { %v1372_v5 = vpop.f32.mrf.mxu1  ;;  %v3178_v2 = vpop.f32.mrf.mxu0 }
 0x16b   : > { %4860 = vst [vmem:[#allocation9_spill] sm:$0xff] %v4411_v32  ;;  %v4414_v4 = vadd.f32 %v3175_v42, %v1439_v59  ;;  %v1437_v29 = vadd.f32 %v1372_v5, %v4315_v1 }
 0x16c   : > { %v3144_v18 = vpop.f32.mrf.mxu1  ;;  %v1603_v62 = vpop.f32.mrf.mxu0 }
 0x16d   : > { %4861 = vst [vmem:[#allocation13_spill] sm:$0xff] %v4414_v4  ;;  %v4417_v36 = vadd.f32 %v1590_v37, %v1437_v29  ;;  %v1442_v31 = vadd.f32 %v3144_v18, %v4322_v8 }
 0x16e   : > { %v1385_v23 = vpop.f32.mrf.mxu1  ;;  %v3179_v41 = vpop.f32.mrf.mxu0 }
 0x16f   : > { %4862 = vst [vmem:[#allocation16_spill] sm:$0xff] %v4417_v36  ;;  %v4420_v52 = vadd.f32 %v3178_v2, %v1442_v31  ;;  %v1440_v7 = vadd.f32 %v1385_v23, %v4325_v38 }
 0x170   : > { %v3145_v19 = vpop.f32.mrf.mxu1  ;;  %v1606_v13 = vpop.f32.mrf.mxu0 }
 0x171   : > { %4863 = vst [vmem:[#allocation17_spill] sm:$0xff] %v4420_v52  ;;  %v4423_v3 = vadd.f32 %v1603_v62, %v1440_v7  ;;  %v1443_v24 = vadd.f32 %v3145_v19, %v4329_v28 }
 0x172   : > { %v1388_v54 = vpop.f32.mrf.mxu1  ;;  %v3182_v1 = vpop.f32.mrf.mxu0 }
 0x173   : > { %4864 = vst [vmem:[#allocation18_spill] sm:$0xff] %v4423_v3  ;;  %v4426_v11 = vadd.f32 %v3179_v41, %v1443_v24  ;;  %v1441_v60 = vadd.f32 %v1388_v54, %v4333_v56 }
 0x174   : > { %v3148_v63 = vpop.f32.mrf.mxu1  ;;  %v1619_v8 = vpop.f32.mrf.mxu0 }
 0x175   : > { %4865 = vst [vmem:[#allocation4_spill] sm:$0xff] %v4426_v11  ;;  %v4429_v33 = vadd.f32 %v1606_v13, %v1441_v60  ;;  %v1446_v53 = vadd.f32 %v3148_v63, %v4336_v14 }
 0x176   : > { %v1401_v17 = vpop.f32.mrf.mxu1  ;;  %v3183_v38 = vpop.f32.mrf.mxu0 }
 0x177   : > { %4866 = vst [vmem:[#allocation2_spill] sm:$0xff] %v4429_v33  ;;  %v4432_v44 = vadd.f32 %v3182_v1, %v1446_v53  ;;  %v1444_v48 = vadd.f32 %v1401_v17, %v4339_v21 }
 0x178   : > { %v3149_v47 = vpop.f32.mrf.mxu1  ;;  %v1622_v28 = vpop.f32.mrf.mxu0 }
 0x179   : > { %4867 = vst [vmem:[#allocation7_spill] sm:$0xff] %v4432_v44  ;;  %v4435_v25 = vadd.f32 %v1619_v8, %v1444_v48  ;;  %v1447_v50 = vadd.f32 %v3149_v47, %v4342_v12 }
 0x17a   : > { %v1404_v42 = vpop.f32.mrf.mxu1  ;;  %v4438_v56 = vpop.f32.mrf.mxu0 }
 0x17b   : > { %4868 = vst [vmem:[#allocation10_spill] sm:$0xff] %v4435_v25  ;;  %v4440_v26 = vadd.f32 %v3183_v38, %v1447_v50  ;;  %v1445_v43 = vadd.f32 %v1404_v42, %v4345_v61 }
 0x17c   : > { %v3188_v14 = vpop.f32.mrf.mxu1  ;;  %v4443_v37 = vpop.f32.mrf.mxu0 }
 0x17d   : > { %4869 = vst [vmem:[#allocation12_spill] sm:$0xff] %v4440_v26  ;;  %v4445_v59 = vadd.f32 %v1622_v28, %v1445_v43 }
 0x17e   : > { %v1722_v5 = vpop.f32.mrf.mxu1  ;;  %v4447_v21 = vpop.f32.mrf.mxu0 }
 0x17f   : > { %4870 = vst [vmem:[#allocation15_spill] sm:$0xff] %v4445_v59 }
 0x180   : > { %v4449_v2 = vpop.f32.mrf.mxu1  ;;  %v4451_v29 = vpop.f32.mrf.mxu0 }
 0x182   : > { %v4453_v12 = vpop.f32.mrf.mxu1  ;;  %v4455_v18 = vpop.f32.mrf.mxu0 }
 0x184   : > { %v4457_v62 = vpop.f32.mrf.mxu1  ;;  %v4459_v31 = vpop.f32.mrf.mxu0 }
 0x186   : > { %v4461_v61 = vpop.f32.mrf.mxu1  ;;  %v4463_v23 = vpop.f32.mrf.mxu0 }
 0x188   : > { %v4465_v41 = vpop.f32.mrf.mxu1  ;;  %v4467_v7 = vpop.f32.mrf.mxu0 }
 0x18a   : > { %v4469_v19 = vpop.f32.mrf.mxu1  ;;  %v4471_v13 = vpop.f32.mrf.mxu0 }
 0x18c   : > { %v4473_v24 = vpop.f32.mrf.mxu1  ;;  %v4475_v54 = vpop.f32.mrf.mxu0 }
 0x18e   : > { %v4477_v1 = vpop.f32.mrf.mxu1  ;;  %v4479_v60 = vpop.f32.mrf.mxu0 }
 0x190   : > { %v4481_v63 = vpop.f32.mrf.mxu1  ;;  %v4483_v8 = vpop.f32.mrf.mxu0 }
 0x192   : > { %v4485_v53 = vpop.f32.mrf.mxu1  ;;  %v4487_v17 = vpop.f32.mrf.mxu0 }
 0x194   : > { %v4489_v38 = vpop.f32.mrf.mxu1  ;;  %v4491_v48 = vpop.f32.mrf.mxu0 }
 0x196   : > { %v4493_v47 = vpop.f32.mrf.mxu1  ;;  %v4495_v28 = vpop.f32.mrf.mxu0 }
 0x198   : > { %v4497_v50 = vpop.f32.mrf.mxu1  ;;  %v4499_v42 = vpop.f32.mrf.mxu0 }
 0x19a   : > { %v4501_v43 = vpop.f32.mrf.mxu1  ;;  %v4503_v59 = vpop.f32.mrf.mxu0 }
 0x19c   : > { %v4505_v26 = vpop.f32.mrf.mxu1  ;;  %v4507_v25 = vpop.f32.mrf.mxu0 }
 0x19d   : > { %4871 = vst [vmem:[#allocation5_spill] sm:$0xff] %v4507_v25 }
 0x19e   : > { %v4509_v44 = vpop.f32.mrf.mxu1  ;;  %v4511_v33 = vpop.f32.mrf.mxu0 }
 0x19f   : > { %4872 = vst [vmem:[#allocation8_spill] sm:$0xff] %v4511_v33 }
 0x1a0   : > { %v4513_v11 = vpop.f32.mrf.mxu1  ;;  %v4515_v3 = vpop.f32.mrf.mxu0 }
 0x1a1   : > { %4873 = vst [vmem:[#allocation11_spill] sm:$0xff] %v4513_v11  ;;  %4874 = vst [vmem:[#allocation19_spill] sm:$0xff] %v4515_v3 }
 0x1a2   : > { %v4517_v52 = vpop.f32.mrf.mxu1  ;;  %v4519_v36 = vpop.f32.mrf.mxu0 }
 0x1a3   : > { %4875 = vst [vmem:[#allocation20_spill] sm:$0xff] %v4517_v52  ;;  %4876 = vst [vmem:[#allocation21_spill] sm:$0xff] %v4519_v36 }
 0x1a4   : > { %v4521_v4 = vpop.f32.mrf.mxu1  ;;  %v4523_v32 = vpop.f32.mrf.mxu0 }
 0x1a5   : > { %4877 = vst [vmem:[#allocation22_spill] sm:$0xff] %v4521_v4  ;;  %4878 = vst [vmem:[#allocation23_spill] sm:$0xff] %v4523_v32 }
 0x1a6   : > { %v4525_v40 = vpop.f32.mrf.mxu1  ;;  %v4527_v6 = vpop.f32.mrf.mxu0 }
 0x1a7   : > { %4879 = vst [vmem:[#allocation24_spill] sm:$0xff] %v4525_v40  ;;  %4880 = vst [vmem:[#allocation25_spill] sm:$0xff] %v4527_v6 }
 0x1a8   : > { %v4529_v25 = vpop.f32.mrf.mxu1  ;;  %v4531_v46 = vpop.f32.mrf.mxu0 }
 0x1a9   : > { %4881 = vst [vmem:[#allocation26_spill] sm:$0xff] %v4529_v25  ;;  %4882 = vst [vmem:[#allocation27_spill] sm:$0xff] %v4531_v46 }
 0x1aa   : > { %v4533_v33 = vpop.f32.mrf.mxu1  ;;  %v4535_v11 = vpop.f32.mrf.mxu0 }
 0x1ab   : > { %4883 = vst [vmem:[#allocation28_spill] sm:$0xff] %v4533_v33  ;;  %4884 = vst [vmem:[#allocation29_spill] sm:$0xff] %v4535_v11 }
 0x1ac   : > { %v4537_v3 = vpop.f32.mrf.mxu1  ;;  %v4539_v52 = vpop.f32.mrf.mxu0 }
 0x1ad   : > { %4885 = vst [vmem:[#allocation30_spill] sm:$0xff] %v4537_v3  ;;  %4886 = vst [vmem:[#allocation31_spill] sm:$0xff] %v4539_v52  ;;  %v1851_v52 = vadd.f32 %v3188_v14, %v4348_v39  ;;  %v1850_v39 = vadd.f32 %v4453_v12, %v4357_v20 }
 0x1ae   : > { %v4541_v36 = vpop.f32.mrf.mxu1  ;;  %v4543_v4 = vpop.f32.mrf.mxu0 }
 0x1af   : > { %4887 = vst [vmem:[#allocation32_spill] sm:$0xff] %v4541_v36  ;;  %4888 = vst [vmem:[#allocation33_spill] sm:$0xff] %v4543_v4 }
 0x1b0   : > { %v4545_v32 = vpop.f32.mrf.mxu1  ;;  %v4547_v40 = vpop.f32.mrf.mxu0 }
 0x1b1   : > { %4889 = vst [vmem:[#allocation34_spill] sm:$0xff] %v4545_v32  ;;  %4890 = vst [vmem:[#allocation35_spill] sm:$0xff] %v4547_v40  ;;  %v1849_v40 = vadd.f32 %v1722_v5, %v4351_v51  ;;  %v4580_v51 = vld [vmem:[%s4773_s2] ss:$0 sm:$0xff] }
 0x1b2   : > { %v4549_v6 = vpop.f32.mrf.mxu1  ;;  %v4551_v25 = vpop.f32.mrf.mxu0 }
 0x1b3   : > { %4891 = vst [vmem:[#allocation36_spill] sm:$0xff] %v4549_v6  ;;  %4892 = vst [vmem:[#allocation37_spill] sm:$0xff] %v4551_v25 }
 0x1b4   : > { %v4553_v46 = vpop.f32.mrf.mxu1  ;;  %v4555_v33 = vpop.f32.mrf.mxu0 }
 0x1b5   : > { %4893 = vst [vmem:[#allocation38_spill] sm:$0xff] %v4553_v46  ;;  %4894 = vst [vmem:[#allocation39_spill] sm:$0xff] %v4555_v33  ;;  %v2059_v46 = vadd.f32 %v4438_v56, %v1851_v52  ;;  %v1852_v33 = vadd.f32 %v4449_v2, %v4354_v49 }
 0x1b6   : > { %v4557_v11 = vpop.f32.mrf.mxu1  ;;  %v4559_v3 = vpop.f32.mrf.mxu0 }
 0x1b7   : > { %4895 = vst [vmem:[#allocation40_spill] sm:$0xff] %v4557_v11  ;;  %4896 = vst [vmem:[#allocation41_spill] sm:$0xff] %v4559_v3  ;;  %v2057_v3 = vadd.f32 %v4443_v37, %v1849_v40  ;;  %v2060_v49 = vadd.f32 %v4447_v21, %v1852_v33  ;;  %v1853_v40 = vadd.f32 %v4461_v61, %v4363_v35 }
 0x1b8   : > { %v4562_v36 = vpop.f32.mrf.mxu1  ;;  %v4564_v4 = vpop.f32.mrf.mxu0 }
 0x1b9   : > { %4897 = vst [vmem:[#allocation42_spill] sm:$0xff] %v4564_v4  ;;  %v1855_v4 = vadd.f32 %v4457_v62, %v4360_v57 }
 0x1ba   : > { %v4567_v6 = vpop.f32.mrf.mxu1  ;;  %v3290_v25 = vpop.f32.mrf.mxu0 }
 0x1bb   : > { %4898 = vst [vmem:[#allocation43_spill] sm:$0xff] %v4567_v6  ;;  %v2063_v62 = vadd.f32 %v4455_v18, %v1855_v4  ;;  %v1856_v6 = vadd.f32 %v4465_v41, %v4366_v58  ;;  %v1854_v4 = vadd.f32 %v4469_v19, %v4369_v15 }
 0x1bc   : > { %v3256_v11 = vpop.f32.mrf.mxu1  ;;  %v2363_v32 = vpop.f32.mrf.mxu0 }
 0x1bd   : > { %v2277_v14 = vadd.f32 %v3256_v11, %v2059_v46  ;;  %v2058_v11 = vadd.f32 %v4451_v29, %v1850_v39  ;;  %v2061_v29 = vadd.f32 %v4459_v31, %v1853_v40  ;;  %v2062_v40 = vadd.f32 %v4467_v7, %v1854_v4 }
 0x1be   : > { %v2148_v52 = vpop.f32.mrf.mxu1  ;;  %v3291_v56 = vpop.f32.mrf.mxu0  ;;  %v1863_v4 = vadd.f32 %v4489_v38, %v4384_v9 }
 0x1bf   : > { %v2492_v5 = vadd.f32 %v3290_v25, %v2277_v14  ;;  %v2275_v2 = vadd.f32 %v2148_v52, %v2057_v3  ;;  %v2064_v52 = vadd.f32 %v4463_v23, %v1856_v6 }
 0x1c0   : > { %v3257_v20 = vpop.f32.mrf.mxu1  ;;  %v2366_v46 = vpop.f32.mrf.mxu0 }
 0x1c1   : > { %v2531_v57 = vadd.f32 %v4580_v51, %v2492_v5  ;;  %v2490_v37 = vadd.f32 %v2363_v32, %v2275_v2  ;;  %v2278_v12 = vadd.f32 %v3257_v20, %v2060_v49  ;;  %v1857_v20 = vadd.f32 %v4477_v1, %v4375_v34 }
 0x1c2   : > { %v2151_v35 = vpop.f32.mrf.mxu1  ;;  %v3294_v3 = vpop.f32.mrf.mxu0 }
 0x1c3   : > { %v2563_v33 = vmax.f32 %v2531_v57, 0.0  ;;  %v2529_v25 = vadd.f32 %v4580_v51, %v2490_v37  ;;  %v2493_v21 = vadd.f32 %v3291_v56, %v2278_v12  ;;  %v2276_v32 = vadd.f32 %v2151_v35, %v2058_v11 }
 0x1c4   : > { %v3260_v58 = vpop.f32.mrf.mxu1  ;;  %v2379_v18 = vpop.f32.mrf.mxu0  ;;  %v1859_v56 = vadd.f32 %v4473_v24, %v4372_v30  ;;  %v1860_v37 = vadd.f32 %v4481_v63, %v4378_v22 }
 0x1c5   : > { %2595 = vst.msk [vmem:[%s4594_s15 + $0x10] sm:$0xff] %vm429_vm2, %v2563_v33  ;;  %v2561_v61 = vmax.f32 %v2529_v25, 0.0  ;;  %v2532_v41 = vadd.f32 %v4580_v51, %v2493_v21  ;;  %v2491_v39 = vadd.f32 %v2366_v46, %v2276_v32  ;;  %v2281_v14 = vadd.f32 %v3260_v58, %v2063_v62 }
 0x1c6   : > { %v2164_v49 = vpop.f32.mrf.mxu1  ;;  %v3295_v31 = vpop.f32.mrf.mxu0  ;;  %v2067_v57 = vadd.f32 %v4471_v13, %v1859_v56  ;;  %v1858_v33 = vadd.f32 %v4485_v53, %v4381_v27 }
 0x1c7   : > { %2593 = vst.msk [vmem:[%s4594_s15] sm:$0xff] %vm429_vm2, %v2561_v61  ;;  %v2564_v15 = vmax.f32 %v2532_v41, 0.0  ;;  %v2530_v19 = vadd.f32 %v4580_v51, %v2491_v39  ;;  %v2496_v5 = vadd.f32 %v3294_v3, %v2281_v14  ;;  %v2279_v2 = vadd.f32 %v2164_v49, %v2061_v29 }
 0x1c8   : > { %v3261_v46 = vpop.f32.mrf.mxu1  ;;  %v2382_v6 = vpop.f32.mrf.mxu0  ;;  %v2065_v3 = vadd.f32 %v4475_v54, %v1857_v20  ;;  %v2068_v29 = vadd.f32 %v4479_v60, %v1860_v37  ;;  %v2066_v41 = vadd.f32 %v4483_v8, %v1858_v33  ;;  %v1861_v39 = vadd.f32 %v4493_v47, %v4387_v0 }
 0x1c9   : > { %2596 = vst.msk [vmem:[%s4594_s15 + $0x18] sm:$0xff] %vm429_vm2, %v2564_v15  ;;  %v2562_v30 = vmax.f32 %v2530_v19, 0.0  ;;  %v2535_v23 = vadd.f32 %v4580_v51, %v2496_v5  ;;  %v2494_v24 = vadd.f32 %v2379_v18, %v2279_v2  ;;  %v2282_v11 = vadd.f32 %v3261_v46, %v2064_v52 }
 0x1ca   : > { %v2167_v12 = vpop.f32.mrf.mxu1  ;;  %v3298_v7 = vpop.f32.mrf.mxu0  ;;  %v2071_v49 = vadd.f32 %v4487_v17, %v1863_v4  ;;  %v2069_v2 = vadd.f32 %v4491_v48, %v1861_v39  ;;  %v4905_v39 = vld [vmem:[#allocation6_spill] sm:$0xff] }
 0x1cb   : > { %2594 = vst.msk [vmem:[%s4594_s15 + $0x8] sm:$0xff] %vm429_vm2, %v2562_v30  ;;  %v2567_v34 = vmax.f32 %v2535_v23, 0.0  ;;  %v2533_v1 = vadd.f32 %v4580_v51, %v2494_v24  ;;  %v2497_v62 = vadd.f32 %v3295_v31, %v2282_v11  ;;  %v2280_v35 = vadd.f32 %v2167_v12, %v2062_v40 }
 0x1cc   : > { %v3264_v25 = vpop.f32.mrf.mxu1  ;;  %v2395_v13 = vpop.f32.mrf.mxu0  ;;  %v1864_v31 = vadd.f32 %v4497_v50, %v4390_v16  ;;  %v1862_v40 = vadd.f32 %v4501_v43, %v4393_v45  ;;  %v1867_v23 = vadd.f32 %v4505_v26, %v4396_v10  ;;  %v1865_v12 = vadd.f32 %v4509_v44, %v4399_v55 }
 0x1cd   : > { %2599 = vst.msk [vmem:[%s4594_s15 + $0x30] sm:$0xff] %vm429_vm2, %v2567_v34  ;;  %v2565_v22 = vmax.f32 %v2533_v1, 0.0  ;;  %v2536_v63 = vadd.f32 %v4580_v51, %v2497_v62  ;;  %v2495_v21 = vadd.f32 %v2382_v6, %v2280_v35  ;;  %v2285_v32 = vadd.f32 %v3264_v25, %v2067_v57  ;;  %v4899_v35 = vld [vmem:[#allocation14_spill] sm:$0xff] }
 0x1ce   : > { %v2180_v58 = vpop.f32.mrf.mxu1  ;;  %v3299_v54 = vpop.f32.mrf.mxu0  ;;  %v2072_v30 = vadd.f32 %v4495_v28, %v1864_v31  ;;  %v2070_v37 = vadd.f32 %v4499_v42, %v1862_v40  ;;  %v2075_v62 = vadd.f32 %v4503_v59, %v1867_v23 }
 0x1cf   : > { %2597 = vst.msk [vmem:[%s4594_s15 + $0x20] sm:$0xff] %vm429_vm2, %v2565_v22  ;;  %v2568_v27 = vmax.f32 %v2536_v63, 0.0  ;;  %v2534_v53 = vadd.f32 %v4580_v51, %v2495_v21  ;;  %v2500_v18 = vadd.f32 %v3298_v7, %v2285_v32  ;;  %v2283_v61 = vadd.f32 %v2180_v58, %v2065_v3  ;;  %v4900_v3 = vld [vmem:[#allocation11_spill] sm:$0xff]  ;;  %v4901_v63 = vld [vmem:[#allocation5_spill] sm:$0xff] }
 0x1d0   : > { %v3265_v14 = vpop.f32.mrf.mxu1  ;;  %v2398_v60 = vpop.f32.mrf.mxu0  ;;  %v1868_v33 = vadd.f32 %v4900_v3, %v4899_v35  ;;  %v2073_v21 = vadd.f32 %v4901_v63, %v1865_v12  ;;  %v4902_v32 = vld [vmem:[#allocation3_spill] sm:$0xff] }
 0x1d1   : > { %2600 = vst.msk [vmem:[%s4594_s15 + $0x38] sm:$0xff] %vm429_vm2, %v2568_v27  ;;  %v2566_v9 = vmax.f32 %v2534_v53, 0.0  ;;  %v2539_v38 = vadd.f32 %v4580_v51, %v2500_v18  ;;  %v2498_v52 = vadd.f32 %v2395_v13, %v2283_v61  ;;  %v2286_v56 = vadd.f32 %v3265_v14, %v2068_v29  ;;  %v4903_v29 = vld [vmem:[#allocation20_spill] sm:$0xff]  ;;  %v4906_v14 = vld [vmem:[#allocation22_spill] sm:$0xff] }
 0x1d2   : > { %v2183_v15 = vpop.f32.mrf.mxu1  ;;  %v3302_v8 = vpop.f32.mrf.mxu0  ;;  %v1866_v4 = vadd.f32 %v4903_v29, %v4902_v32  ;;  %v4904_v61 = vld [vmem:[#allocation8_spill] sm:$0xff] }
 0x1d3   : > { %2598 = vst.msk [vmem:[%s4594_s15 + $0x28] sm:$0xff] %vm429_vm2, %v2566_v9  ;;  %v2571_v0 = vmax.f32 %v2539_v38, 0.0  ;;  %v2537_v47 = vadd.f32 %v4580_v51, %v2498_v52  ;;  %v2501_v19 = vadd.f32 %v3299_v54, %v2286_v56  ;;  %v2284_v5 = vadd.f32 %v2183_v15, %v2066_v41  ;;  %v4907_v15 = vld [vmem:[#allocation19_spill] sm:$0xff] }
 0x1d4   : > { %v3268_v20 = vpop.f32.mrf.mxu1  ;;  %v2411_v17 = vpop.f32.mrf.mxu0  ;;  %v2076_v41 = vadd.f32 %v4904_v61, %v1868_v33  ;;  %v4916_v33 = vld [vmem:[#allocation25_spill] sm:$0xff] }
 0x1d5   : > { %2603 = vst.msk [vmem:[%s4594_s15 + $0x50] sm:$0xff] %vm429_vm2, %v2571_v0  ;;  %v2569_v16 = vmax.f32 %v2537_v47, 0.0  ;;  %v2540_v50 = vadd.f32 %v4580_v51, %v2501_v19  ;;  %v2499_v46 = vadd.f32 %v2398_v60, %v2284_v5  ;;  %v2289_v6 = vadd.f32 %v3268_v20, %v2071_v49  ;;  %v4908_v0 = vld [vmem:[#allocation9_spill] sm:$0xff]  ;;  %v4909_v47 = vld [vmem:[#allocation24_spill] sm:$0xff] }
 0x1d6   : > { %v2196_v24 = vpop.f32.mrf.mxu1  ;;  %v3303_v48 = vpop.f32.mrf.mxu0  ;;  %v1871_v60 = vadd.f32 %v4906_v14, %v4905_v39  ;;  %v1869_v19 = vadd.f32 %v4909_v47, %v4908_v0 }
 0x1d7   : > { %2601 = vst.msk [vmem:[%s4594_s15 + $0x40] sm:$0xff] %vm429_vm2, %v2569_v16  ;;  %v2572_v45 = vmax.f32 %v2540_v50, 0.0  ;;  %v2538_v43 = vadd.f32 %v4580_v51, %v2499_v46  ;;  %v2504_v11 = vadd.f32 %v3302_v8, %v2289_v6  ;;  %v2287_v57 = vadd.f32 %v2196_v24, %v2069_v2  ;;  %v4910_v50 = vld [vmem:[#allocation21_spill] sm:$0xff] }
 0x1d8   : > { %v3269_v7 = vpop.f32.mrf.mxu1  ;;  %v2414_v28 = vpop.f32.mrf.mxu0  ;;  %v2074_v8 = vadd.f32 %v4907_v15, %v1866_v4  ;;  %v2079_v46 = vadd.f32 %v4910_v50, %v1871_v60  ;;  %v4911_v6 = vld [vmem:[#allocation13_spill] sm:$0xff]  ;;  %v4919_v4 = vld [vmem:[#allocation27_spill] sm:$0xff] }
 0x1d9   : > { %2604 = vst.msk [vmem:[%s4594_s15 + $0x58] sm:$0xff] %vm429_vm2, %v2572_v45  ;;  %v2570_v10 = vmax.f32 %v2538_v43, 0.0  ;;  %v2543_v26 = vadd.f32 %v4580_v51, %v2504_v11  ;;  %v2502_v34 = vadd.f32 %v2411_v17, %v2287_v57  ;;  %v2290_v1 = vadd.f32 %v3269_v7, %v2072_v30  ;;  %v4912_v30 = vld [vmem:[#allocation26_spill] sm:$0xff]  ;;  %v4914_v7 = vld [vmem:[#allocation16_spill] sm:$0xff]  ;;  %v4922_v60 = vld [vmem:[#allocation29_spill] sm:$0xff] }
 0x1da   : > { %v2199_v25 = vpop.f32.mrf.mxu1  ;;  %v3306_v42 = vpop.f32.mrf.mxu0  ;;  %v1872_v23 = vadd.f32 %v4912_v30, %v4911_v6 }
 0x1db   : > { %2602 = vst.msk [vmem:[%s4594_s15 + $0x48] sm:$0xff] %vm429_vm2, %v2570_v10  ;;  %v2575_v55 = vmax.f32 %v2543_v26, 0.0  ;;  %v2541_v44 = vadd.f32 %v4580_v51, %v2502_v34  ;;  %v2505_v13 = vadd.f32 %v3303_v48, %v2290_v1  ;;  %v2288_v22 = vadd.f32 %v2199_v25, %v2070_v37  ;;  %v4913_v37 = vld [vmem:[#allocation23_spill] sm:$0xff] }
 0x1dc   : > { %v3272_v58 = vpop.f32.mrf.mxu1  ;;  %v2427_v59 = vpop.f32.mrf.mxu0  ;;  %v2077_v12 = vadd.f32 %v4913_v37, %v1869_v19  ;;  %v2080_v25 = vadd.f32 %v4916_v33, %v1872_v23  ;;  %v4925_v19 = vld [vmem:[#allocation31_spill] sm:$0xff]  ;;  %v4928_v23 = vld [vmem:[#allocation33_spill] sm:$0xff] }
 0x1dd   : > { %2607 = vst.msk [vmem:[%s4594_s15 + $0x70] sm:$0xff] %vm429_vm2, %v2575_v55  ;;  %v2573_v54 = vmax.f32 %v2541_v44, 0.0  ;;  %v2544_v27 = vadd.f32 %v4580_v51, %v2505_v13  ;;  %v2503_v53 = vadd.f32 %v2414_v28, %v2288_v22  ;;  %v2293_v18 = vadd.f32 %v3272_v58, %v2075_v62  ;;  %v4915_v28 = vld [vmem:[#allocation28_spill] sm:$0xff]  ;;  %v4918_v55 = vld [vmem:[#allocation30_spill] sm:$0xff] }
 0x1de   : > { %v2212_v9 = vpop.f32.mrf.mxu1  ;;  %v3307_v38 = vpop.f32.mrf.mxu0  ;;  %v1870_v10 = vadd.f32 %v4915_v28, %v4914_v7 }
 0x1df   : > { %2605 = vst.msk [vmem:[%s4594_s15 + $0x60] sm:$0xff] %vm429_vm2, %v2573_v54  ;;  %v2576_v52 = vmax.f32 %v2544_v27, 0.0  ;;  %v2542_v56 = vadd.f32 %v4580_v51, %v2503_v53  ;;  %v2508_v49 = vadd.f32 %v3306_v42, %v2293_v18  ;;  %v2291_v31 = vadd.f32 %v2212_v9, %v2073_v21  ;;  %v4917_v42 = vld [vmem:[#allocation17_spill] sm:$0xff]  ;;  %v4921_v54 = vld [vmem:[#allocation32_spill] sm:$0xff] }
 0x1e0   : > { %v3273_v5 = vpop.f32.mrf.mxu1  ;;  %v2430_v2 = vpop.f32.mrf.mxu0  ;;  %v1875_v44 = vadd.f32 %v4918_v55, %v4917_v42  ;;  %v2078_v58 = vadd.f32 %v4919_v4, %v1870_v10  ;;  %v4931_v10 = vld [vmem:[#allocation35_spill] sm:$0xff] }
 0x1e1   : > { %2608 = vst.msk [vmem:[%s4594_s15 + $0x78] sm:$0xff] %vm429_vm2, %v2576_v52  ;;  %v2574_v40 = vmax.f32 %v2542_v56, 0.0  ;;  %v2547_v20 = vadd.f32 %v4580_v51, %v2508_v49  ;;  %v2506_v17 = vadd.f32 %v2427_v59, %v2291_v31  ;;  %v2294_v16 = vadd.f32 %v3273_v5, %v2076_v41  ;;  %v4920_v59 = vld [vmem:[#allocation18_spill] sm:$0xff] }
 0x1e2   : > { %v2215_v24 = vpop.f32.mrf.mxu1  ;;  %v3310_v48 = vpop.f32.mrf.mxu0  ;;  %v1873_v27 = vadd.f32 %v4921_v54, %v4920_v59  ;;  %v2083_v9 = vadd.f32 %v4922_v60, %v1875_v44  ;;  %v4924_v52 = vld [vmem:[#allocation34_spill] sm:$0xff]  ;;  %v4934_v44 = vld [vmem:[#allocation37_spill] sm:$0xff]  ;;  %v4936_v54 = vld [vmem:[#allocation39_spill] sm:$0xff] }
 0x1e3   : > { %2606 = vst.msk [vmem:[%s4594_s15 + $0x68] sm:$0xff] %vm429_vm2, %v2574_v40  ;;  %v2579_v45 = vmax.f32 %v2547_v20, 0.0  ;;  %v2545_v43 = vadd.f32 %v4580_v51, %v2506_v17  ;;  %v2509_v11 = vadd.f32 %v3307_v38, %v2294_v16  ;;  %v2292_v57 = vadd.f32 %v2215_v24, %v2074_v8  ;;  %v4923_v38 = vld [vmem:[#allocation4_spill] sm:$0xff] }
 0x1e4   : > { %v3276_v26 = vpop.f32.mrf.mxu1  ;;  %v2443_v34 = vpop.f32.mrf.mxu0  ;;  %v1876_v56 = vadd.f32 %v4924_v52, %v4923_v38  ;;  %v2081_v5 = vadd.f32 %v4925_v19, %v1873_v27  ;;  %v4927_v40 = vld [vmem:[#allocation36_spill] sm:$0xff]  ;;  %v4939_v38 = vld [vmem:[#allocation41_spill] sm:$0xff] }
 0x1e5   : > { %2611 = vst.msk [vmem:[%s4594_s15 + $0x90] sm:$0xff] %vm429_vm2, %v2579_v45  ;;  %v2577_v1 = vmax.f32 %v2545_v43, 0.0  ;;  %v2548_v62 = vadd.f32 %v4580_v51, %v2509_v11  ;;  %v2507_v35 = vadd.f32 %v2430_v2, %v2292_v57  ;;  %v2297_v3 = vadd.f32 %v3276_v26, %v2079_v46  ;;  %v4926_v2 = vld [vmem:[#allocation2_spill] sm:$0xff] }
 0x1e6   : > { %v2228_v13 = vpop.f32.mrf.mxu1  ;;  %v3311_v22 = vpop.f32.mrf.mxu0  ;;  %v1874_v20 = vadd.f32 %v4927_v40, %v4926_v2  ;;  %v2084_v24 = vadd.f32 %v4928_v23, %v1876_v56  ;;  %v4930_v45 = vld [vmem:[#allocation38_spill] sm:$0xff] }
 0x1e7   : > { %2609 = vst.msk [vmem:[%s4594_s15 + $0x80] sm:$0xff] %vm429_vm2, %v2577_v1  ;;  %v2580_v63 = vmax.f32 %v2548_v62, 0.0  ;;  %v2546_v21 = vadd.f32 %v4580_v51, %v2507_v35  ;;  %v2512_v32 = vadd.f32 %v3310_v48, %v2297_v3  ;;  %v2295_v29 = vadd.f32 %v2228_v13, %v2077_v12  ;;  %v4929_v48 = vld [vmem:[#allocation7_spill] sm:$0xff]  ;;  %v4933_v1 = vld [vmem:[#allocation40_spill] sm:$0xff] }
 0x1e8   : > { %v3277_v53 = vpop.f32.mrf.mxu1  ;;  %v2446_v18 = vpop.f32.mrf.mxu0  ;;  %v1879_v43 = vadd.f32 %v4930_v45, %v4929_v48  ;;  %v2082_v26 = vadd.f32 %v4931_v10, %v1874_v20 }
 0x1e9   : > { %2612 = vst.msk [vmem:[%s4594_s15 + $0x98] sm:$0xff] %vm429_vm2, %v2580_v63  ;;  %v2578_v61 = vmax.f32 %v2546_v21, 0.0  ;;  %v2551_v41 = vadd.f32 %v4580_v51, %v2512_v32  ;;  %v2510_v39 = vadd.f32 %v2443_v34, %v2295_v29  ;;  %v2298_v14 = vadd.f32 %v3277_v53, %v2080_v25  ;;  %v4932_v34 = vld [vmem:[#allocation10_spill] sm:$0xff]  ;;  %v4937_v53 = vld [vmem:[#allocation15_spill] sm:$0xff] }
 0x1ea   : > { %v2231_v49 = vpop.f32.mrf.mxu1  ;;  %v3314_v31 = vpop.f32.mrf.mxu0  ;;  %v1877_v62 = vadd.f32 %v4933_v1, %v4932_v34  ;;  %v2087_v13 = vadd.f32 %v4934_v44, %v1879_v43 }
 0x1eb   : > { %2610 = vst.msk [vmem:[%s4594_s15 + $0x88] sm:$0xff] %vm429_vm2, %v2578_v61  ;;  %v2583_v15 = vmax.f32 %v2551_v41, 0.0  ;;  %v2549_v8 = vadd.f32 %v4580_v51, %v2510_v39  ;;  %v2513_v0 = vadd.f32 %v3311_v22, %v2298_v14  ;;  %v2296_v47 = vadd.f32 %v2231_v49, %v2078_v58  ;;  %v4935_v22 = vld [vmem:[#allocation12_spill] sm:$0xff] }
 0x1ec   : > { %v3280_v17 = vpop.f32.mrf.mxu1  ;;  %v2459_v16 = vpop.f32.mrf.mxu0  ;;  %v1880_v63 = vadd.f32 %v4562_v36, %v4935_v22  ;;  %v2085_v27 = vadd.f32 %v4936_v54, %v1877_v62 }
 0x1ed   : > { %2615 = vst.msk [vmem:[%s4594_s15 + $0xb0] sm:$0xff] %vm429_vm2, %v2583_v15  ;;  %v2581_v50 = vmax.f32 %v2549_v8, 0.0  ;;  %v2552_v46 = vadd.f32 %v4580_v51, %v2513_v0  ;;  %v2511_v6 = vadd.f32 %v2446_v18, %v2296_v47  ;;  %v2301_v30 = vadd.f32 %v3280_v17, %v2083_v9  ;;  %v4938_v18 = vld [vmem:[#allocation43_spill] sm:$0xff]  ;;  %v4940_v0 = vld [vmem:[#allocation42_spill] sm:$0xff] }
 0x1ee   : > { %v2244_v11 = vpop.f32.mrf.mxu1  ;;  %v3315_v57 = vpop.f32.mrf.mxu0  ;;  %v1878_v61 = vadd.f32 %v4938_v18, %v4937_v53  ;;  %v2088_v52 = vadd.f32 %v4939_v38, %v1880_v63 }
 0x1ef   : > { %2613 = vst.msk [vmem:[%s4594_s15 + $0xa0] sm:$0xff] %vm429_vm2, %v2581_v50  ;;  %v2584_v37 = vmax.f32 %v2552_v46, 0.0  ;;  %v2550_v12 = vadd.f32 %v4580_v51, %v2511_v6  ;;  %v2516_v7 = vadd.f32 %v3314_v31, %v2301_v30  ;;  %v2299_v28 = vadd.f32 %v2244_v11, %v2081_v5 }
 0x1f0   : > { %v3281_v35 = vpop.f32.mrf.mxu1  ;;  %v2462_v3 = vpop.f32.mrf.mxu0  ;;  %v2086_v47 = vadd.f32 %v4940_v0, %v1878_v61 }
 0x1f1   : > { %2616 = vst.msk [vmem:[%s4594_s15 + $0xb8] sm:$0xff] %vm429_vm2, %v2584_v37  ;;  %v2582_v33 = vmax.f32 %v2550_v12, 0.0  ;;  %v2555_v25 = vadd.f32 %v4580_v51, %v2516_v7  ;;  %v2514_v42 = vadd.f32 %v2459_v16, %v2299_v28  ;;  %v2302_v55 = vadd.f32 %v3281_v35, %v2084_v24 }
 0x1f2   : > { %v2247_v21 = vpop.f32.mrf.mxu1  ;;  %v3318_v32 = vpop.f32.mrf.mxu0 }
 0x1f3   : > { %2614 = vst.msk [vmem:[%s4594_s15 + $0xa8] sm:$0xff] %vm429_vm2, %v2582_v33  ;;  %v2587_v29 = vmax.f32 %v2555_v25, 0.0  ;;  %v2553_v4 = vadd.f32 %v4580_v51, %v2514_v42  ;;  %v2517_v58 = vadd.f32 %v3315_v57, %v2302_v55  ;;  %v2300_v59 = vadd.f32 %v2247_v21, %v2082_v26 }
 0x1f4   : > { %v3284_v41 = vpop.f32.mrf.mxu1  ;;  %v2475_v39 = vpop.f32.mrf.mxu0 }
 0x1f5   : > { %2619 = vst.msk [vmem:[%s4594_s15 + $0xd0] sm:$0xff] %vm429_vm2, %v2587_v29  ;;  %v2585_v36 = vmax.f32 %v2553_v4, 0.0  ;;  %v2556_v14 = vadd.f32 %v4580_v51, %v2517_v58  ;;  %v2515_v60 = vadd.f32 %v2462_v3, %v2300_v59  ;;  %v2305_v9 = vadd.f32 %v3284_v41, %v2087_v13 }
 0x1f6   : > { %v2260_v56 = vpop.f32.mrf.mxu1  ;;  %v3319_v5 = vpop.f32.mrf.mxu0 }
 0x1f7   : > { %2617 = vst.msk [vmem:[%s4594_s15 + $0xc0] sm:$0xff] %vm429_vm2, %v2585_v36  ;;  %v2588_v49 = vmax.f32 %v2556_v14, 0.0  ;;  %v2554_v31 = vadd.f32 %v4580_v51, %v2515_v60  ;;  %v2520_v15 = vadd.f32 %v3318_v32, %v2305_v9  ;;  %v2303_v8 = vadd.f32 %v2260_v56, %v2085_v27 }
 0x1f8   : > { %v3285_v19 = vpop.f32.mrf.mxu1  ;;  %v2478_v23 = vpop.f32.mrf.mxu0 }
 0x1f9   : > { %2620 = vst.msk [vmem:[%s4594_s15 + $0xd8] sm:$0xff] %vm429_vm2, %v2588_v49  ;;  %v2586_v2 = vmax.f32 %v2554_v31, 0.0  ;;  %v2559_v40 = vadd.f32 %v4580_v51, %v2520_v15  ;;  %v2518_v20 = vadd.f32 %v2475_v39, %v2303_v8  ;;  %v2306_v17 = vadd.f32 %v3285_v19, %v2088_v52 }
 0x1fa   : > { %v2263_v16 = vpop.f32.mrf.mxu1 }
 0x1fb   : > { %2618 = vst.msk [vmem:[%s4594_s15 + $0xc8] sm:$0xff] %vm429_vm2, %v2586_v2  ;;  %v2591_v50 = vmax.f32 %v2559_v40, 0.0  ;;  %v2557_v46 = vadd.f32 %v4580_v51, %v2518_v20  ;;  %v2521_v6 = vadd.f32 %v3319_v5, %v2306_v17  ;;  %v2304_v30 = vadd.f32 %v2263_v16, %v2086_v47 }
 0x1fd   : > { %2623 = vst.msk [vmem:[%s4594_s15 + $0xf0] sm:$0xff] %vm429_vm2, %v2591_v50  ;;  %v2589_v24 = vmax.f32 %v2557_v46, 0.0  ;;  %v2560_v48 = vadd.f32 %v4580_v51, %v2521_v6  ;;  %v2519_v45 = vadd.f32 %v2478_v23, %v2304_v30 }
 0x1ff   : > { %2621 = vst.msk [vmem:[%s4594_s15 + $0xe0] sm:$0xff] %vm429_vm2, %v2589_v24  ;;  %v2592_v43 = vmax.f32 %v2560_v48, 0.0  ;;  %v2558_v11 = vadd.f32 %v4580_v51, %v2519_v45 }
 0x201   : > { %2624 = vst.msk [vmem:[%s4594_s15 + $0xf8] sm:$0xff] %vm429_vm2, %v2592_v43  ;;  %v2590_v57 = vmax.f32 %v2558_v11, 0.0 }
 0x203   : > { %2622 = vst.msk [vmem:[%s4594_s15 + $0xe8] sm:$0xff] %vm429_vm2, %v2590_v57 }
 0x204 PF: > { %s13_s12 = sadd.s32 1, %s3356_s12  }
 0x205   : > { %p10_p4 = scmp.ge.s32.totalorder %s13_s12, 4  }
 0x207   :  { %12 = sbr.rel (!%p10_p4) target bundleno = 1 (0x1), region = 70 }

</bundles_post_ra>
